<compile_context>
chip_gen: v7x
topology: tpu7x:2x2x1
jax: 0.10.0
libtpu: 0.0.40
codegen_flags: <defaults>
</compile_context>

<pallas_src>
import functools

import jax
import jax.numpy as jnp
from jax import lax
from jax.experimental import pallas as pl
from jax.experimental.pallas import tpu as pltpu


# ----------------------------- Config ---------------------------------------
class Config:
    word_vocab_size = 128
    word_embed_size = 32
    topic_vocab_size = 16
    topic_embed_size = 8
    act_vocab_size = 8
    act_embed_size = 8
    max_utt_length = 8
    sent_hidden_size = 32          # utterance-encoder output dim
    ctx_hidden_size = 32           # context-encoder last-state dim
    latent_size = 16
    use_hcf = True
    prior_input_size = topic_embed_size + 4 + 4 + ctx_hidden_size            # 48
    recog_input_size = prior_input_size + sent_hidden_size + act_embed_size  # 88


# ------------------------ static layout constants ----------------------------
V = Config.word_vocab_size
E = Config.word_embed_size
TV = Config.topic_vocab_size
TE = Config.topic_embed_size
A = Config.act_vocab_size
AE = Config.act_embed_size
UTT = Config.max_utt_length
S = Config.sent_hidden_size
H = Config.ctx_hidden_size
L = Config.latent_size
CD = Config.prior_input_size       # cond width (48)
GD = CD + L                        # gen width (64)
ED = GD + AE                       # enc_outputs width (72)
PH = max(2 * L, 100)               # prior hidden
BH = 100                           # bow hidden (MLPby surrogate)

# lanes of the (B, 128) "feat" scratch row
FEAT_W = 128
F_TOPIC, F_MYP, F_OTP, F_CTX = 0, TE, TE + 4, TE + 8
F_LAT, F_ACT, F_UTTO, F_AFC = CD, GD, ED, ED + S
assert F_AFC + AE <= FEAT_W

# bias rows inside the "biases" block of the weight slab
(B_UTT, B_CTX, B_AFC, B_RECOG, B_PRIOR1,
 B_PRIOR2, B_BOW1, B_BOW2, B_ACTPROJ, B_DEC) = range(10)


def _round8(n):
    return (n + 7) // 8 * 8


_WSLAB_SPEC = (
    ("word_to_sent", V),       # word_emb @ W_utt           (V, S)
    ("word_to_vocab", V),      # word_emb @ W_dec_emb       (V, V)
    ("topic_emb", TV),         # (TV, TE)
    ("act_emb", A),            # (A, AE)
    ("w_act_fc", AE),          # (AE, AE)
    ("w_ctx", S + 2),          # (S+2, H): rows 0:S sent, row S floor0, S+1 floor1
    ("w_recog", FEAT_W),       # feat-row-space (128, 2L)
    ("w_prior1", FEAT_W),      # feat-row-space (128, PH)
    ("w_prior2", PH),          # (PH, 2L)
    ("w_bow1", FEAT_W),        # feat-row-space (128, BH)
    ("w_bow2", BH),            # (BH, V)
    ("w_actproj", FEAT_W),     # feat-row-space (128, A)
    ("w_decenc", FEAT_W),      # feat-row-space (128, V)
    ("biases", 16),            # one bias per row, lane offset 0
)

W_LAYOUT = {}
_off = 0
for _name, _rows in _WSLAB_SPEC:
    W_LAYOUT[_name] = _off
    _off += _round8(_rows)
W_ROWS = _off


# --------------------------- fused Pallas kernel ------------------------------
def _fused_forward_kernel(data_ref, w_ref,
                          slab_ref, bow_ref, dec_ref, words_ref,
                          feat_ref,
                          *, B, DL, T, off, use_prior, mode):
    f32 = jnp.float32
    Td = T - 1

    def wslice(name, rows, cols):
        r0 = W_LAYOUT[name]
        return w_ref[r0:r0 + rows, 0:cols]

    def bias(row, cols):
        r0 = W_LAYOUT["biases"] + row
        return w_ref[r0:r0 + 1, 0:cols]

    data = data_ref[...]                                        # (B, 128) f32

    def dcols(o, width):
        return data[:, o:o + width]

    # integer views of the packed ids (exact small ints carried as f32 lanes)
    ctx_tok = dcols(off["ctok"], DL * UTT).astype(jnp.int32)    # (B, DL*UTT)
    out_tok = dcols(off["otok"], T).astype(jnp.int32)           # (B, T)
    topic_id = dcols(off["top"], 1).astype(jnp.int32)           # (B, 1)
    des_id = dcols(off["des"], 1).astype(jnp.int32)             # (B, 1)

    lane_v = lax.broadcasted_iota(jnp.int32, (B, V), 1)         # vocab lane ids

    w_word_sent = wslice("word_to_sent", V, S)                  # (V, S)
    b_utt = bias(B_UTT, S)

    # ---------------- utterance + context encoder surrogates ------------------
    # TODO(synk): UtteranceRNN / ContextRNN are undefined in the reference;
    # realized as (length-masked) mean-pool + dense + tanh.
    ctx_len = dcols(off["clen"], 1)                             # (B, 1) f32
    turn_idx = lax.broadcasted_iota(jnp.int32, (B, DL), 1)
    ctx_mask = (turn_idx < ctx_len.astype(jnp.int32)).astype(f32)
    ctx_w = ctx_mask / jnp.maximum(ctx_len, 1.0)                # (B, DL)
    floors = dcols(off["fl"], DL)                               # (B, DL) in {0,1}

    sent_pool = jnp.zeros((B, S), f32)
    fl1 = jnp.zeros((B, 1), f32)
    inv_utt = 1.0 / UTT
    for d in range(DL):
        cnt = jnp.zeros((B, V), f32)
        for t in range(UTT):
            tok = ctx_tok[:, d * UTT + t:d * UTT + t + 1]       # (B, 1)
            cnt = cnt + (lane_v == tok).astype(f32)
        enc_d = jnp.tanh(jnp.dot(cnt * inv_utt, w_word_sent,
                                 preferred_element_type=f32) + b_utt)    # (B, S)
        wd = ctx_w[:, d:d + 1]
        sent_pool = sent_pool + wd * enc_d
        fl1 = fl1 + wd * floors[:, d:d + 1]
    fl0 = jnp.sum(ctx_w, axis=1, keepdims=True) - fl1

    ctx_r0 = W_LAYOUT["w_ctx"]
    ctx_state = jnp.tanh(
        jnp.dot(sent_pool, wslice("w_ctx", S, H), preferred_element_type=f32)
        + fl0 * w_ref[ctx_r0 + S:ctx_r0 + S + 1, 0:H]
        + fl1 * w_ref[ctx_r0 + S + 1:ctx_r0 + S + 2, 0:H]
        + bias(B_CTX, H))                                       # (B, H)

    # response-side utterance encoding (length-masked mean pool)
    out_len = dcols(off["olen"], 1)
    pos_idx = lax.broadcasted_iota(jnp.int32, (B, T), 1)
    out_mask = (pos_idx < out_len.astype(jnp.int32)).astype(f32)
    out_w = out_mask / jnp.maximum(jnp.sum(out_mask, axis=1, keepdims=True), 1.0)
    wcnt = jnp.zeros((B, V), f32)
    for t in range(T):
        tok = out_tok[:, t:t + 1]
        wcnt = wcnt + out_w[:, t:t + 1] * (lane_v == tok).astype(f32)
    utt_out_enc = jnp.tanh(jnp.dot(wcnt, w_word_sent,
                                   preferred_element_type=f32) + b_utt)   # (B, S)

    # ---------------- topic / act embeddings + ActFC ---------------------------
    oh_topic = (lax.broadcasted_iota(jnp.int32, (B, TV), 1) == topic_id).astype(f32)
    topic_vec = jnp.dot(oh_topic, wslice("topic_emb", TV, TE),
                        preferred_element_type=f32)             # (B, TE)
    oh_act = (lax.broadcasted_iota(jnp.int32, (B, A), 1) == des_id).astype(f32)
    act_embeded = jnp.dot(oh_act, wslice("act_emb", A, AE),
                          preferred_element_type=f32)           # (B, AE)
    # TODO(synk): ActFC undefined in the reference; realized as dense + tanh.
    act_enc = jnp.tanh(jnp.dot(act_embeded, wslice("w_act_fc", AE, AE),
                               preferred_element_type=f32) + bias(B_AFC, AE))

    # ------ assemble 128-lane conditional feature row (VMEM scratch) -----------
    feat_ref[...] = jnp.zeros((B, FEAT_W), f32)
    feat_ref[:, F_TOPIC:F_TOPIC + TE] = topic_vec
    feat_ref[:, F_MYP:F_MYP + 4] = dcols(off["myp"], 4)
    feat_ref[:, F_OTP:F_OTP + 4] = dcols(off["otp"], 4)
    feat_ref[:, F_CTX:F_CTX + H] = ctx_state
    feat_ref[:, F_UTTO:F_UTTO + S] = utt_out_enc
    feat_ref[:, F_AFC:F_AFC + AE] = act_enc

    # ---------------- recognition / prior networks (exact) ---------------------
    feat = feat_ref[...]
    recog_mulogvar = (jnp.dot(feat, wslice("w_recog", FEAT_W, 2 * L),
                              preferred_element_type=f32) + bias(B_RECOG, 2 * L))
    prior_h = jnp.tanh(jnp.dot(feat, wslice("w_prior1", FEAT_W, PH),
                               preferred_element_type=f32) + bias(B_PRIOR1, PH))
    prior_mulogvar = (jnp.dot(prior_h, wslice("w_prior2", PH, 2 * L),
                              preferred_element_type=f32) + bias(B_PRIOR2, 2 * L))

    # ---------------- reparameterized gaussian sample ---------------------------
    mulogvar = prior_mulogvar if use_prior else recog_mulogvar      # static branch
    mu, logvar = mulogvar[:, :L], mulogvar[:, L:]
    latent = mu + jnp.exp(0.5 * logvar) * dcols(off["eps"], L)
    feat_ref[:, F_LAT:F_LAT + L] = latent

    # ---------------- bow / act heads (MLPby surrogate) -------------------------
    # TODO(synk): MLPby (loss_project) undefined; realized as dense+tanh->dense
    # for bow and a single dense for act.
    feat = feat_ref[...]
    bow_h = jnp.tanh(jnp.dot(feat, wslice("w_bow1", FEAT_W, BH),
                             preferred_element_type=f32) + bias(B_BOW1, BH))
    bow_ref[...] = (jnp.dot(bow_h, wslice("w_bow2", BH, V),
                            preferred_element_type=f32) + bias(B_BOW2, V))
    act_logits = (jnp.dot(feat, wslice("w_actproj", FEAT_W, A),
                          preferred_element_type=f32) + bias(B_ACTPROJ, A))

    m = jnp.max(act_logits, axis=-1, keepdims=True)
    p = jnp.exp(act_logits - m)
    act_prob = p / jnp.sum(p, axis=-1, keepdims=True)
    pred_act = jnp.dot(act_prob, wslice("act_emb", A, AE),
                       preferred_element_type=f32)
    sel_act = pred_act if mode == "test" else act_embeded           # static branch
    feat_ref[:, F_ACT:F_ACT + AE] = sel_act

    # ---------------- decoder surrogate -----------------------------------------
    # TODO(synk): DecoderRNN undefined; realized as per-step logits =
    # word_emb(tok) @ W_e + enc_outputs @ W_c + b (teacher forcing).
    feat = feat_ref[...]
    enc_part = (jnp.dot(feat, wslice("w_decenc", FEAT_W, V),
                        preferred_element_type=f32) + bias(B_DEC, V))    # (B, V)
    w_word_vocab = wslice("word_to_vocab", V, V)                         # (V, V)
    for t in range(Td):
        oh_t = (lane_v == out_tok[:, t:t + 1]).astype(f32)               # (B, V)
        logits_t = jnp.dot(oh_t, w_word_vocab,
                           preferred_element_type=f32) + enc_part        # (B, V)
        dec_ref[:, t * V:(t + 1) * V] = logits_t                         # lane-aligned
        mx = jnp.max(logits_t, axis=-1, keepdims=True)
        words_ref[:, t:t + 1] = jnp.min(
            jnp.where(logits_t >= mx, lane_v, V), axis=-1, keepdims=True)

    # ---------------- packed small-head output slab -----------------------------
    slab_ref[...] = jnp.zeros((B, 128), f32)
    slab_ref[:, 0:2 * L] = recog_mulogvar
    slab_ref[:, 2 * L:4 * L] = prior_mulogvar
    slab_ref[:, 4 * L:4 * L + A] = act_logits


# ------------------------- parameter construction ----------------------------
def init_params(key):
    ks = jax.random.split(key, 16)

    def dense(k, fan_in, fan_out):
        w = jax.random.normal(k, (fan_in, fan_out), jnp.float32) * (fan_in ** -0.5)
        b = jnp.zeros((fan_out,), jnp.float32)
        return w, b

    word_emb = jax.random.normal(ks[0], (V, E), jnp.float32) * 0.1
    word_emb = word_emb.at[0].set(0.0)                 # padding_idx=0
    topic_emb = jax.random.normal(ks[1], (TV, TE), jnp.float32) * 0.1
    act_emb = jax.random.normal(ks[2], (A, AE), jnp.float32) * 0.1

    w_u, b_u = dense(ks[3], E, S)
    w_c, b_c = dense(ks[4], S + 2, H)
    w_af, b_af = dense(ks[5], AE, AE)
    w_r, b_r = dense(ks[6], Config.recog_input_size, 2 * L)
    w_p1, b_p1 = dense(ks[7], CD, PH)
    w_p2, b_p2 = dense(ks[8], PH, 2 * L)
    w_b1, b_b1 = dense(ks[9], GD, BH)
    w_b2, b_b2 = dense(ks[10], BH, V)
    w_ap, b_ap = dense(ks[11], GD, A)
    w_dec, b_dec = dense(ks[12], E + ED, V)            # DecoderRNN surrogate
    w_de, w_dc = w_dec[:E], w_dec[E:]                  # split at word-emb boundary

    def feat_scatter(cols, pieces):
        out = jnp.zeros((FEAT_W, cols), jnp.float32)
        for row0, blk in pieces:
            out = out.at[row0:row0 + blk.shape[0]].set(blk)
        return out

    blocks = {
        "word_to_sent": word_emb @ w_u,
        "word_to_vocab": word_emb @ w_de,
        "topic_emb": topic_emb,
        "act_emb": act_emb,
        "w_act_fc": w_af,
        "w_ctx": w_c,
        "w_recog": feat_scatter(2 * L, [(0, w_r[0:CD]),
                                        (F_UTTO, w_r[CD:CD + S]),
                                        (F_AFC, w_r[CD + S:CD + S + AE])]),
        "w_prior1": feat_scatter(PH, [(0, w_p1)]),
        "w_prior2": w_p2,
        "w_bow1": feat_scatter(BH, [(0, w_b1)]),
        "w_bow2": w_b2,
        "w_actproj": feat_scatter(A, [(0, w_ap)]),
        "w_decenc": feat_scatter(V, [(0, w_dc)]),
    }
    biases = jnp.zeros((16, 128), jnp.float32)
    for row, vec in ((B_UTT, b_u), (B_CTX, b_c), (B_AFC, b_af), (B_RECOG, b_r),
                     (B_PRIOR1, b_p1), (B_PRIOR2, b_p2), (B_BOW1, b_b1),
                     (B_BOW2, b_b2), (B_ACTPROJ, b_ap), (B_DEC, b_dec)):
        biases = biases.at[row, :vec.shape[0]].set(vec)
    blocks["biases"] = biases

    wslab = jnp.zeros((W_ROWS, 128), jnp.float32)
    for name, blk in blocks.items():
        r0 = W_LAYOUT[name]
        r, c = blk.shape
        wslab = wslab.at[r0:r0 + r, 0:c].set(blk)
    return {"wslab": wslab}


# ------------------------------ forward --------------------------------------
def kg_rnn_cvae_forward(params, feed, eps_key, use_prior=False, mode="train"):
    # TODO(synk): at B~2 the model is launch-bound, so a single gridless,
    # whole-array-VMEM call is optimal.  For large batch, add a grid over
    # 128/256-row batch blocks with dimension_semantics=("parallel",), bf16
    # matmul inputs and an explicit vmem_limit_bytes re-derived per generation.
    input_contexts = feed["input_contexts"]          # (B, DL, UTT) int32
    floors = feed["floors"]                          # (B, DL) int32 in {0,1}
    context_lens = feed["context_lens"]              # (B,) int32
    topics = feed["topics"]                          # (B,) int32
    my_profile = feed["my_profile"]                  # (B, 4) f32
    ot_profile = feed["ot_profile"]                  # (B, 4) f32
    output_tokens = feed["output_tokens"]            # (B, T) int32
    output_lens = feed["output_lens"]                # (B,) int32
    output_des = feed["output_des"]                  # (B,) int32

    B, DL, utt = input_contexts.shape
    assert utt == UTT
    T = output_tokens.shape[1]
    Td = T - 1

    eps = jax.random.normal(eps_key, (B, L), jnp.float32)

    # --- pack ALL per-call data into one (B, 128) f32 slab (single input DMA) --
    f32 = jnp.float32
    cols = (
        ("ctok", input_contexts.reshape(B, DL * UTT).astype(f32)),
        ("otok", output_tokens.astype(f32)),
        ("fl", floors.astype(f32)),
        ("clen", context_lens.reshape(B, 1).astype(f32)),
        ("olen", output_lens.reshape(B, 1).astype(f32)),
        ("top", topics.reshape(B, 1).astype(f32)),
        ("des", output_des.reshape(B, 1).astype(f32)),
        ("myp", my_profile.astype(f32)),
        ("otp", ot_profile.astype(f32)),
        ("eps", eps),
    )
    off, cur = {}, 0
    for name, arr in cols:
        off[name] = cur
        cur += arr.shape[1]
    assert cur <= 128
    data = jnp.concatenate([arr for _, arr in cols], axis=1)
    data = jnp.pad(data, ((0, 0), (0, 128 - cur)))

    kernel = functools.partial(
        _fused_forward_kernel, B=B, DL=DL, T=T, off=off,
        use_prior=bool(use_prior), mode=mode)

    vmem = functools.partial(pl.BlockSpec, memory_space=pltpu.MemorySpace.VMEM)
    slab, bow_logits, dec_flat, dec_out_words = pl.pallas_call(
        kernel,
        in_specs=[vmem(), vmem()],
        out_specs=(vmem(), vmem(), vmem(), vmem()),
        out_shape=(
            jax.ShapeDtypeStruct((B, 128), jnp.float32),        # packed small heads
            jax.ShapeDtypeStruct((B, V), jnp.float32),          # bow_logits
            jax.ShapeDtypeStruct((B, Td * V), jnp.float32),     # decoder logits
            jax.ShapeDtypeStruct((B, Td), jnp.int32),           # argmax words
        ),
        scratch_shapes=[pltpu.VMEM((B, FEAT_W), jnp.float32)],
    )(data, params["wslab"])

    # unpack the lane-dense slab (cheap XLA slices)
    recog_mu = slab[:, 0:L]
    recog_logvar = slab[:, L:2 * L]
    prior_mu = slab[:, 2 * L:3 * L]
    prior_logvar = slab[:, 3 * L:4 * L]
    act_logits = slab[:, 4 * L:4 * L + A]
    dec_outs = dec_flat.reshape(B, Td, V)
    labels = output_tokens[:, 1:]

    return (dec_outs, output_des, labels, bow_logits, act_logits,
            recog_mu, recog_logvar, prior_mu, prior_logvar, dec_out_words)


# -------------------------------- main ---------------------------------------
if __name__ == "__main__":
    key = jax.random.PRNGKey(0)
    (k_param, k_ctx, k_tok, k_prof1, k_prof2, k_eps, k_topic, k_act,
     k_floor) = jax.random.split(key, 9)

    params = init_params(k_param)

    B, DL, T = 2, 3, 8
    feed = dict(
        input_contexts=jax.random.randint(k_ctx, (B, DL, UTT), 0, V, jnp.int32),
        floors=jax.random.randint(k_floor, (B, DL), 0, 2, jnp.int32),
        context_lens=jnp.array([3, 2], jnp.int32),
        topics=jax.random.randint(k_topic, (B,), 0, TV, jnp.int32),
        my_profile=jax.random.normal(k_prof1, (B, 4), jnp.float32),
        ot_profile=jax.random.normal(k_prof2, (B, 4), jnp.float32),
        output_tokens=jax.random.randint(k_tok, (B, T), 1, V, jnp.int32),
        output_lens=jnp.array([8, 6], jnp.int32),
        output_des=jax.random.randint(k_act, (B,), 0, A, jnp.int32),
    )

    forward = jax.jit(kg_rnn_cvae_forward, static_argnames=("use_prior", "mode"))
    outs = forward(params, feed, k_eps, use_prior=False, mode="train")
    outs = jax.block_until_ready(outs)

    (dec_outs, output_des_o, labels, bow_logits, act_logits,
     recog_mu, recog_logvar, prior_mu, prior_logvar, dec_out_words) = outs
    assert dec_outs.shape == (B, T - 1, V)
    assert labels.shape == (B, T - 1)
    assert bow_logits.shape == (B, V)
    assert act_logits.shape == (B, A)
    assert recog_mu.shape == (B, L)
    assert recog_logvar.shape == (B, L)
    assert prior_mu.shape == (B, L)
    assert prior_logvar.shape == (B, L)
    assert dec_out_words.shape == (B, T - 1)
    assert bool(jnp.all(jnp.isfinite(dec_outs)))
    assert bool(jnp.all(jnp.isfinite(bow_logits)))

    print("KERNEL_OK")
</pallas_src>

<mosaic_0001>
module attributes {stable_mosaic.version = 11 : i64} {
  func.func @_fused_forward_kernel(%arg0: memref<2x128xf32, #tpu.memory_space<vmem>>, %arg1: memref<1192x128xf32, #tpu.memory_space<vmem>>, %arg2: memref<2x128xf32, #tpu.memory_space<vmem>>, %arg3: memref<2x128xf32, #tpu.memory_space<vmem>>, %arg4: memref<2x896xf32, #tpu.memory_space<vmem>>, %arg5: memref<2x7xi32, #tpu.memory_space<vmem>>, %arg6: memref<2x128xf32, #tpu.memory_space<vmem>>) attributes {dimension_semantics = [], scalar_prefetch = 0 : i64, scratch_operands = 1 : i64, tpu.core_type = #tpu.core_type<tc>} {
    %c0 = arith.constant 0 : index
    %c0_0 = arith.constant 0 : index
    %0 = vector.load %arg0[%c0, %c0_0] : memref<2x128xf32, #tpu.memory_space<vmem>>, vector<2x128xf32>
    %1 = vector.extract_strided_slice %0 {offsets = [0, 0], sizes = [2, 24], strides = [1, 1]} : vector<2x128xf32> to vector<2x24xf32>
    %2 = arith.fptosi %1 : vector<2x24xf32> to vector<2x24xi32>
    %3 = vector.extract_strided_slice %0 {offsets = [0, 24], sizes = [2, 8], strides = [1, 1]} : vector<2x128xf32> to vector<2x8xf32>
    %4 = arith.fptosi %3 : vector<2x8xf32> to vector<2x8xi32>
    %5 = vector.extract_strided_slice %0 {offsets = [0, 37], sizes = [2, 1], strides = [1, 1]} : vector<2x128xf32> to vector<2x1xf32>
    %6 = arith.fptosi %5 : vector<2x1xf32> to vector<2x1xi32>
    %7 = vector.extract_strided_slice %0 {offsets = [0, 38], sizes = [2, 1], strides = [1, 1]} : vector<2x128xf32> to vector<2x1xf32>
    %8 = arith.fptosi %7 : vector<2x1xf32> to vector<2x1xi32>
    %9 = tpu.iota {dimensions = array<i32: 1>} : vector<2x128xi32>
    %c0_1 = arith.constant 0 : index
    %c0_2 = arith.constant 0 : index
    %10 = vector.load %arg1[%c0_1, %c0_2] : memref<1192x128xf32, #tpu.memory_space<vmem>>, vector<128x32xf32>
    %c1176 = arith.constant 1176 : index
    %c0_3 = arith.constant 0 : index
    %11 = vector.load %arg1[%c1176, %c0_3] : memref<1192x128xf32, #tpu.memory_space<vmem>>, vector<1x32xf32>
    %12 = vector.extract_strided_slice %0 {offsets = [0, 35], sizes = [2, 1], strides = [1, 1]} : vector<2x128xf32> to vector<2x1xf32>
    %13 = tpu.iota {dimensions = array<i32: 1>} : vector<2x3xi32>
    %14 = arith.fptosi %12 : vector<2x1xf32> to vector<2x1xi32>
    %15 = vector.broadcast %14 : vector<2x1xi32> to vector<2x3xi32>
    %16 = arith.cmpi slt, %13, %15 : vector<2x3xi32>
    %17 = arith.extui %16 : vector<2x3xi1> to vector<2x3xi32>
    %18 = arith.sitofp %17 : vector<2x3xi32> to vector<2x3xf32>
    %cst = arith.constant 1.000000e+00 : f32
    %19 = vector.broadcast %cst : f32 to vector<2x1xf32>
    %20 = arith.maximumf %12, %19 : vector<2x1xf32>
    %21 = vector.broadcast %20 : vector<2x1xf32> to vector<2x3xf32>
    %22 = arith.divf %18, %21 : vector<2x3xf32>
    %23 = vector.extract_strided_slice %0 {offsets = [0, 32], sizes = [2, 3], strides = [1, 1]} : vector<2x128xf32> to vector<2x3xf32>
    %cst_4 = arith.constant 0.000000e+00 : f32
    %24 = vector.broadcast %cst_4 : f32 to vector<2x32xf32>
    %cst_5 = arith.constant 0.000000e+00 : f32
    %25 = vector.broadcast %cst_5 : f32 to vector<2x1xf32>
    %cst_6 = arith.constant 0.000000e+00 : f32
    %26 = vector.broadcast %cst_6 : f32 to vector<2x128xf32>
    %27 = vector.extract_strided_slice %2 {offsets = [0, 0], sizes = [2, 1], strides = [1, 1]} : vector<2x24xi32> to vector<2x1xi32>
    %28 = vector.broadcast %27 : vector<2x1xi32> to vector<2x128xi32>
    %29 = arith.cmpi eq, %9, %28 : vector<2x128xi32>
    %30 = arith.extui %29 : vector<2x128xi1> to vector<2x128xi32>
    %31 = arith.sitofp %30 : vector<2x128xi32> to vector<2x128xf32>
    %32 = arith.addf %26, %31 : vector<2x128xf32>
    %33 = vector.extract_strided_slice %2 {offsets = [0, 1], sizes = [2, 1], strides = [1, 1]} : vector<2x24xi32> to vector<2x1xi32>
    %34 = vector.broadcast %33 : vector<2x1xi32> to vector<2x128xi32>
    %35 = arith.cmpi eq, %9, %34 : vector<2x128xi32>
    %36 = arith.extui %35 : vector<2x128xi1> to vector<2x128xi32>
    %37 = arith.sitofp %36 : vector<2x128xi32> to vector<2x128xf32>
    %38 = arith.addf %32, %37 : vector<2x128xf32>
    %39 = vector.extract_strided_slice %2 {offsets = [0, 2], sizes = [2, 1], strides = [1, 1]} : vector<2x24xi32> to vector<2x1xi32>
    %40 = vector.broadcast %39 : vector<2x1xi32> to vector<2x128xi32>
    %41 = arith.cmpi eq, %9, %40 : vector<2x128xi32>
    %42 = arith.extui %41 : vector<2x128xi1> to vector<2x128xi32>
    %43 = arith.sitofp %42 : vector<2x128xi32> to vector<2x128xf32>
    %44 = arith.addf %38, %43 : vector<2x128xf32>
    %45 = vector.extract_strided_slice %2 {offsets = [0, 3], sizes = [2, 1], strides = [1, 1]} : vector<2x24xi32> to vector<2x1xi32>
    %46 = vector.broadcast %45 : vector<2x1xi32> to vector<2x128xi32>
    %47 = arith.cmpi eq, %9, %46 : vector<2x128xi32>
    %48 = arith.extui %47 : vector<2x128xi1> to vector<2x128xi32>
    %49 = arith.sitofp %48 : vector<2x128xi32> to vector<2x128xf32>
    %50 = arith.addf %44, %49 : vector<2x128xf32>
    %51 = vector.extract_strided_slice %2 {offsets = [0, 4], sizes = [2, 1], strides = [1, 1]} : vector<2x24xi32> to vector<2x1xi32>
    %52 = vector.broadcast %51 : vector<2x1xi32> to vector<2x128xi32>
    %53 = arith.cmpi eq, %9, %52 : vector<2x128xi32>
    %54 = arith.extui %53 : vector<2x128xi1> to vector<2x128xi32>
    %55 = arith.sitofp %54 : vector<2x128xi32> to vector<2x128xf32>
    %56 = arith.addf %50, %55 : vector<2x128xf32>
    %57 = vector.extract_strided_slice %2 {offsets = [0, 5], sizes = [2, 1], strides = [1, 1]} : vector<2x24xi32> to vector<2x1xi32>
    %58 = vector.broadcast %57 : vector<2x1xi32> to vector<2x128xi32>
    %59 = arith.cmpi eq, %9, %58 : vector<2x128xi32>
    %60 = arith.extui %59 : vector<2x128xi1> to vector<2x128xi32>
    %61 = arith.sitofp %60 : vector<2x128xi32> to vector<2x128xf32>
    %62 = arith.addf %56, %61 : vector<2x128xf32>
    %63 = vector.extract_strided_slice %2 {offsets = [0, 6], sizes = [2, 1], strides = [1, 1]} : vector<2x24xi32> to vector<2x1xi32>
    %64 = vector.broadcast %63 : vector<2x1xi32> to vector<2x128xi32>
    %65 = arith.cmpi eq, %9, %64 : vector<2x128xi32>
    %66 = arith.extui %65 : vector<2x128xi1> to vector<2x128xi32>
    %67 = arith.sitofp %66 : vector<2x128xi32> to vector<2x128xf32>
    %68 = arith.addf %62, %67 : vector<2x128xf32>
    %69 = vector.extract_strided_slice %2 {offsets = [0, 7], sizes = [2, 1], strides = [1, 1]} : vector<2x24xi32> to vector<2x1xi32>
    %70 = vector.broadcast %69 : vector<2x1xi32> to vector<2x128xi32>
    %71 = arith.cmpi eq, %9, %70 : vector<2x128xi32>
    %72 = arith.extui %71 : vector<2x128xi1> to vector<2x128xi32>
    %73 = arith.sitofp %72 : vector<2x128xi32> to vector<2x128xf32>
    %74 = arith.addf %68, %73 : vector<2x128xf32>
    %cst_7 = arith.constant 1.250000e-01 : f32
    %75 = vector.broadcast %cst_7 : f32 to vector<2x128xf32>
    %76 = arith.mulf %74, %75 : vector<2x128xf32>
    %cst_8 = arith.constant dense<0.000000e+00> : vector<2x32xf32>
    %77 = tpu.matmul %76, %10, %cst_8 {dimension_numbers = #tpu.dot_dimension_numbers<[1], [0], [0], [1], [0, 0, 1, 1], [], []>} : vector<2x128xf32>, vector<128x32xf32>, vector<2x32xf32> -> vector<2x32xf32>
    %78 = vector.broadcast %11 : vector<1x32xf32> to vector<2x32xf32>
    %79 = arith.addf %77, %78 : vector<2x32xf32>
    %80 = math.tanh %79 : vector<2x32xf32>
    %81 = vector.extract_strided_slice %22 {offsets = [0, 0], sizes = [2, 1], strides = [1, 1]} : vector<2x3xf32> to vector<2x1xf32>
    %82 = vector.broadcast %81 : vector<2x1xf32> to vector<2x32xf32>
    %83 = arith.mulf %82, %80 : vector<2x32xf32>
    %84 = arith.addf %24, %83 : vector<2x32xf32>
    %85 = vector.extract_strided_slice %23 {offsets = [0, 0], sizes = [2, 1], strides = [1, 1]} : vector<2x3xf32> to vector<2x1xf32>
    %86 = arith.mulf %81, %85 : vector<2x1xf32>
    %87 = arith.addf %25, %86 : vector<2x1xf32>
    %cst_9 = arith.constant 0.000000e+00 : f32
    %88 = vector.broadcast %cst_9 : f32 to vector<2x128xf32>
    %89 = vector.extract_strided_slice %2 {offsets = [0, 8], sizes = [2, 1], strides = [1, 1]} : vector<2x24xi32> to vector<2x1xi32>
    %90 = vector.broadcast %89 : vector<2x1xi32> to vector<2x128xi32>
    %91 = arith.cmpi eq, %9, %90 : vector<2x128xi32>
    %92 = arith.extui %91 : vector<2x128xi1> to vector<2x128xi32>
    %93 = arith.sitofp %92 : vector<2x128xi32> to vector<2x128xf32>
    %94 = arith.addf %88, %93 : vector<2x128xf32>
    %95 = vector.extract_strided_slice %2 {offsets = [0, 9], sizes = [2, 1], strides = [1, 1]} : vector<2x24xi32> to vector<2x1xi32>
    %96 = vector.broadcast %95 : vector<2x1xi32> to vector<2x128xi32>
    %97 = arith.cmpi eq, %9, %96 : vector<2x128xi32>
    %98 = arith.extui %97 : vector<2x128xi1> to vector<2x128xi32>
    %99 = arith.sitofp %98 : vector<2x128xi32> to vector<2x128xf32>
    %100 = arith.addf %94, %99 : vector<2x128xf32>
    %101 = vector.extract_strided_slice %2 {offsets = [0, 10], sizes = [2, 1], strides = [1, 1]} : vector<2x24xi32> to vector<2x1xi32>
    %102 = vector.broadcast %101 : vector<2x1xi32> to vector<2x128xi32>
    %103 = arith.cmpi eq, %9, %102 : vector<2x128xi32>
    %104 = arith.extui %103 : vector<2x128xi1> to vector<2x128xi32>
    %105 = arith.sitofp %104 : vector<2x128xi32> to vector<2x128xf32>
    %106 = arith.addf %100, %105 : vector<2x128xf32>
    %107 = vector.extract_strided_slice %2 {offsets = [0, 11], sizes = [2, 1], strides = [1, 1]} : vector<2x24xi32> to vector<2x1xi32>
    %108 = vector.broadcast %107 : vector<2x1xi32> to vector<2x128xi32>
    %109 = arith.cmpi eq, %9, %108 : vector<2x128xi32>
    %110 = arith.extui %109 : vector<2x128xi1> to vector<2x128xi32>
    %111 = arith.sitofp %110 : vector<2x128xi32> to vector<2x128xf32>
    %112 = arith.addf %106, %111 : vector<2x128xf32>
    %113 = vector.extract_strided_slice %2 {offsets = [0, 12], sizes = [2, 1], strides = [1, 1]} : vector<2x24xi32> to vector<2x1xi32>
    %114 = vector.broadcast %113 : vector<2x1xi32> to vector<2x128xi32>
    %115 = arith.cmpi eq, %9, %114 : vector<2x128xi32>
    %116 = arith.extui %115 : vector<2x128xi1> to vector<2x128xi32>
    %117 = arith.sitofp %116 : vector<2x128xi32> to vector<2x128xf32>
    %118 = arith.addf %112, %117 : vector<2x128xf32>
    %119 = vector.extract_strided_slice %2 {offsets = [0, 13], sizes = [2, 1], strides = [1, 1]} : vector<2x24xi32> to vector<2x1xi32>
    %120 = vector.broadcast %119 : vector<2x1xi32> to vector<2x128xi32>
    %121 = arith.cmpi eq, %9, %120 : vector<2x128xi32>
    %122 = arith.extui %121 : vector<2x128xi1> to vector<2x128xi32>
    %123 = arith.sitofp %122 : vector<2x128xi32> to vector<2x128xf32>
    %124 = arith.addf %118, %123 : vector<2x128xf32>
    %125 = vector.extract_strided_slice %2 {offsets = [0, 14], sizes = [2, 1], strides = [1, 1]} : vector<2x24xi32> to vector<2x1xi32>
    %126 = vector.broadcast %125 : vector<2x1xi32> to vector<2x128xi32>
    %127 = arith.cmpi eq, %9, %126 : vector<2x128xi32>
    %128 = arith.extui %127 : vector<2x128xi1> to vector<2x128xi32>
    %129 = arith.sitofp %128 : vector<2x128xi32> to vector<2x128xf32>
    %130 = arith.addf %124, %129 : vector<2x128xf32>
    %131 = vector.extract_strided_slice %2 {offsets = [0, 15], sizes = [2, 1], strides = [1, 1]} : vector<2x24xi32> to vector<2x1xi32>
    %132 = vector.broadcast %131 : vector<2x1xi32> to vector<2x128xi32>
    %133 = arith.cmpi eq, %9, %132 : vector<2x128xi32>
    %134 = arith.extui %133 : vector<2x128xi1> to vector<2x128xi32>
    %135 = arith.sitofp %134 : vector<2x128xi32> to vector<2x128xf32>
    %136 = arith.addf %130, %135 : vector<2x128xf32>
    %cst_10 = arith.constant 1.250000e-01 : f32
    %137 = vector.broadcast %cst_10 : f32 to vector<2x128xf32>
    %138 = arith.mulf %136, %137 : vector<2x128xf32>
    %cst_11 = arith.constant dense<0.000000e+00> : vector<2x32xf32>
    %139 = tpu.matmul %138, %10, %cst_11 {dimension_numbers = #tpu.dot_dimension_numbers<[1], [0], [0], [1], [0, 0, 1, 1], [], []>} : vector<2x128xf32>, vector<128x32xf32>, vector<2x32xf32> -> vector<2x32xf32>
    %140 = vector.broadcast %11 : vector<1x32xf32> to vector<2x32xf32>
    %141 = arith.addf %139, %140 : vector<2x32xf32>
    %142 = math.tanh %141 : vector<2x32xf32>
    %143 = vector.extract_strided_slice %22 {offsets = [0, 1], sizes = [2, 1], strides = [1, 1]} : vector<2x3xf32> to vector<2x1xf32>
    %144 = vector.broadcast %143 : vector<2x1xf32> to vector<2x32xf32>
    %145 = arith.mulf %144, %142 : vector<2x32xf32>
    %146 = arith.addf %84, %145 : vector<2x32xf32>
    %147 = vector.extract_strided_slice %23 {offsets = [0, 1], sizes = [2, 1], strides = [1, 1]} : vector<2x3xf32> to vector<2x1xf32>
    %148 = arith.mulf %143, %147 : vector<2x1xf32>
    %149 = arith.addf %87, %148 : vector<2x1xf32>
    %cst_12 = arith.constant 0.000000e+00 : f32
    %150 = vector.broadcast %cst_12 : f32 to vector<2x128xf32>
    %151 = vector.extract_strided_slice %2 {offsets = [0, 16], sizes = [2, 1], strides = [1, 1]} : vector<2x24xi32> to vector<2x1xi32>
    %152 = vector.broadcast %151 : vector<2x1xi32> to vector<2x128xi32>
    %153 = arith.cmpi eq, %9, %152 : vector<2x128xi32>
    %154 = arith.extui %153 : vector<2x128xi1> to vector<2x128xi32>
    %155 = arith.sitofp %154 : vector<2x128xi32> to vector<2x128xf32>
    %156 = arith.addf %150, %155 : vector<2x128xf32>
    %157 = vector.extract_strided_slice %2 {offsets = [0, 17], sizes = [2, 1], strides = [1, 1]} : vector<2x24xi32> to vector<2x1xi32>
    %158 = vector.broadcast %157 : vector<2x1xi32> to vector<2x128xi32>
    %159 = arith.cmpi eq, %9, %158 : vector<2x128xi32>
    %160 = arith.extui %159 : vector<2x128xi1> to vector<2x128xi32>
    %161 = arith.sitofp %160 : vector<2x128xi32> to vector<2x128xf32>
    %162 = arith.addf %156, %161 : vector<2x128xf32>
    %163 = vector.extract_strided_slice %2 {offsets = [0, 18], sizes = [2, 1], strides = [1, 1]} : vector<2x24xi32> to vector<2x1xi32>
    %164 = vector.broadcast %163 : vector<2x1xi32> to vector<2x128xi32>
    %165 = arith.cmpi eq, %9, %164 : vector<2x128xi32>
    %166 = arith.extui %165 : vector<2x128xi1> to vector<2x128xi32>
    %167 = arith.sitofp %166 : vector<2x128xi32> to vector<2x128xf32>
    %168 = arith.addf %162, %167 : vector<2x128xf32>
    %169 = vector.extract_strided_slice %2 {offsets = [0, 19], sizes = [2, 1], strides = [1, 1]} : vector<2x24xi32> to vector<2x1xi32>
    %170 = vector.broadcast %169 : vector<2x1xi32> to vector<2x128xi32>
    %171 = arith.cmpi eq, %9, %170 : vector<2x128xi32>
    %172 = arith.extui %171 : vector<2x128xi1> to vector<2x128xi32>
    %173 = arith.sitofp %172 : vector<2x128xi32> to vector<2x128xf32>
    %174 = arith.addf %168, %173 : vector<2x128xf32>
    %175 = vector.extract_strided_slice %2 {offsets = [0, 20], sizes = [2, 1], strides = [1, 1]} : vector<2x24xi32> to vector<2x1xi32>
    %176 = vector.broadcast %175 : vector<2x1xi32> to vector<2x128xi32>
    %177 = arith.cmpi eq, %9, %176 : vector<2x128xi32>
    %178 = arith.extui %177 : vector<2x128xi1> to vector<2x128xi32>
    %179 = arith.sitofp %178 : vector<2x128xi32> to vector<2x128xf32>
    %180 = arith.addf %174, %179 : vector<2x128xf32>
    %181 = vector.extract_strided_slice %2 {offsets = [0, 21], sizes = [2, 1], strides = [1, 1]} : vector<2x24xi32> to vector<2x1xi32>
    %182 = vector.broadcast %181 : vector<2x1xi32> to vector<2x128xi32>
    %183 = arith.cmpi eq, %9, %182 : vector<2x128xi32>
    %184 = arith.extui %183 : vector<2x128xi1> to vector<2x128xi32>
    %185 = arith.sitofp %184 : vector<2x128xi32> to vector<2x128xf32>
    %186 = arith.addf %180, %185 : vector<2x128xf32>
    %187 = vector.extract_strided_slice %2 {offsets = [0, 22], sizes = [2, 1], strides = [1, 1]} : vector<2x24xi32> to vector<2x1xi32>
    %188 = vector.broadcast %187 : vector<2x1xi32> to vector<2x128xi32>
    %189 = arith.cmpi eq, %9, %188 : vector<2x128xi32>
    %190 = arith.extui %189 : vector<2x128xi1> to vector<2x128xi32>
    %191 = arith.sitofp %190 : vector<2x128xi32> to vector<2x128xf32>
    %192 = arith.addf %186, %191 : vector<2x128xf32>
    %193 = vector.extract_strided_slice %2 {offsets = [0, 23], sizes = [2, 1], strides = [1, 1]} : vector<2x24xi32> to vector<2x1xi32>
    %194 = vector.broadcast %193 : vector<2x1xi32> to vector<2x128xi32>
    %195 = arith.cmpi eq, %9, %194 : vector<2x128xi32>
    %196 = arith.extui %195 : vector<2x128xi1> to vector<2x128xi32>
    %197 = arith.sitofp %196 : vector<2x128xi32> to vector<2x128xf32>
    %198 = arith.addf %192, %197 : vector<2x128xf32>
    %cst_13 = arith.constant 1.250000e-01 : f32
    %199 = vector.broadcast %cst_13 : f32 to vector<2x128xf32>
    %200 = arith.mulf %198, %199 : vector<2x128xf32>
    %cst_14 = arith.constant dense<0.000000e+00> : vector<2x32xf32>
    %201 = tpu.matmul %200, %10, %cst_14 {dimension_numbers = #tpu.dot_dimension_numbers<[1], [0], [0], [1], [0, 0, 1, 1], [], []>} : vector<2x128xf32>, vector<128x32xf32>, vector<2x32xf32> -> vector<2x32xf32>
    %202 = vector.broadcast %11 : vector<1x32xf32> to vector<2x32xf32>
    %203 = arith.addf %201, %202 : vector<2x32xf32>
    %204 = math.tanh %203 : vector<2x32xf32>
    %205 = vector.extract_strided_slice %22 {offsets = [0, 2], sizes = [2, 1], strides = [1, 1]} : vector<2x3xf32> to vector<2x1xf32>
    %206 = vector.broadcast %205 : vector<2x1xf32> to vector<2x32xf32>
    %207 = arith.mulf %206, %204 : vector<2x32xf32>
    %208 = arith.addf %146, %207 : vector<2x32xf32>
    %209 = vector.extract_strided_slice %23 {offsets = [0, 2], sizes = [2, 1], strides = [1, 1]} : vector<2x3xf32> to vector<2x1xf32>
    %210 = arith.mulf %205, %209 : vector<2x1xf32>
    %211 = arith.addf %149, %210 : vector<2x1xf32>
    %cst_15 = arith.constant dense<0.000000e+00> : vector<2xf32>
    %212 = vector.multi_reduction <add>, %22, %cst_15 [1] : vector<2x3xf32> to vector<2xf32>
    %213 = vector.shape_cast %212 : vector<2xf32> to vector<2x1xf32>
    %214 = arith.subf %213, %211 : vector<2x1xf32>
    %c288 = arith.constant 288 : index
    %c0_16 = arith.constant 0 : index
    %215 = vector.load %arg1[%c288, %c0_16] : memref<1192x128xf32, #tpu.memory_space<vmem>>, vector<32x32xf32>
    %cst_17 = arith.constant dense<0.000000e+00> : vector<2x32xf32>
    %216 = tpu.matmul %208, %215, %cst_17 {dimension_numbers = #tpu.dot_dimension_numbers<[1], [0], [0], [1], [0, 0, 1, 1], [], []>} : vector<2x32xf32>, vector<32x32xf32>, vector<2x32xf32> -> vector<2x32xf32>
    %c320 = arith.constant 320 : index
    %c0_18 = arith.constant 0 : index
    %217 = vector.load %arg1[%c320, %c0_18] : memref<1192x128xf32, #tpu.memory_space<vmem>>, vector<1x32xf32>
    %218 = vector.broadcast %214 : vector<2x1xf32> to vector<2x32xf32>
    %219 = vector.broadcast %217 : vector<1x32xf32> to vector<2x32xf32>
    %220 = arith.mulf %218, %219 : vector<2x32xf32>
    %221 = arith.addf %216, %220 : vector<2x32xf32>
    %c321 = arith.constant 321 : index
    %c0_19 = arith.constant 0 : index
    %222 = vector.load %arg1[%c321, %c0_19] : memref<1192x128xf32, #tpu.memory_space<vmem>>, vector<1x32xf32>
    %223 = vector.broadcast %211 : vector<2x1xf32> to vector<2x32xf32>
    %224 = vector.broadcast %222 : vector<1x32xf32> to vector<2x32xf32>
    %225 = arith.mulf %223, %224 : vector<2x32xf32>
    %226 = arith.addf %221, %225 : vector<2x32xf32>
    %c1177 = arith.constant 1177 : index
    %c0_20 = arith.constant 0 : index
    %227 = vector.load %arg1[%c1177, %c0_20] : memref<1192x128xf32, #tpu.memory_space<vmem>>, vector<1x32xf32>
    %228 = vector.broadcast %227 : vector<1x32xf32> to vector<2x32xf32>
    %229 = arith.addf %226, %228 : vector<2x32xf32>
    %230 = math.tanh %229 : vector<2x32xf32>
    %231 = vector.extract_strided_slice %0 {offsets = [0, 36], sizes = [2, 1], strides = [1, 1]} : vector<2x128xf32> to vector<2x1xf32>
    %232 = tpu.iota {dimensions = array<i32: 1>} : vector<2x8xi32>
    %233 = arith.fptosi %231 : vector<2x1xf32> to vector<2x1xi32>
    %234 = vector.broadcast %233 : vector<2x1xi32> to vector<2x8xi32>
    %235 = arith.cmpi slt, %232, %234 : vector<2x8xi32>
    %236 = arith.extui %235 : vector<2x8xi1> to vector<2x8xi32>
    %237 = arith.sitofp %236 : vector<2x8xi32> to vector<2x8xf32>
    %cst_21 = arith.constant dense<0.000000e+00> : vector<2xf32>
    %238 = vector.multi_reduction <add>, %237, %cst_21 [1] : vector<2x8xf32> to vector<2xf32>
    %239 = vector.shape_cast %238 : vector<2xf32> to vector<2x1xf32>
    %cst_22 = arith.constant 1.000000e+00 : f32
    %240 = vector.broadcast %cst_22 : f32 to vector<2x1xf32>
    %241 = arith.maximumf %239, %240 : vector<2x1xf32>
    %242 = vector.broadcast %241 : vector<2x1xf32> to vector<2x8xf32>
    %243 = arith.divf %237, %242 : vector<2x8xf32>
    %cst_23 = arith.constant 0.000000e+00 : f32
    %244 = vector.broadcast %cst_23 : f32 to vector<2x128xf32>
    %245 = vector.extract_strided_slice %4 {offsets = [0, 0], sizes = [2, 1], strides = [1, 1]} : vector<2x8xi32> to vector<2x1xi32>
    %246 = vector.extract_strided_slice %243 {offsets = [0, 0], sizes = [2, 1], strides = [1, 1]} : vector<2x8xf32> to vector<2x1xf32>
    %247 = vector.broadcast %245 : vector<2x1xi32> to vector<2x128xi32>
    %248 = arith.cmpi eq, %9, %247 : vector<2x128xi32>
    %249 = arith.extui %248 : vector<2x128xi1> to vector<2x128xi32>
    %250 = arith.sitofp %249 : vector<2x128xi32> to vector<2x128xf32>
    %251 = vector.broadcast %246 : vector<2x1xf32> to vector<2x128xf32>
    %252 = arith.mulf %251, %250 : vector<2x128xf32>
    %253 = arith.addf %244, %252 : vector<2x128xf32>
    %254 = vector.extract_strided_slice %4 {offsets = [0, 1], sizes = [2, 1], strides = [1, 1]} : vector<2x8xi32> to vector<2x1xi32>
    %255 = vector.extract_strided_slice %243 {offsets = [0, 1], sizes = [2, 1], strides = [1, 1]} : vector<2x8xf32> to vector<2x1xf32>
    %256 = vector.broadcast %254 : vector<2x1xi32> to vector<2x128xi32>
    %257 = arith.cmpi eq, %9, %256 : vector<2x128xi32>
    %258 = arith.extui %257 : vector<2x128xi1> to vector<2x128xi32>
    %259 = arith.sitofp %258 : vector<2x128xi32> to vector<2x128xf32>
    %260 = vector.broadcast %255 : vector<2x1xf32> to vector<2x128xf32>
    %261 = arith.mulf %260, %259 : vector<2x128xf32>
    %262 = arith.addf %253, %261 : vector<2x128xf32>
    %263 = vector.extract_strided_slice %4 {offsets = [0, 2], sizes = [2, 1], strides = [1, 1]} : vector<2x8xi32> to vector<2x1xi32>
    %264 = vector.extract_strided_slice %243 {offsets = [0, 2], sizes = [2, 1], strides = [1, 1]} : vector<2x8xf32> to vector<2x1xf32>
    %265 = vector.broadcast %263 : vector<2x1xi32> to vector<2x128xi32>
    %266 = arith.cmpi eq, %9, %265 : vector<2x128xi32>
    %267 = arith.extui %266 : vector<2x128xi1> to vector<2x128xi32>
    %268 = arith.sitofp %267 : vector<2x128xi32> to vector<2x128xf32>
    %269 = vector.broadcast %264 : vector<2x1xf32> to vector<2x128xf32>
    %270 = arith.mulf %269, %268 : vector<2x128xf32>
    %271 = arith.addf %262, %270 : vector<2x128xf32>
    %272 = vector.extract_strided_slice %4 {offsets = [0, 3], sizes = [2, 1], strides = [1, 1]} : vector<2x8xi32> to vector<2x1xi32>
    %273 = vector.extract_strided_slice %243 {offsets = [0, 3], sizes = [2, 1], strides = [1, 1]} : vector<2x8xf32> to vector<2x1xf32>
    %274 = vector.broadcast %272 : vector<2x1xi32> to vector<2x128xi32>
    %275 = arith.cmpi eq, %9, %274 : vector<2x128xi32>
    %276 = arith.extui %275 : vector<2x128xi1> to vector<2x128xi32>
    %277 = arith.sitofp %276 : vector<2x128xi32> to vector<2x128xf32>
    %278 = vector.broadcast %273 : vector<2x1xf32> to vector<2x128xf32>
    %279 = arith.mulf %278, %277 : vector<2x128xf32>
    %280 = arith.addf %271, %279 : vector<2x128xf32>
    %281 = vector.extract_strided_slice %4 {offsets = [0, 4], sizes = [2, 1], strides = [1, 1]} : vector<2x8xi32> to vector<2x1xi32>
    %282 = vector.extract_strided_slice %243 {offsets = [0, 4], sizes = [2, 1], strides = [1, 1]} : vector<2x8xf32> to vector<2x1xf32>
    %283 = vector.broadcast %281 : vector<2x1xi32> to vector<2x128xi32>
    %284 = arith.cmpi eq, %9, %283 : vector<2x128xi32>
    %285 = arith.extui %284 : vector<2x128xi1> to vector<2x128xi32>
    %286 = arith.sitofp %285 : vector<2x128xi32> to vector<2x128xf32>
    %287 = vector.broadcast %282 : vector<2x1xf32> to vector<2x128xf32>
    %288 = arith.mulf %287, %286 : vector<2x128xf32>
    %289 = arith.addf %280, %288 : vector<2x128xf32>
    %290 = vector.extract_strided_slice %4 {offsets = [0, 5], sizes = [2, 1], strides = [1, 1]} : vector<2x8xi32> to vector<2x1xi32>
    %291 = vector.extract_strided_slice %243 {offsets = [0, 5], sizes = [2, 1], strides = [1, 1]} : vector<2x8xf32> to vector<2x1xf32>
    %292 = vector.broadcast %290 : vector<2x1xi32> to vector<2x128xi32>
    %293 = arith.cmpi eq, %9, %292 : vector<2x128xi32>
    %294 = arith.extui %293 : vector<2x128xi1> to vector<2x128xi32>
    %295 = arith.sitofp %294 : vector<2x128xi32> to vector<2x128xf32>
    %296 = vector.broadcast %291 : vector<2x1xf32> to vector<2x128xf32>
    %297 = arith.mulf %296, %295 : vector<2x128xf32>
    %298 = arith.addf %289, %297 : vector<2x128xf32>
    %299 = vector.extract_strided_slice %4 {offsets = [0, 6], sizes = [2, 1], strides = [1, 1]} : vector<2x8xi32> to vector<2x1xi32>
    %300 = vector.extract_strided_slice %243 {offsets = [0, 6], sizes = [2, 1], strides = [1, 1]} : vector<2x8xf32> to vector<2x1xf32>
    %301 = vector.broadcast %299 : vector<2x1xi32> to vector<2x128xi32>
    %302 = arith.cmpi eq, %9, %301 : vector<2x128xi32>
    %303 = arith.extui %302 : vector<2x128xi1> to vector<2x128xi32>
    %304 = arith.sitofp %303 : vector<2x128xi32> to vector<2x128xf32>
    %305 = vector.broadcast %300 : vector<2x1xf32> to vector<2x128xf32>
    %306 = arith.mulf %305, %304 : vector<2x128xf32>
    %307 = arith.addf %298, %306 : vector<2x128xf32>
    %308 = vector.extract_strided_slice %4 {offsets = [0, 7], sizes = [2, 1], strides = [1, 1]} : vector<2x8xi32> to vector<2x1xi32>
    %309 = vector.extract_strided_slice %243 {offsets = [0, 7], sizes = [2, 1], strides = [1, 1]} : vector<2x8xf32> to vector<2x1xf32>
    %310 = vector.broadcast %308 : vector<2x1xi32> to vector<2x128xi32>
    %311 = arith.cmpi eq, %9, %310 : vector<2x128xi32>
    %312 = arith.extui %311 : vector<2x128xi1> to vector<2x128xi32>
    %313 = arith.sitofp %312 : vector<2x128xi32> to vector<2x128xf32>
    %314 = vector.broadcast %309 : vector<2x1xf32> to vector<2x128xf32>
    %315 = arith.mulf %314, %313 : vector<2x128xf32>
    %316 = arith.addf %307, %315 : vector<2x128xf32>
    %cst_24 = arith.constant dense<0.000000e+00> : vector<2x32xf32>
    %317 = tpu.matmul %316, %10, %cst_24 {dimension_numbers = #tpu.dot_dimension_numbers<[1], [0], [0], [1], [0, 0, 1, 1], [], []>} : vector<2x128xf32>, vector<128x32xf32>, vector<2x32xf32> -> vector<2x32xf32>
    %318 = vector.broadcast %11 : vector<1x32xf32> to vector<2x32xf32>
    %319 = arith.addf %317, %318 : vector<2x32xf32>
    %320 = math.tanh %319 : vector<2x32xf32>
    %321 = tpu.iota {dimensions = array<i32: 1>} : vector<2x16xi32>
    %322 = vector.broadcast %6 : vector<2x1xi32> to vector<2x16xi32>
    %323 = arith.cmpi eq, %321, %322 : vector<2x16xi32>
    %324 = arith.extui %323 : vector<2x16xi1> to vector<2x16xi32>
    %325 = arith.sitofp %324 : vector<2x16xi32> to vector<2x16xf32>
    %c256 = arith.constant 256 : index
    %c0_25 = arith.constant 0 : index
    %326 = vector.load %arg1[%c256, %c0_25] : memref<1192x128xf32, #tpu.memory_space<vmem>>, vector<16x8xf32>
    %cst_26 = arith.constant dense<0.000000e+00> : vector<2x8xf32>
    %327 = tpu.matmul %325, %326, %cst_26 {dimension_numbers = #tpu.dot_dimension_numbers<[1], [0], [0], [1], [0, 0, 1, 1], [], []>} : vector<2x16xf32>, vector<16x8xf32>, vector<2x8xf32> -> vector<2x8xf32>
    %328 = tpu.iota {dimensions = array<i32: 1>} : vector<2x8xi32>
    %329 = vector.broadcast %8 : vector<2x1xi32> to vector<2x8xi32>
    %330 = arith.cmpi eq, %328, %329 : vector<2x8xi32>
    %331 = arith.extui %330 : vector<2x8xi1> to vector<2x8xi32>
    %332 = arith.sitofp %331 : vector<2x8xi32> to vector<2x8xf32>
    %c272 = arith.constant 272 : index
    %c0_27 = arith.constant 0 : index
    %333 = vector.load %arg1[%c272, %c0_27] : memref<1192x128xf32, #tpu.memory_space<vmem>>, vector<8x8xf32>
    %cst_28 = arith.constant dense<0.000000e+00> : vector<2x8xf32>
    %334 = tpu.matmul %332, %333, %cst_28 {dimension_numbers = #tpu.dot_dimension_numbers<[1], [0], [0], [1], [0, 0, 1, 1], [], []>} : vector<2x8xf32>, vector<8x8xf32>, vector<2x8xf32> -> vector<2x8xf32>
    %c280 = arith.constant 280 : index
    %c0_29 = arith.constant 0 : index
    %335 = vector.load %arg1[%c280, %c0_29] : memref<1192x128xf32, #tpu.memory_space<vmem>>, vector<8x8xf32>
    %cst_30 = arith.constant dense<0.000000e+00> : vector<2x8xf32>
    %336 = tpu.matmul %334, %335, %cst_30 {dimension_numbers = #tpu.dot_dimension_numbers<[1], [0], [0], [1], [0, 0, 1, 1], [], []>} : vector<2x8xf32>, vector<8x8xf32>, vector<2x8xf32> -> vector<2x8xf32>
    %c1178 = arith.constant 1178 : index
    %c0_31 = arith.constant 0 : index
    %337 = vector.load %arg1[%c1178, %c0_31] : memref<1192x128xf32, #tpu.memory_space<vmem>>, vector<1x8xf32>
    %338 = vector.broadcast %337 : vector<1x8xf32> to vector<2x8xf32>
    %339 = arith.addf %336, %338 : vector<2x8xf32>
    %340 = math.tanh %339 : vector<2x8xf32>
    %cst_32 = arith.constant 0.000000e+00 : f32
    %341 = vector.broadcast %cst_32 : f32 to vector<2x128xf32>
    %c0_33 = arith.constant 0 : index
    %c0_34 = arith.constant 0 : index
    %342 = vector.load %arg6[%c0_33, %c0_34] : memref<2x128xf32, #tpu.memory_space<vmem>>, vector<2x128xf32>
    tpu.vector_store %arg6[%c0_33, %c0_34], %341 {strides = array<i32>} : memref<2x128xf32, #tpu.memory_space<vmem>>, vector<2x128xf32>,
    %c0_35 = arith.constant 0 : index
    %c0_36 = arith.constant 0 : index
    %343 = vector.load %arg6[%c0_35, %c0_36] : memref<2x128xf32, #tpu.memory_space<vmem>>, vector<2x8xf32>
    tpu.vector_store %arg6[%c0_35, %c0_36], %327 {strides = array<i32>} : memref<2x128xf32, #tpu.memory_space<vmem>>, vector<2x8xf32>,
    %344 = vector.extract_strided_slice %0 {offsets = [0, 39], sizes = [2, 4], strides = [1, 1]} : vector<2x128xf32> to vector<2x4xf32>
    %c0_37 = arith.constant 0 : index
    %c8 = arith.constant 8 : index
    %345 = vector.load %arg6[%c0_37, %c8] : memref<2x128xf32, #tpu.memory_space<vmem>>, vector<2x4xf32>
    tpu.vector_store %arg6[%c0_37, %c8], %344 {strides = array<i32>} : memref<2x128xf32, #tpu.memory_space<vmem>>, vector<2x4xf32>,
    %346 = vector.extract_strided_slice %0 {offsets = [0, 43], sizes = [2, 4], strides = [1, 1]} : vector<2x128xf32> to vector<2x4xf32>
    %c0_38 = arith.constant 0 : index
    %c12 = arith.constant 12 : index
    %347 = vector.load %arg6[%c0_38, %c12] : memref<2x128xf32, #tpu.memory_space<vmem>>, vector<2x4xf32>
    tpu.vector_store %arg6[%c0_38, %c12], %346 {strides = array<i32>} : memref<2x128xf32, #tpu.memory_space<vmem>>, vector<2x4xf32>,
    %c0_39 = arith.constant 0 : index
    %c16 = arith.constant 16 : index
    %348 = vector.load %arg6[%c0_39, %c16] : memref<2x128xf32, #tpu.memory_space<vmem>>, vector<2x32xf32>
    tpu.vector_store %arg6[%c0_39, %c16], %230 {strides = array<i32>} : memref<2x128xf32, #tpu.memory_space<vmem>>, vector<2x32xf32>,
    %c0_40 = arith.constant 0 : index
    %c72 = arith.constant 72 : index
    %349 = vector.load %arg6[%c0_40, %c72] : memref<2x128xf32, #tpu.memory_space<vmem>>, vector<2x32xf32>
    tpu.vector_store %arg6[%c0_40, %c72], %320 {strides = array<i32>} : memref<2x128xf32, #tpu.memory_space<vmem>>, vector<2x32xf32>,
    %c0_41 = arith.constant 0 : index
    %c104 = arith.constant 104 : index
    %350 = vector.load %arg6[%c0_41, %c104] : memref<2x128xf32, #tpu.memory_space<vmem>>, vector<2x8xf32>
    tpu.vector_store %arg6[%c0_41, %c104], %340 {strides = array<i32>} : memref<2x128xf32, #tpu.memory_space<vmem>>, vector<2x8xf32>,
    %c0_42 = arith.constant 0 : index
    %c0_43 = arith.constant 0 : index
    %351 = vector.load %arg6[%c0_42, %c0_43] : memref<2x128xf32, #tpu.memory_space<vmem>>, vector<2x128xf32>
    %c328 = arith.constant 328 : index
    %c0_44 = arith.constant 0 : index
    %352 = vector.load %arg1[%c328, %c0_44] : memref<1192x128xf32, #tpu.memory_space<vmem>>, vector<128x32xf32>
    %cst_45 = arith.constant dense<0.000000e+00> : vector<2x32xf32>
    %353 = tpu.matmul %351, %352, %cst_45 {dimension_numbers = #tpu.dot_dimension_numbers<[1], [0], [0], [1], [0, 0, 1, 1], [], []>} : vector<2x128xf32>, vector<128x32xf32>, vector<2x32xf32> -> vector<2x32xf32>
    %c1179 = arith.constant 1179 : index
    %c0_46 = arith.constant 0 : index
    %354 = vector.load %arg1[%c1179, %c0_46] : memref<1192x128xf32, #tpu.memory_space<vmem>>, vector<1x32xf32>
    %355 = vector.broadcast %354 : vector<1x32xf32> to vector<2x32xf32>
    %356 = arith.addf %353, %355 : vector<2x32xf32>
    %c456 = arith.constant 456 : index
    %c0_47 = arith.constant 0 : index
    %357 = vector.load %arg1[%c456, %c0_47] : memref<1192x128xf32, #tpu.memory_space<vmem>>, vector<128x100xf32>
    %cst_48 = arith.constant dense<0.000000e+00> : vector<2x100xf32>
    %358 = tpu.matmul %351, %357, %cst_48 {dimension_numbers = #tpu.dot_dimension_numbers<[1], [0], [0], [1], [0, 0, 1, 1], [], []>} : vector<2x128xf32>, vector<128x100xf32>, vector<2x100xf32> -> vector<2x100xf32>
    %c1180 = arith.constant 1180 : index
    %c0_49 = arith.constant 0 : index
    %359 = vector.load %arg1[%c1180, %c0_49] : memref<1192x128xf32, #tpu.memory_space<vmem>>, vector<1x100xf32>
    %360 = vector.broadcast %359 : vector<1x100xf32> to vector<2x100xf32>
    %361 = arith.addf %358, %360 : vector<2x100xf32>
    %362 = math.tanh %361 : vector<2x100xf32>
    %c584 = arith.constant 584 : index
    %c0_50 = arith.constant 0 : index
    %363 = vector.load %arg1[%c584, %c0_50] : memref<1192x128xf32, #tpu.memory_space<vmem>>, vector<100x32xf32>
    %cst_51 = arith.constant dense<0.000000e+00> : vector<2x32xf32>
    %364 = tpu.matmul %362, %363, %cst_51 {dimension_numbers = #tpu.dot_dimension_numbers<[1], [0], [0], [1], [0, 0, 1, 1], [], []>} : vector<2x100xf32>, vector<100x32xf32>, vector<2x32xf32> -> vector<2x32xf32>
    %c1181 = arith.constant 1181 : index
    %c0_52 = arith.constant 0 : index
    %365 = vector.load %arg1[%c1181, %c0_52] : memref<1192x128xf32, #tpu.memory_space<vmem>>, vector<1x32xf32>
    %366 = vector.broadcast %365 : vector<1x32xf32> to vector<2x32xf32>
    %367 = arith.addf %364, %366 : vector<2x32xf32>
    %368 = vector.extract_strided_slice %356 {offsets = [0, 0], sizes = [2, 16], strides = [1, 1]} : vector<2x32xf32> to vector<2x16xf32>
    %369 = vector.extract_strided_slice %356 {offsets = [0, 16], sizes = [2, 16], strides = [1, 1]} : vector<2x32xf32> to vector<2x16xf32>
    %cst_53 = arith.constant 5.000000e-01 : f32
    %370 = vector.broadcast %cst_53 : f32 to vector<2x16xf32>
    %371 = arith.mulf %370, %369 : vector<2x16xf32>
    %372 = math.exp %371 : vector<2x16xf32>
    %373 = vector.extract_strided_slice %0 {offsets = [0, 47], sizes = [2, 16], strides = [1, 1]} : vector<2x128xf32> to vector<2x16xf32>
    %374 = arith.mulf %372, %373 : vector<2x16xf32>
    %375 = arith.addf %368, %374 : vector<2x16xf32>
    %c0_54 = arith.constant 0 : index
    %c48 = arith.constant 48 : index
    %376 = vector.load %arg6[%c0_54, %c48] : memref<2x128xf32, #tpu.memory_space<vmem>>, vector<2x16xf32>
    tpu.vector_store %arg6[%c0_54, %c48], %375 {strides = array<i32>} : memref<2x128xf32, #tpu.memory_space<vmem>>, vector<2x16xf32>,
    %c0_55 = arith.constant 0 : index
    %c0_56 = arith.constant 0 : index
    %377 = vector.load %arg6[%c0_55, %c0_56] : memref<2x128xf32, #tpu.memory_space<vmem>>, vector<2x128xf32>
    %c688 = arith.constant 688 : index
    %c0_57 = arith.constant 0 : index
    %378 = vector.load %arg1[%c688, %c0_57] : memref<1192x128xf32, #tpu.memory_space<vmem>>, vector<128x100xf32>
    %cst_58 = arith.constant dense<0.000000e+00> : vector<2x100xf32>
    %379 = tpu.matmul %377, %378, %cst_58 {dimension_numbers = #tpu.dot_dimension_numbers<[1], [0], [0], [1], [0, 0, 1, 1], [], []>} : vector<2x128xf32>, vector<128x100xf32>, vector<2x100xf32> -> vector<2x100xf32>
    %c1182 = arith.constant 1182 : index
    %c0_59 = arith.constant 0 : index
    %380 = vector.load %arg1[%c1182, %c0_59] : memref<1192x128xf32, #tpu.memory_space<vmem>>, vector<1x100xf32>
    %381 = vector.broadcast %380 : vector<1x100xf32> to vector<2x100xf32>
    %382 = arith.addf %379, %381 : vector<2x100xf32>
    %383 = math.tanh %382 : vector<2x100xf32>
    %c816 = arith.constant 816 : index
    %c0_60 = arith.constant 0 : index
    %384 = vector.load %arg1[%c816, %c0_60] : memref<1192x128xf32, #tpu.memory_space<vmem>>, vector<100x128xf32>
    %cst_61 = arith.constant dense<0.000000e+00> : vector<2x128xf32>
    %385 = tpu.matmul %383, %384, %cst_61 {dimension_numbers = #tpu.dot_dimension_numbers<[1], [0], [0], [1], [0, 0, 1, 1], [], []>} : vector<2x100xf32>, vector<100x128xf32>, vector<2x128xf32> -> vector<2x128xf32>
    %c1183 = arith.constant 1183 : index
    %c0_62 = arith.constant 0 : index
    %386 = vector.load %arg1[%c1183, %c0_62] : memref<1192x128xf32, #tpu.memory_space<vmem>>, vector<1x128xf32>
    %387 = vector.broadcast %386 : vector<1x128xf32> to vector<2x128xf32>
    %388 = arith.addf %385, %387 : vector<2x128xf32>
    %c0_63 = arith.constant 0 : index
    %c0_64 = arith.constant 0 : index
    %389 = vector.load %arg3[%c0_63, %c0_64] : memref<2x128xf32, #tpu.memory_space<vmem>>, vector<2x128xf32>
    tpu.vector_store %arg3[%c0_63, %c0_64], %388 {strides = array<i32>} : memref<2x128xf32, #tpu.memory_space<vmem>>, vector<2x128xf32>,
    %c920 = arith.constant 920 : index
    %c0_65 = arith.constant 0 : index
    %390 = vector.load %arg1[%c920, %c0_65] : memref<1192x128xf32, #tpu.memory_space<vmem>>, vector<128x8xf32>
    %cst_66 = arith.constant dense<0.000000e+00> : vector<2x8xf32>
    %391 = tpu.matmul %377, %390, %cst_66 {dimension_numbers = #tpu.dot_dimension_numbers<[1], [0], [0], [1], [0, 0, 1, 1], [], []>} : vector<2x128xf32>, vector<128x8xf32>, vector<2x8xf32> -> vector<2x8xf32>
    %c1184 = arith.constant 1184 : index
    %c0_67 = arith.constant 0 : index
    %392 = vector.load %arg1[%c1184, %c0_67] : memref<1192x128xf32, #tpu.memory_space<vmem>>, vector<1x8xf32>
    %393 = vector.broadcast %392 : vector<1x8xf32> to vector<2x8xf32>
    %394 = arith.addf %391, %393 : vector<2x8xf32>
    %c0_68 = arith.constant 0 : index
    %c64 = arith.constant 64 : index
    %395 = vector.load %arg6[%c0_68, %c64] : memref<2x128xf32, #tpu.memory_space<vmem>>, vector<2x8xf32>
    tpu.vector_store %arg6[%c0_68, %c64], %334 {strides = array<i32>} : memref<2x128xf32, #tpu.memory_space<vmem>>, vector<2x8xf32>,
    %c0_69 = arith.constant 0 : index
    %c0_70 = arith.constant 0 : index
    %396 = vector.load %arg6[%c0_69, %c0_70] : memref<2x128xf32, #tpu.memory_space<vmem>>, vector<2x128xf32>
    %c1048 = arith.constant 1048 : index
    %c0_71 = arith.constant 0 : index
    %397 = vector.load %arg1[%c1048, %c0_71] : memref<1192x128xf32, #tpu.memory_space<vmem>>, vector<128x128xf32>
    %cst_72 = arith.constant dense<0.000000e+00> : vector<2x128xf32>
    %398 = tpu.matmul %396, %397, %cst_72 {dimension_numbers = #tpu.dot_dimension_numbers<[1], [0], [0], [1], [0, 0, 1, 1], [], []>} : vector<2x128xf32>, vector<128x128xf32>, vector<2x128xf32> -> vector<2x128xf32>
    %c1185 = arith.constant 1185 : index
    %c0_73 = arith.constant 0 : index
    %399 = vector.load %arg1[%c1185, %c0_73] : memref<1192x128xf32, #tpu.memory_space<vmem>>, vector<1x128xf32>
    %400 = vector.broadcast %399 : vector<1x128xf32> to vector<2x128xf32>
    %401 = arith.addf %398, %400 : vector<2x128xf32>
    %c128 = arith.constant 128 : index
    %c0_74 = arith.constant 0 : index
    %402 = vector.load %arg1[%c128, %c0_74] : memref<1192x128xf32, #tpu.memory_space<vmem>>, vector<128x128xf32>
    %403 = vector.extract_strided_slice %4 {offsets = [0, 0], sizes = [2, 1], strides = [1, 1]} : vector<2x8xi32> to vector<2x1xi32>
    %404 = vector.broadcast %403 : vector<2x1xi32> to vector<2x128xi32>
    %405 = arith.cmpi eq, %9, %404 : vector<2x128xi32>
    %406 = arith.extui %405 : vector<2x128xi1> to vector<2x128xi32>
    %407 = arith.sitofp %406 : vector<2x128xi32> to vector<2x128xf32>
    %cst_75 = arith.constant dense<0.000000e+00> : vector<2x128xf32>
    %408 = tpu.matmul %407, %402, %cst_75 {dimension_numbers = #tpu.dot_dimension_numbers<[1], [0], [0], [1], [0, 0, 1, 1], [], []>} : vector<2x128xf32>, vector<128x128xf32>, vector<2x128xf32> -> vector<2x128xf32>
    %409 = arith.addf %408, %401 : vector<2x128xf32>
    %c0_76 = arith.constant 0 : index
    %c0_77 = arith.constant 0 : index
    %410 = vector.load %arg4[%c0_76, %c0_77] : memref<2x896xf32, #tpu.memory_space<vmem>>, vector<2x128xf32>
    tpu.vector_store %arg4[%c0_76, %c0_77], %409 {strides = array<i32>} : memref<2x896xf32, #tpu.memory_space<vmem>>, vector<2x128xf32>,
    %cst_78 = arith.constant dense<0xFF800000> : vector<2xf32>
    %411 = vector.multi_reduction <maximumf>, %409, %cst_78 [1] : vector<2x128xf32> to vector<2xf32>
    %412 = vector.shape_cast %411 : vector<2xf32> to vector<2x1xf32>
    %413 = vector.broadcast %412 : vector<2x1xf32> to vector<2x128xf32>
    %414 = arith.cmpf oge, %409, %413 : vector<2x128xf32>
    %c128_i32 = arith.constant 128 : i32
    %415 = vector.broadcast %c128_i32 : i32 to vector<2x128xi32>
    %416 = arith.select %414, %9, %415 : vector<2x128xi1>, vector<2x128xi32>
    %cst_79 = arith.constant dense<2147483647> : vector<2xi32>
    %417 = vector.multi_reduction <minsi>, %416, %cst_79 [1] : vector<2x128xi32> to vector<2xi32>
    %418 = vector.shape_cast %417 : vector<2xi32> to vector<2x1xi32>
    %c0_80 = arith.constant 0 : index
    %c0_81 = arith.constant 0 : index
    %419 = vector.load %arg5[%c0_80, %c0_81] : memref<2x7xi32, #tpu.memory_space<vmem>>, vector<2x1xi32>
    tpu.vector_store %arg5[%c0_80, %c0_81], %418 {strides = array<i32>} : memref<2x7xi32, #tpu.memory_space<vmem>>, vector<2x1xi32>,
    %420 = vector.extract_strided_slice %4 {offsets = [0, 1], sizes = [2, 1], strides = [1, 1]} : vector<2x8xi32> to vector<2x1xi32>
    %421 = vector.broadcast %420 : vector<2x1xi32> to vector<2x128xi32>
    %422 = arith.cmpi eq, %9, %421 : vector<2x128xi32>
    %423 = arith.extui %422 : vector<2x128xi1> to vector<2x128xi32>
    %424 = arith.sitofp %423 : vector<2x128xi32> to vector<2x128xf32>
    %cst_82 = arith.constant dense<0.000000e+00> : vector<2x128xf32>
    %425 = tpu.matmul %424, %402, %cst_82 {dimension_numbers = #tpu.dot_dimension_numbers<[1], [0], [0], [1], [0, 0, 1, 1], [], []>} : vector<2x128xf32>, vector<128x128xf32>, vector<2x128xf32> -> vector<2x128xf32>
    %426 = arith.addf %425, %401 : vector<2x128xf32>
    %c0_83 = arith.constant 0 : index
    %c128_84 = arith.constant 128 : index
    %427 = vector.load %arg4[%c0_83, %c128_84] : memref<2x896xf32, #tpu.memory_space<vmem>>, vector<2x128xf32>
    tpu.vector_store %arg4[%c0_83, %c128_84], %426 {strides = array<i32>} : memref<2x896xf32, #tpu.memory_space<vmem>>, vector<2x128xf32>,
    %cst_85 = arith.constant dense<0xFF800000> : vector<2xf32>
    %428 = vector.multi_reduction <maximumf>, %426, %cst_85 [1] : vector<2x128xf32> to vector<2xf32>
    %429 = vector.shape_cast %428 : vector<2xf32> to vector<2x1xf32>
    %430 = vector.broadcast %429 : vector<2x1xf32> to vector<2x128xf32>
    %431 = arith.cmpf oge, %426, %430 : vector<2x128xf32>
    %c128_i32_86 = arith.constant 128 : i32
    %432 = vector.broadcast %c128_i32_86 : i32 to vector<2x128xi32>
    %433 = arith.select %431, %9, %432 : vector<2x128xi1>, vector<2x128xi32>
    %cst_87 = arith.constant dense<2147483647> : vector<2xi32>
    %434 = vector.multi_reduction <minsi>, %433, %cst_87 [1] : vector<2x128xi32> to vector<2xi32>
    %435 = vector.shape_cast %434 : vector<2xi32> to vector<2x1xi32>
    %c0_88 = arith.constant 0 : index
    %c1 = arith.constant 1 : index
    %436 = vector.load %arg5[%c0_88, %c1] : memref<2x7xi32, #tpu.memory_space<vmem>>, vector<2x1xi32>
    tpu.vector_store %arg5[%c0_88, %c1], %435 {strides = array<i32>} : memref<2x7xi32, #tpu.memory_space<vmem>>, vector<2x1xi32>,
    %437 = vector.extract_strided_slice %4 {offsets = [0, 2], sizes = [2, 1], strides = [1, 1]} : vector<2x8xi32> to vector<2x1xi32>
    %438 = vector.broadcast %437 : vector<2x1xi32> to vector<2x128xi32>
    %439 = arith.cmpi eq, %9, %438 : vector<2x128xi32>
    %440 = arith.extui %439 : vector<2x128xi1> to vector<2x128xi32>
    %441 = arith.sitofp %440 : vector<2x128xi32> to vector<2x128xf32>
    %cst_89 = arith.constant dense<0.000000e+00> : vector<2x128xf32>
    %442 = tpu.matmul %441, %402, %cst_89 {dimension_numbers = #tpu.dot_dimension_numbers<[1], [0], [0], [1], [0, 0, 1, 1], [], []>} : vector<2x128xf32>, vector<128x128xf32>, vector<2x128xf32> -> vector<2x128xf32>
    %443 = arith.addf %442, %401 : vector<2x128xf32>
    %c0_90 = arith.constant 0 : index
    %c256_91 = arith.constant 256 : index
    %444 = vector.load %arg4[%c0_90, %c256_91] : memref<2x896xf32, #tpu.memory_space<vmem>>, vector<2x128xf32>
    tpu.vector_store %arg4[%c0_90, %c256_91], %443 {strides = array<i32>} : memref<2x896xf32, #tpu.memory_space<vmem>>, vector<2x128xf32>,
    %cst_92 = arith.constant dense<0xFF800000> : vector<2xf32>
    %445 = vector.multi_reduction <maximumf>, %443, %cst_92 [1] : vector<2x128xf32> to vector<2xf32>
    %446 = vector.shape_cast %445 : vector<2xf32> to vector<2x1xf32>
    %447 = vector.broadcast %446 : vector<2x1xf32> to vector<2x128xf32>
    %448 = arith.cmpf oge, %443, %447 : vector<2x128xf32>
    %c128_i32_93 = arith.constant 128 : i32
    %449 = vector.broadcast %c128_i32_93 : i32 to vector<2x128xi32>
    %450 = arith.select %448, %9, %449 : vector<2x128xi1>, vector<2x128xi32>
    %cst_94 = arith.constant dense<2147483647> : vector<2xi32>
    %451 = vector.multi_reduction <minsi>, %450, %cst_94 [1] : vector<2x128xi32> to vector<2xi32>
    %452 = vector.shape_cast %451 : vector<2xi32> to vector<2x1xi32>
    %c0_95 = arith.constant 0 : index
    %c2 = arith.constant 2 : index
    %453 = vector.load %arg5[%c0_95, %c2] : memref<2x7xi32, #tpu.memory_space<vmem>>, vector<2x1xi32>
    tpu.vector_store %arg5[%c0_95, %c2], %452 {strides = array<i32>} : memref<2x7xi32, #tpu.memory_space<vmem>>, vector<2x1xi32>,
    %454 = vector.extract_strided_slice %4 {offsets = [0, 3], sizes = [2, 1], strides = [1, 1]} : vector<2x8xi32> to vector<2x1xi32>
    %455 = vector.broadcast %454 : vector<2x1xi32> to vector<2x128xi32>
    %456 = arith.cmpi eq, %9, %455 : vector<2x128xi32>
    %457 = arith.extui %456 : vector<2x128xi1> to vector<2x128xi32>
    %458 = arith.sitofp %457 : vector<2x128xi32> to vector<2x128xf32>
    %cst_96 = arith.constant dense<0.000000e+00> : vector<2x128xf32>
    %459 = tpu.matmul %458, %402, %cst_96 {dimension_numbers = #tpu.dot_dimension_numbers<[1], [0], [0], [1], [0, 0, 1, 1], [], []>} : vector<2x128xf32>, vector<128x128xf32>, vector<2x128xf32> -> vector<2x128xf32>
    %460 = arith.addf %459, %401 : vector<2x128xf32>
    %c0_97 = arith.constant 0 : index
    %c384 = arith.constant 384 : index
    %461 = vector.load %arg4[%c0_97, %c384] : memref<2x896xf32, #tpu.memory_space<vmem>>, vector<2x128xf32>
    tpu.vector_store %arg4[%c0_97, %c384], %460 {strides = array<i32>} : memref<2x896xf32, #tpu.memory_space<vmem>>, vector<2x128xf32>,
    %cst_98 = arith.constant dense<0xFF800000> : vector<2xf32>
    %462 = vector.multi_reduction <maximumf>, %460, %cst_98 [1] : vector<2x128xf32> to vector<2xf32>
    %463 = vector.shape_cast %462 : vector<2xf32> to vector<2x1xf32>
    %464 = vector.broadcast %463 : vector<2x1xf32> to vector<2x128xf32>
    %465 = arith.cmpf oge, %460, %464 : vector<2x128xf32>
    %c128_i32_99 = arith.constant 128 : i32
    %466 = vector.broadcast %c128_i32_99 : i32 to vector<2x128xi32>
    %467 = arith.select %465, %9, %466 : vector<2x128xi1>, vector<2x128xi32>
    %cst_100 = arith.constant dense<2147483647> : vector<2xi32>
    %468 = vector.multi_reduction <minsi>, %467, %cst_100 [1] : vector<2x128xi32> to vector<2xi32>
    %469 = vector.shape_cast %468 : vector<2xi32> to vector<2x1xi32>
    %c0_101 = arith.constant 0 : index
    %c3 = arith.constant 3 : index
    %470 = vector.load %arg5[%c0_101, %c3] : memref<2x7xi32, #tpu.memory_space<vmem>>, vector<2x1xi32>
    tpu.vector_store %arg5[%c0_101, %c3], %469 {strides = array<i32>} : memref<2x7xi32, #tpu.memory_space<vmem>>, vector<2x1xi32>,
    %471 = vector.extract_strided_slice %4 {offsets = [0, 4], sizes = [2, 1], strides = [1, 1]} : vector<2x8xi32> to vector<2x1xi32>
    %472 = vector.broadcast %471 : vector<2x1xi32> to vector<2x128xi32>
    %473 = arith.cmpi eq, %9, %472 : vector<2x128xi32>
    %474 = arith.extui %473 : vector<2x128xi1> to vector<2x128xi32>
    %475 = arith.sitofp %474 : vector<2x128xi32> to vector<2x128xf32>
    %cst_102 = arith.constant dense<0.000000e+00> : vector<2x128xf32>
    %476 = tpu.matmul %475, %402, %cst_102 {dimension_numbers = #tpu.dot_dimension_numbers<[1], [0], [0], [1], [0, 0, 1, 1], [], []>} : vector<2x128xf32>, vector<128x128xf32>, vector<2x128xf32> -> vector<2x128xf32>
    %477 = arith.addf %476, %401 : vector<2x128xf32>
    %c0_103 = arith.constant 0 : index
    %c512 = arith.constant 512 : index
    %478 = vector.load %arg4[%c0_103, %c512] : memref<2x896xf32, #tpu.memory_space<vmem>>, vector<2x128xf32>
    tpu.vector_store %arg4[%c0_103, %c512], %477 {strides = array<i32>} : memref<2x896xf32, #tpu.memory_space<vmem>>, vector<2x128xf32>,
    %cst_104 = arith.constant dense<0xFF800000> : vector<2xf32>
    %479 = vector.multi_reduction <maximumf>, %477, %cst_104 [1] : vector<2x128xf32> to vector<2xf32>
    %480 = vector.shape_cast %479 : vector<2xf32> to vector<2x1xf32>
    %481 = vector.broadcast %480 : vector<2x1xf32> to vector<2x128xf32>
    %482 = arith.cmpf oge, %477, %481 : vector<2x128xf32>
    %c128_i32_105 = arith.constant 128 : i32
    %483 = vector.broadcast %c128_i32_105 : i32 to vector<2x128xi32>
    %484 = arith.select %482, %9, %483 : vector<2x128xi1>, vector<2x128xi32>
    %cst_106 = arith.constant dense<2147483647> : vector<2xi32>
    %485 = vector.multi_reduction <minsi>, %484, %cst_106 [1] : vector<2x128xi32> to vector<2xi32>
    %486 = vector.shape_cast %485 : vector<2xi32> to vector<2x1xi32>
    %c0_107 = arith.constant 0 : index
    %c4 = arith.constant 4 : index
    %487 = vector.load %arg5[%c0_107, %c4] : memref<2x7xi32, #tpu.memory_space<vmem>>, vector<2x1xi32>
    tpu.vector_store %arg5[%c0_107, %c4], %486 {strides = array<i32>} : memref<2x7xi32, #tpu.memory_space<vmem>>, vector<2x1xi32>,
    %488 = vector.extract_strided_slice %4 {offsets = [0, 5], sizes = [2, 1], strides = [1, 1]} : vector<2x8xi32> to vector<2x1xi32>
    %489 = vector.broadcast %488 : vector<2x1xi32> to vector<2x128xi32>
    %490 = arith.cmpi eq, %9, %489 : vector<2x128xi32>
    %491 = arith.extui %490 : vector<2x128xi1> to vector<2x128xi32>
    %492 = arith.sitofp %491 : vector<2x128xi32> to vector<2x128xf32>
    %cst_108 = arith.constant dense<0.000000e+00> : vector<2x128xf32>
    %493 = tpu.matmul %492, %402, %cst_108 {dimension_numbers = #tpu.dot_dimension_numbers<[1], [0], [0], [1], [0, 0, 1, 1], [], []>} : vector<2x128xf32>, vector<128x128xf32>, vector<2x128xf32> -> vector<2x128xf32>
    %494 = arith.addf %493, %401 : vector<2x128xf32>
    %c0_109 = arith.constant 0 : index
    %c640 = arith.constant 640 : index
    %495 = vector.load %arg4[%c0_109, %c640] : memref<2x896xf32, #tpu.memory_space<vmem>>, vector<2x128xf32>
    tpu.vector_store %arg4[%c0_109, %c640], %494 {strides = array<i32>} : memref<2x896xf32, #tpu.memory_space<vmem>>, vector<2x128xf32>,
    %cst_110 = arith.constant dense<0xFF800000> : vector<2xf32>
    %496 = vector.multi_reduction <maximumf>, %494, %cst_110 [1] : vector<2x128xf32> to vector<2xf32>
    %497 = vector.shape_cast %496 : vector<2xf32> to vector<2x1xf32>
    %498 = vector.broadcast %497 : vector<2x1xf32> to vector<2x128xf32>
    %499 = arith.cmpf oge, %494, %498 : vector<2x128xf32>
    %c128_i32_111 = arith.constant 128 : i32
    %500 = vector.broadcast %c128_i32_111 : i32 to vector<2x128xi32>
    %501 = arith.select %499, %9, %500 : vector<2x128xi1>, vector<2x128xi32>
    %cst_112 = arith.constant dense<2147483647> : vector<2xi32>
    %502 = vector.multi_reduction <minsi>, %501, %cst_112 [1] : vector<2x128xi32> to vector<2xi32>
    %503 = vector.shape_cast %502 : vector<2xi32> to vector<2x1xi32>
    %c0_113 = arith.constant 0 : index
    %c5 = arith.constant 5 : index
    %504 = vector.load %arg5[%c0_113, %c5] : memref<2x7xi32, #tpu.memory_space<vmem>>, vector<2x1xi32>
    tpu.vector_store %arg5[%c0_113, %c5], %503 {strides = array<i32>} : memref<2x7xi32, #tpu.memory_space<vmem>>, vector<2x1xi32>,
    %505 = vector.extract_strided_slice %4 {offsets = [0, 6], sizes = [2, 1], strides = [1, 1]} : vector<2x8xi32> to vector<2x1xi32>
    %506 = vector.broadcast %505 : vector<2x1xi32> to vector<2x128xi32>
    %507 = arith.cmpi eq, %9, %506 : vector<2x128xi32>
    %508 = arith.extui %507 : vector<2x128xi1> to vector<2x128xi32>
    %509 = arith.sitofp %508 : vector<2x128xi32> to vector<2x128xf32>
    %cst_114 = arith.constant dense<0.000000e+00> : vector<2x128xf32>
    %510 = tpu.matmul %509, %402, %cst_114 {dimension_numbers = #tpu.dot_dimension_numbers<[1], [0], [0], [1], [0, 0, 1, 1], [], []>} : vector<2x128xf32>, vector<128x128xf32>, vector<2x128xf32> -> vector<2x128xf32>
    %511 = arith.addf %510, %401 : vector<2x128xf32>
    %c0_115 = arith.constant 0 : index
    %c768 = arith.constant 768 : index
    %512 = vector.load %arg4[%c0_115, %c768] : memref<2x896xf32, #tpu.memory_space<vmem>>, vector<2x128xf32>
    tpu.vector_store %arg4[%c0_115, %c768], %511 {strides = array<i32>} : memref<2x896xf32, #tpu.memory_space<vmem>>, vector<2x128xf32>,
    %cst_116 = arith.constant dense<0xFF800000> : vector<2xf32>
    %513 = vector.multi_reduction <maximumf>, %511, %cst_116 [1] : vector<2x128xf32> to vector<2xf32>
    %514 = vector.shape_cast %513 : vector<2xf32> to vector<2x1xf32>
    %515 = vector.broadcast %514 : vector<2x1xf32> to vector<2x128xf32>
    %516 = arith.cmpf oge, %511, %515 : vector<2x128xf32>
    %c128_i32_117 = arith.constant 128 : i32
    %517 = vector.broadcast %c128_i32_117 : i32 to vector<2x128xi32>
    %518 = arith.select %516, %9, %517 : vector<2x128xi1>, vector<2x128xi32>
    %cst_118 = arith.constant dense<2147483647> : vector<2xi32>
    %519 = vector.multi_reduction <minsi>, %518, %cst_118 [1] : vector<2x128xi32> to vector<2xi32>
    %520 = vector.shape_cast %519 : vector<2xi32> to vector<2x1xi32>
    %c0_119 = arith.constant 0 : index
    %c6 = arith.constant 6 : index
    %521 = vector.load %arg5[%c0_119, %c6] : memref<2x7xi32, #tpu.memory_space<vmem>>, vector<2x1xi32>
    tpu.vector_store %arg5[%c0_119, %c6], %520 {strides = array<i32>} : memref<2x7xi32, #tpu.memory_space<vmem>>, vector<2x1xi32>,
    %cst_120 = arith.constant 0.000000e+00 : f32
    %522 = vector.broadcast %cst_120 : f32 to vector<2x128xf32>
    %c0_121 = arith.constant 0 : index
    %c0_122 = arith.constant 0 : index
    %523 = vector.load %arg2[%c0_121, %c0_122] : memref<2x128xf32, #tpu.memory_space<vmem>>, vector<2x128xf32>
    tpu.vector_store %arg2[%c0_121, %c0_122], %522 {strides = array<i32>} : memref<2x128xf32, #tpu.memory_space<vmem>>, vector<2x128xf32>,
    %c0_123 = arith.constant 0 : index
    %c0_124 = arith.constant 0 : index
    %524 = vector.load %arg2[%c0_123, %c0_124] : memref<2x128xf32, #tpu.memory_space<vmem>>, vector<2x32xf32>
    tpu.vector_store %arg2[%c0_123, %c0_124], %356 {strides = array<i32>} : memref<2x128xf32, #tpu.memory_space<vmem>>, vector<2x32xf32>,
    %c0_125 = arith.constant 0 : index
    %c32 = arith.constant 32 : index
    %525 = vector.load %arg2[%c0_125, %c32] : memref<2x128xf32, #tpu.memory_space<vmem>>, vector<2x32xf32>
    tpu.vector_store %arg2[%c0_125, %c32], %367 {strides = array<i32>} : memref<2x128xf32, #tpu.memory_space<vmem>>, vector<2x32xf32>,
    %c0_126 = arith.constant 0 : index
    %c64_127 = arith.constant 64 : index
    %526 = vector.load %arg2[%c0_126, %c64_127] : memref<2x128xf32, #tpu.memory_space<vmem>>, vector<2x8xf32>
    tpu.vector_store %arg2[%c0_126, %c64_127], %394 {strides = array<i32>} : memref<2x128xf32, #tpu.memory_space<vmem>>, vector<2x8xf32>,
    return
  }
}

</mosaic_0001>

<bundles_post_ra>
// kernel: kg_rnn_cvae_forward.1
= control target key start
LH: loop header
LB: loop body
LE: loop exit
PB: predicated region body
PF: predicated region fallthrough
CT: control target
= control target key end

     0   :  { %11 = vsyncpa [#allocation4], 0  ;;  %s4893_s0 = inlined_call_operand.vmem [shape: f32[2,128], index: 0, kind: input, shape index: {}]   ;;  %s4894_s1 = inlined_call_operand.hbm [shape: f32[1192,128], index: 1, kind: input, shape index: {}]   ;;  %s4895_s2 = inlined_call_operand.vmem [shape: f32[2,128], index: 2, kind: output, shape index: {0}]   ;;  %s4896_s3 = inlined_call_operand.hbm [shape: f32[2,128], index: 3, kind: output, shape index: {1}]   ;;  %s4897_s4 = inlined_call_operand.hbm [shape: f32[2,896], index: 4, kind: output, shape index: {2}]   ;;  %s4898_s5 = inlined_call_operand.hbm [shape: s32[2,7], index: 5, kind: output, shape index: {3}]  }
   0x1   :  { %12 = vsyncpa [#allocation5], 0 }
   0x2   :  { %13 = vsyncpa [#allocation8], 0  ;;  %s4126_s18 = smov [#allocation3]   ;;  %s4032_s22 = scalar_lea.hbm %s4894_s1, 19072 }
   0x3   :  { %s21_s19 = sshll.u32 %s4126_s18, 4  ;;  %p4033_p0 = scmp.ne.s32.totalorder %s4894_s1, %s4032_s22  ;;  %s22_s19 = int_to_ptr.vmem [resolvable:$true] %s21_s19 }
   0x4   :  { %p4036_p1 = scmp.lt.u32.totalorder %s4032_s22, %s4894_s1 }
   0x6   :  { %p4038_p2 = pnand %p4036_p1, %p4033_p0 }
   0x8   :  { %4041 = shalt.err (!%p4038_p2)
}
   0x9   :  { %s4042_s27 = scalar_lea.vmem %s22_s19, 19072  ;;  %p4047_p4 = scmp.lt.s32.totalorder %s22_s19, %s22_s19 }
   0xa   :  { %p4043_p3 = scmp.ne.s32.totalorder %s22_s19, %s4042_s27  ;;  %p4048_p5 = scmp.lt.s32.totalorder %s4042_s27, %s4042_s27 }
   0xc   :  { %p4049_p6 = por %p4048_p5, %p4047_p4 }
   0xe   :  { %p4050_p7 = pnand %p4049_p6, %p4043_p3 }
  0x10   :  { %4053 = shalt.err (!%p4050_p7)
}
  0x11   :  { %s4127_s28 = smov 128   ;;  %s4128_s29 = smov 8  }
  0x12   :  { %27 = dma.hbm_to_vmem [thread:$0]  %s4894_s1, 19072, %s22_s19, [#allocation4], %s4127_s28, %s4127_s28, %s4128_s29  }
  0x13   :  { %4120 = dma.done.wait [#allocation4], 19072  }
  0x14   :  { %4121 = vsyncadd [#allocation4], 4294948224  ;;  %v4129_v0 = vmov 2   ;;  %v4130_v1 = vmov 0   ;;  %v4230_v2 = vld [vmem:[%s4893_s0] sm:$0x3]  ;;  %v33_v59 = vlaneseq }
  0x15   :  { %3962 = vset.pattern.permute.xlu1 %v4129_v0  ;;  %3960 = vset.pattern.permute.xlu0 %v4130_v1  ;;  %v4131_v3 = vmov 0.0|0.0   ;;  %v35_v4 = vld [vmem:[#allocation3] sm:$0xff]  ;;  %v36_v5 = vld [vmem:[#allocation3 + $0x8] sm:$0xff]  ;;  %v3901_v6 = vtrunc.f32 %v4230_v2  ;;  %v37_v8 = vld [vmem:[#allocation3 + $0x10] sm:$0xff]  ;;  %v4132_v10 = vmov 0.0   ;;  %v4133_v16 = vmov 3  }
  0x16   :  { %3472 = vmatprep.subr.bf16.mxu0 %v4131_v3  ;;  %3496 = vmatprep.subr.bf16.mxu1 %v4131_v3  ;;  %v4235_v7 = vpack.c.bf16 %v36_v5, %v35_v4  ;;  %v38_v9 = vld [vmem:[#allocation3 + $0x18] sm:$0xff]  ;;  %1025 = vst [vmem:[#allocation2] sm:$0x3] %v4132_v10  ;;  %2391 = vst [vmem:[%s4895_s2] sm:$0x3] %v4132_v10  ;;  %v39_v13 = vld [vmem:[#allocation3 + $0x20] sm:$0xff]  ;;  %v4134_v17 = vmov 1  }
  0x17   :  { %v4242_v11 = vcvt.f32.s32 %v3901_v6  ;;  %v4245_v12 = vpack.c.bf16 %v38_v9, %v37_v8  ;;  %v40_v14 = vld [vmem:[#allocation3 + $0x28] sm:$0xff]  ;;  %v41_v18 = vld [vmem:[#allocation3 + $0x30] sm:$0xff]  ;;  %v42_v19 = vld [vmem:[#allocation3 + $0x38] sm:$0xff]  ;;  %v4135_v21 = vmov 4   ;;  %v4136_v22 = vmov 5   ;;  %s4167_s9 = smov 96  }
  0x18   :  { %3474 = vmatpush3.bf16.msra.mxu0 %v4235_v7  ;;  %3498 = vmatpush3.bf16.msra.mxu1 %v4235_v7  ;;  %v4253_v15 = vpack.c.bf16 %v40_v14, %v39_v13  ;;  %v4265_v20 = vpack.c.bf16 %v42_v19, %v41_v18  ;;  %v43_v23 = vld [vmem:[#allocation3 + $0x40] sm:$0xff]  ;;  %v44_v24 = vld [vmem:[#allocation3 + $0x48] sm:$0xff]  ;;  %v4137_v26 = vmov 6   ;;  %v4138_v27 = vmov 8   ;;  %v45_v28 = vld [vmem:[#allocation3 + $0x50] sm:$0xff]  ;;  %s4169_s10 = smov 127  }
  0x19   :  { %3475 = vmatprep.subr.bf16.mxu0 %v4131_v3  ;;  %3499 = vmatprep.subr.bf16.mxu1 %v4131_v3  ;;  %v4275_v25 = vpack.c.bf16 %v44_v24, %v43_v23  ;;  %v46_v29 = vld [vmem:[#allocation3 + $0x58] sm:$0xff]  ;;  %v4139_v31 = vmov 7   ;;  %v4140_v32 = vmov 16   ;;  %v47_v33 = vld [vmem:[#allocation3 + $0x60] sm:$0xff]  ;;  %v48_v34 = vld [vmem:[#allocation3 + $0x68] sm:$0xff]  ;;  %v4141_v36 = vmov 9  }
  0x1a   :  { %81 = vperm.xlu1 %3962, %v4242_v11   ;;  %67 = vperm.xlu0 %3960, %v4242_v11   ;;  %v4284_v30 = vpack.c.bf16 %v46_v29, %v45_v28  ;;  %v4293_v35 = vpack.c.bf16 %v48_v34, %v47_v33  ;;  %v4142_v37 = vmov 18   ;;  %v49_v38 = vld [vmem:[#allocation3 + $0x70] sm:$0xff]  ;;  %v50_v39 = vld [vmem:[#allocation3 + $0x78] sm:$0xff]  ;;  %vm4143_vm0 = vmmov 0   ;;  %s4170_s11 = smov 126   ;;  %s4171_s12 = smov 97  }
  0x1b   :  { %2858 = vmatprep.mubr.msk.f32.mxu0 %vm4143_vm0, %v4132_v10  ;;  %v4302_v40 = vpack.c.bf16 %v50_v39, %v49_v38  ;;  %2893 = vmatprep.mubr.msk.f32.mxu1 %vm4143_vm0, %v4132_v10  ;;  %v4144_v41 = vmov 10   ;;  %v4145_v42 = vmov 13   ;;  %v4146_v43 = vmov 17   ;;  %s4172_s13 = smov 16   ;;  %s4173_s14 = smov 72  }
  0x1c   :  { %3477 = vmatpush3.bf16.msra.mxu0 %v4245_v12  ;;  %3501 = vmatpush3.bf16.msra.mxu1 %v4245_v12  ;;  %v4147_v44 = vmov 21   ;;  %v4148_v45 = vmov 11   ;;  %v4149_v46 = vmov 23   ;;  %v4150_v47 = vmov 12   ;;  %s4174_s15 = smov 104   ;;  %s4175_s18 = smov 112  }
  0x1d   :  { %3478 = vmatprep.subr.bf16.mxu0 %v4131_v3  ;;  %3502 = vmatprep.subr.bf16.mxu1 %v4131_v3  ;;  %v4151_v48 = vmov 35   ;;  %v4152_v49 = vmov 19   ;;  %v4153_v50 = vmov 20   ;;  %v4154_v51 = vmov 14   ;;  %s4176_s19 = smov 48   ;;  %s4177_s20 = smov 64  }
  0x1e   :  { %3963 = vset.pattern.permute.xlu1 %v4133_v16  ;;  %3961 = vset.pattern.permute.xlu0 %v4134_v17  ;;  %v4155_v52 = vmov 15   ;;  %v4156_v53 = vmov 22   ;;  %v4157_v54 = vmov 36   ;;  %v58_v55 = vmax.f32 %v4230_v2, 1.0  ;;  %s4179_s21 = smov 32   ;;  %s4180_s22 = smov [#allocation7]  }
  0x1f   :  { %88 = vperm.xlu1 %3963, %v4242_v11   ;;  %74 = vperm.xlu0 %3961, %v4242_v11   ;;  %v4158_v56 = vmov 24   ;;  %v4159_v57 = vmov 28   ;;  %v4160_v58 = vmov 25   ;;  %v4330_v60 = vand.u32 127, %v33_v59  ;;  %s2423_s23 = sshll.u32 %s4180_s22, 4  ;;  %s4181_s24 = smov [#allocation6]   ;;  %s2424_s23 = int_to_ptr.vmem [resolvable:$true] %s2423_s23 }
  0x20   :  { %3480 = vmatpush3.bf16.msra.mxu0 %v4253_v15  ;;  %3504 = vmatpush3.bf16.msra.mxu1 %v4253_v15  ;;  %s2413_s25 = sshll.u32 %s4181_s24, 4  ;;  %s4054_s26 = scalar_lea.vmem %s2424_s23, 224  ;;  %s2414_s25 = int_to_ptr.vmem [resolvable:$true] %s2413_s25 }
  0x21   :  { %3481 = vmatprep.subr.bf16.mxu0 %v4131_v3  ;;  %3505 = vmatprep.subr.bf16.mxu1 %v4131_v3  ;;  %p4055_p8 = scmp.ne.s32.totalorder %s2424_s23, %s4054_s26  ;;  %p4059_p9 = scmp.lt.s32.totalorder %s2424_s23, %s2424_s23 }
  0x22   :  { %p4060_p10 = scmp.lt.s32.totalorder %s4054_s26, %s4054_s26 }
  0x23   :  { %3964 = vset.pattern.permute.xlu1 %v4135_v21  ;;  %3965 = vset.pattern.permute.xlu0 %v4136_v22 }
  0x24   :  { %95 = vperm.xlu1 %3964, %v4242_v11   ;;  %102 = vperm.xlu0 %3965, %v4242_v11   ;;  %p4061_p11 = por %p4060_p10, %p4059_p9 }
  0x25   :  { %3483 = vmatpush3.bf16.msra.mxu0 %v4265_v20  ;;  %3507 = vmatpush3.bf16.msra.mxu1 %v4265_v20 }
  0x26   :  { %3484 = vmatprep.subr.bf16.mxu0 %v4131_v3  ;;  %3508 = vmatprep.subr.bf16.mxu1 %v4131_v3  ;;  %p4062_p12 = pnand %p4061_p11, %p4055_p8 }
  0x28   :  { %3966 = vset.pattern.permute.xlu1 %v4137_v26  ;;  %3968 = vset.pattern.permute.xlu0 %v4138_v27 }
  0x29   :  { %109 = vperm.xlu1 %3966, %v4242_v11   ;;  %212 = vperm.xlu0 %3968, %v4242_v11  }
  0x2a   :  { %3486 = vmatpush3.bf16.msra.mxu0 %v4275_v25  ;;  %3510 = vmatpush3.bf16.msra.mxu1 %v4275_v25 }
  0x2b   :  { %3487 = vmatprep.subr.bf16.mxu0 %v4131_v3  ;;  %3511 = vmatprep.subr.bf16.mxu1 %v4131_v3 }
  0x2d   :  { %3967 = vset.pattern.permute.xlu1 %v4139_v31  ;;  %3971 = vset.pattern.permute.xlu0 %v4140_v32 }
  0x2e   :  { %116 = vperm.xlu1 %3967, %v4242_v11   ;;  %351 = vperm.xlu0 %3971, %v4242_v11  }
  0x2f   :  { %3489 = vmatpush3.bf16.msra.mxu0 %v4284_v30  ;;  %3513 = vmatpush3.bf16.msra.mxu1 %v4284_v30 }
  0x30   :  { %3490 = vmatprep.subr.bf16.mxu0 %v4131_v3  ;;  %3514 = vmatprep.subr.bf16.mxu1 %v4131_v3 }
  0x32   :  { %3969 = vset.pattern.permute.xlu1 %v4141_v36  ;;  %3974 = vset.pattern.permute.xlu0 %v4142_v37 }
  0x33   :  { %219 = vperm.xlu1 %3969, %v4242_v11   ;;  %365 = vperm.xlu0 %3974, %v4242_v11  }
  0x34   :  { %3492 = vmatpush3.bf16.msra.mxu0 %v4293_v35  ;;  %3516 = vmatpush3.bf16.msra.mxu1 %v4293_v35 }
  0x35   :  { %3493 = vmatprep.subr.bf16.mxu0 %v4131_v3  ;;  %3517 = vmatprep.subr.bf16.mxu1 %v4131_v3 }
  0x37   :  { %3970 = vset.pattern.permute.xlu1 %v4144_v41  ;;  %3977 = vset.pattern.permute.xlu0 %v4145_v42 }
  0x38   :  { %226 = vperm.xlu1 %3970, %v4242_v11   ;;  %247 = vperm.xlu0 %3977, %v4242_v11  }
  0x39   :  { %3495 = vmatpush3.bf16.msra.mxu0 %v4302_v40  ;;  %3519 = vmatpush3.bf16.msra.mxu1 %v4302_v40 }
  0x3a   :  { %3520 = vmatprep.subr.bf16.mxu0 %v4131_v3  ;;  %3544 = vmatprep.subr.bf16.mxu1 %v4131_v3 }
  0x3c   :  { %3972 = vset.pattern.permute.xlu1 %v4146_v43  ;;  %3980 = vset.pattern.permute.xlu0 %v4147_v44 }
  0x3d   :  { %358 = vperm.xlu1 %3972, %v4242_v11   ;;  %386 = vperm.xlu0 %3980, %v4242_v11  }
  0x41   :  { %3973 = vset.pattern.permute.xlu1 %v4148_v45  ;;  %3983 = vset.pattern.permute.xlu0 %v4149_v46 }
  0x42   :  { %233 = vperm.xlu1 %3973, %v4242_v11   ;;  %400 = vperm.xlu0 %3983, %v4242_v11  }
  0x46   :  { %3975 = vset.pattern.permute.xlu1 %v4150_v47  ;;  %3986 = vset.pattern.permute.xlu0 %v4151_v48 }
  0x47   :  { %240 = vperm.xlu1 %3975, %v4242_v11   ;;  %53 = vperm.xlu0 %3986, %v4242_v11  }
  0x4b   :  { %3976 = vset.pattern.permute.xlu1 %v4152_v49  ;;  %3987 = vset.pattern.permute.xlu0 %v4158_v56 }
  0x4c   :  { %372 = vperm.xlu1 %3976, %v4242_v11   ;;  %615 = vperm.xlu0 %3987, %v4242_v11  }
  0x50   :  { %3978 = vset.pattern.permute.xlu1 %v4153_v50  ;;  %3991 = vset.pattern.permute.xlu0 %v4159_v57 }
  0x51   :  { %379 = vperm.xlu1 %3978, %v4242_v11   ;;  %664 = vperm.xlu0 %3991, %v4242_v11  }
  0x55   :  { %3979 = vset.pattern.permute.xlu1 %v4154_v51  ;;  %3994 = vset.pattern.permute.xlu0 %v4130_v1 }
  0x56   :  { %254 = vperm.xlu1 %3979, %v4242_v11  }
  0x5a   :  { %3981 = vset.pattern.permute.xlu1 %v4155_v52 }
  0x5b   :  { %261 = vperm.xlu1 %3981, %v4242_v11  }
  0x5f   :  { %3982 = vset.pattern.permute.xlu1 %v4156_v53 }
  0x60   :  { %393 = vperm.xlu1 %3982, %v4242_v11  }
  0x64   :  { %3984 = vset.pattern.permute.xlu1 %v4157_v54 }
  0x65   :  { %602 = vperm.xlu1 %3984, %v4242_v11  }
  0x69   :  { %3985 = vset.pattern.permute.xlu1 %v4151_v48 }
  0x6a   :  { %61 = vperm.xlu1 %3985, %v58_v55  }
  0x6e   :  { %3988 = vset.pattern.permute.xlu1 %v4160_v58 }
  0x99   :  { %v82_v61 = vpop.permute.xlu1 %81  ;;  %v68_v62 = vpop.permute.xlu0 %67 }
  0x9a   :  { %vm69_vm1 = vcmp.eq.s32.totalorder %v4330_v60, %v68_v62  ;;  %vm83_vm2 = vcmp.eq.s32.totalorder %v4330_v60, %v82_v61 }
  0x9b   :  { %v2452_v63 = vsel %vm69_vm1, 1.0, %v4132_v10  ;;  %v2454_v9 = vsel %vm83_vm2, 1.0, %v4132_v10 }
  0x9e   :  { %v89_v4 = vpop.permute.xlu1 %88  ;;  %v75_v5 = vpop.permute.xlu0 %74 }
  0x9f   :  { %vm76_vm3 = vcmp.eq.s32.totalorder %v4330_v60, %v75_v5  ;;  %vm90_vm4 = vcmp.eq.s32.totalorder %v4330_v60, %v89_v4 }
  0xa0   :  { %v2453_v6 = vsel %vm76_vm3, 1.0, %v4132_v10  ;;  %v2455_v19 = vsel %vm90_vm4, 1.0, %v4132_v10 }
  0xa1   :  { %v79_v8 = vadd.f32 %v2453_v6, %v2452_v63 }
  0xa3   :  { %v86_v13 = vadd.f32 %v2454_v9, %v79_v8  ;;  %v96_v14 = vpop.permute.xlu1 %95  ;;  %v103_v18 = vpop.permute.xlu0 %102 }
  0xa4   :  { %vm97_vm5 = vcmp.eq.s32.totalorder %v4330_v60, %v96_v14  ;;  %vm104_vm6 = vcmp.eq.s32.totalorder %v4330_v60, %v103_v18 }
  0xa5   :  { %v93_v23 = vadd.f32 %v2455_v19, %v86_v13  ;;  %v2456_v24 = vsel %vm97_vm5, 1.0, %v4132_v10  ;;  %v2457_v28 = vsel %vm104_vm6, 1.0, %v4132_v10 }
  0xa7   :  { %v100_v27 = vadd.f32 %v2456_v24, %v93_v23 }
  0xa8   :  { %v110_v29 = vpop.permute.xlu1 %109  ;;  %v213_v45 = vpop.permute.xlu0 %212 }
  0xa9   :  { %vm111_vm7 = vcmp.eq.s32.totalorder %v4330_v60, %v110_v29  ;;  %v107_v32 = vadd.f32 %v2457_v28, %v100_v27  ;;  %vm214_vm10 = vcmp.eq.s32.totalorder %v4330_v60, %v213_v45 }
  0xaa   :  { %v2458_v33 = vsel %vm111_vm7, 1.0, %v4132_v10  ;;  %v2461_v50 = vsel %vm214_vm10, 1.0, %v4132_v10  ;;  %vm607_vm10 = vcmask 58368  }
  0xab   :  { %v114_v36 = vadd.f32 %v2458_v33, %v107_v32 }
  0xad   :  { %v117_v34 = vpop.permute.xlu1 %116  ;;  %v352_v46 = vpop.permute.xlu0 %351 }
  0xae   :  { %vm118_vm8 = vcmp.eq.s32.totalorder %v4330_v60, %v117_v34  ;;  %vm353_vm13 = vcmp.eq.s32.totalorder %v4330_v60, %v352_v46 }
  0xaf   :  { %v2459_v37 = vsel %vm118_vm8, 1.0, %v4132_v10  ;;  %v2469_v58 = vsel %vm353_vm13, 1.0, %v4132_v10  ;;  %vm488_vm13 = vcmask 17408  }
  0xb0   :  { %v121_v38 = vadd.f32 %v2459_v37, %v114_v36 }
  0xb2   :  { %v122_v39 = vmul.f32 0.125, %v121_v38  ;;  %v220_v41 = vpop.permute.xlu1 %219  ;;  %v366_v51 = vpop.permute.xlu0 %365 }
  0xb3   :  { %vm221_vm9 = vcmp.eq.s32.totalorder %v4330_v60, %v220_v41  ;;  %vm367_vm1 = vcmp.eq.s32.totalorder %v4330_v60, %v366_v51 }
  0xb4   :  { %2859 = vmatmul.mubr.f32.vlgmr.msra.gmra.mrb[0].mxu0 %v122_v39  ;;  %v2462_v49 = vsel %vm221_vm9, 1.0, %v4132_v10  ;;  %v2471_v4 = vsel %vm367_vm1, 1.0, %v4132_v10 }
  0xb5   :  { %3522 = vmatpush3.bf16.msra.mxu0 %v4235_v7  ;;  %2928 = vmatprep.mubr.msk.f32.mxu0 %vm4143_vm0, %v4132_v10  ;;  %v224_v53 = vadd.f32 %v2462_v49, %v2461_v50 }
  0xb6   :  { %3523 = vmatprep.subr.bf16.mxu0 %v4131_v3 }
  0xb7   :  { %v227_v42 = vpop.permute.xlu1 %226  ;;  %v248_v55 = vpop.permute.xlu0 %247 }
  0xb8   :  { %vm228_vm11 = vcmp.eq.s32.totalorder %v4330_v60, %v227_v42  ;;  %vm249_vm2 = vcmp.eq.s32.totalorder %v4330_v60, %v248_v55  ;;  %v4162_v55 = vmov 27  }
  0xb9   :  { %3525 = vmatpush3.bf16.msra.mxu0 %v4245_v12  ;;  %v2463_v52 = vsel %vm228_vm11, 1.0, %v4132_v10  ;;  %v2466_v8 = vsel %vm249_vm2, 1.0, %v4132_v10 }
  0xba   :  { %3526 = vmatprep.subr.bf16.mxu0 %v4131_v3  ;;  %v231_v57 = vadd.f32 %v2463_v52, %v224_v53 }
  0xbc   :  { %v359_v43 = vpop.permute.xlu1 %358  ;;  %v387_v13 = vpop.permute.xlu0 %386 }
  0xbd   :  { %3528 = vmatpush3.bf16.msra.mxu0 %v4253_v15  ;;  %vm360_vm14 = vcmp.eq.s32.totalorder %v4330_v60, %v359_v43  ;;  %vm388_vm6 = vcmp.eq.s32.totalorder %v4330_v60, %v387_v13 }
  0xbe   :  { %3529 = vmatprep.subr.bf16.mxu0 %v4131_v3  ;;  %v2470_v59 = vsel %vm360_vm14, 1.0, %v4132_v10  ;;  %v2474_v34 = vsel %vm388_vm6, 1.0, %v4132_v10  ;;  %vm508_vm14 = vcmask 261120  }
  0xbf   :  { %v363_v63 = vadd.f32 %v2470_v59, %v2469_v58  ;;  %v493_v58 = vld [vmem:[#allocation3 + $0x120] sm:$0xff]  ;;  %v494_v59 = vld [vmem:[#allocation3 + $0x128] sm:$0xff] }
  0xc1   :  { %v234_v44 = vpop.permute.xlu1 %233  ;;  %3531 = vmatpush3.bf16.msra.mxu0 %v4265_v20  ;;  %v370_v14 = vadd.f32 %v2471_v4, %v363_v63  ;;  %v401_v29 = vpop.permute.xlu0 %400  ;;  %v496_v63 = vld [vmem:[#allocation3 + $0x138] sm:$0xff] }
  0xc2   :  { %3532 = vmatprep.subr.bf16.mxu0 %v4131_v3  ;;  %vm235_vm12 = vcmp.eq.s32.totalorder %v4330_v60, %v234_v44  ;;  %vm402_vm8 = vcmp.eq.s32.totalorder %v4330_v60, %v401_v29 }
  0xc3   :  { %v2464_v54 = vsel %vm235_vm12, 1.0, %v4132_v10  ;;  %v2476_v42 = vsel %vm402_vm8, 1.0, %v4132_v10 }
  0xc4   :  { %v238_v62 = vadd.f32 %v2464_v54, %v231_v57  ;;  %v4161_v54 = vmov 26   ;;  %v4164_v57 = vmov 30  }
  0xc5   :  { %3534 = vmatpush3.bf16.msra.mxu0 %v4275_v25 }
  0xc6   :  { %v241_v47 = vpop.permute.xlu1 %240  ;;  %3535 = vmatprep.subr.bf16.mxu0 %v4131_v3  ;;  %v54_v50 = vpop.permute.xlu0 %53 }
  0xc7   :  { %vm242_vm15 = vcmp.eq.s32.totalorder %v4330_v60, %v241_v47  ;;  %vm55_vm12 = vcmp.lt.s32.totalorder %v4330_v60, %v54_v50 }
  0xc8   :  { %v2465_v61 = vsel %vm242_vm15, 1.0, %v4132_v10  ;;  %v2451_v51 = vsel %vm55_vm12, 1.0, %v4132_v10  ;;  %vm871_vm12 = vcmask 64512  }
  0xc9   :  { %3537 = vmatpush3.bf16.msra.mxu0 %v4284_v30  ;;  %v245_v5 = vadd.f32 %v2465_v61, %v238_v62  ;;  %v3545_v61 = vpack.c.bf16 %v494_v59, %v493_v58  ;;  %v495_v62 = vld [vmem:[#allocation3 + $0x130] sm:$0xff] }
  0xca   :  { %3538 = vmatprep.subr.bf16.mxu0 %v4131_v3  ;;  %v3548_v4 = vpack.c.bf16 %v496_v63, %v495_v62 }
  0xcb   :  { %v373_v48 = vpop.permute.xlu1 %372  ;;  %v252_v19 = vadd.f32 %v2466_v8, %v245_v5 }
  0xcc   :  { %vm374_vm3 = vcmp.eq.s32.totalorder %v4330_v60, %v373_v48 }
  0xcd   :  { %3540 = vmatpush3.bf16.msra.mxu0 %v4293_v35  ;;  %v2472_v9 = vsel %vm374_vm3, 1.0, %v4132_v10 }
  0xce   :  { %3541 = vmatprep.subr.bf16.mxu0 %v4131_v3  ;;  %v377_v24 = vadd.f32 %v2472_v9, %v370_v14  ;;  %v4165_v14 = vmov 37  }
  0xd0   :  { %v380_v56 = vpop.permute.xlu1 %379 }
  0xd1   :  { %3543 = vmatpush3.bf16.msra.mxu0 %v4302_v40  ;;  %vm381_vm4 = vcmp.eq.s32.totalorder %v4330_v60, %v380_v56  ;;  %v4163_v56 = vmov 29  }
  0xd2   :  { %2989 = vmatprep.subr.mxu0 %v4132_v10  ;;  %v2473_v23 = vsel %vm381_vm4, 1.0, %v4132_v10 }
  0xd3   :  { %v384_v32 = vadd.f32 %v2473_v23, %v377_v24 }
  0xd5   :  { %v255_v6 = vpop.permute.xlu1 %254  ;;  %v391_v39 = vadd.f32 %v2474_v34, %v384_v32 }
  0xd6   :  { %vm256_vm5 = vcmp.eq.s32.totalorder %v4330_v60, %v255_v6 }
  0xd7   :  { %v2467_v18 = vsel %vm256_vm5, 1.0, %v4132_v10 }
  0xd8   :  { %v259_v28 = vadd.f32 %v2467_v18, %v252_v19  ;;  %v4166_v18 = vmov 31  }
  0xda   :  { %v262_v27 = vpop.permute.xlu1 %261 }
  0xdb   :  { %vm263_vm7 = vcmp.eq.s32.totalorder %v4330_v60, %v262_v27 }
  0xdc   :  { %v2468_v33 = vsel %vm263_vm7, 1.0, %v4132_v10 }
  0xdd   :  { %v266_v36 = vadd.f32 %v2468_v33, %v259_v28 }
  0xdf   :  { %v267_v37 = vmul.f32 0.125, %v266_v36  ;;  %v394_v38 = vpop.permute.xlu1 %393 }
  0xe0   :  { %vm395_vm9 = vcmp.eq.s32.totalorder %v4330_v60, %v394_v38 }
  0xe1   :  { %v2475_v41 = vsel %vm395_vm9, 1.0, %v4132_v10  ;;  %2894 = vmatmul.mubr.f32.vlgmr.msra.gmra.mrb[0].mxu1 %v267_v37  ;;  %vm790_vm9 = vcmask 130048  }
  0xe2   :  { %v398_v43 = vadd.f32 %v2475_v41, %v391_v39  ;;  %2939 = vmatprep.mubr.msk.f32.mxu1 %vm4143_vm0, %v4132_v10  ;;  %3546 = vmatpush3.bf16.msra.mxu1 %v3545_v61 }
  0xe3   :  { %3547 = vmatprep.subr.bf16.mxu1 %v4131_v3 }
  0xe4   :  { %v405_v44 = vadd.f32 %v2476_v42, %v398_v43  ;;  %v603_v45 = vpop.permute.xlu1 %602 }
  0xe5   :  { %vm604_vm11 = vcmp.lt.s32.totalorder %v4330_v60, %v603_v45 }
  0xe6   :  { %v406_v46 = vmul.f32 0.125, %v405_v44  ;;  %v2481_v47 = vsel %vm604_vm11, 1.0, %v4132_v10  ;;  %3549 = vmatpush3.bf16.msra.mxu1 %v3548_v4 }
  0xe7   :  { %v608_v48 = vsel %vm607_vm10, %v2481_v47, 0.0  ;;  %3550 = vmatprep.subr.bf16.mxu1 %v4131_v3 }
  0xe8   :  { %609 = vadd.xlane.f32.xlu1 %v608_v48  ;;  %2929 = vmatmul.mubr.f32.vlgmr.msra.gmra.mrb[2].mxu0 %v406_v46 }
  0xe9   :  { %v62_v49 = vpop.permute.xlu1 %61  ;;  %2991 = vmatprep.mubr.msk.f32.mxu0 %vm4143_vm0, %v4132_v10 }
  0xea   :  { %4010 = vrcp.f32 %v62_v49 }
  0xf4   :  { %v4011_v52 = vpop.eup %4010 }
  0xf5   :  { %v4407_v53 = vmul.f32 %v4011_v52, %v2451_v51 }
  0xf7   :  { %200 = vperm.xlu0 %3994, %v4407_v53   ;;  %v489_v32 = vsel %vm488_vm13, %v4407_v53, 0.0  ;;  %vm1030_vm13 = vcmask 91200  }
  0xf9   :  { %628 = vperm.xlu1 %3988, %v4242_v11  }
  0xfb   :  { %3995 = vset.pattern.permute.xlu0 %v4134_v17 }
  0xfc   :  { %340 = vperm.xlu0 %3995, %v4407_v53  }
  0xfd   :  { %3989 = vset.pattern.permute.xlu1 %v4161_v54 }
  0xfe   :  { %640 = vperm.xlu1 %3989, %v4242_v11  }
 0x100   :  { %3996 = vset.pattern.permute.xlu0 %v4129_v0 }
 0x101   :  { %479 = vperm.xlu0 %3996, %v4407_v53  }
 0x102   :  { %3990 = vset.pattern.permute.xlu1 %v4162_v55 }
 0x103   :  { %652 = vperm.xlu1 %3990, %v4242_v11  }
 0x105   :  { %3997 = vset.pattern.permute.xlu0 %v4130_v1 }
 0x107   :  { %3992 = vset.pattern.permute.xlu1 %v4163_v56 }
 0x108   :  { %676 = vperm.xlu1 %3992, %v4242_v11  }
 0x10c   :  { %3993 = vset.pattern.permute.xlu1 %v4164_v57 }
 0x10d   :  { %688 = vperm.xlu1 %3993, %v4242_v11  }
 0x111   :  { %4000 = vset.pattern.permute.xlu1 %v4133_v16 }
 0x175   :  { %v610_v5 = vpop.xlane.xlu1 %609 }
 0x176   :  { %v611_v6 = vmax.f32 %v610_v5, 1.0 }
 0x178   :  { %4012 = vrcp.f32 %v611_v6 }
 0x182   :  { %v4013_v8 = vpop.eup %4012 }
 0x183   :  { %v613_v9 = vmul.f32 %v4013_v8, %v2481_v47 }
 0x185   :  { %658 = vperm.xlu1 %4000, %v613_v9   ;;  %622 = vperm.xlu0 %3997, %v613_v9  }
 0x187   :  { %v193_v16 = vpop.f32.mrb[0].mxu0 }
 0x188   :  { %v2860_v13 = vpop.f32.mrb[1].mxu0 }
 0x189   :  { %4001 = vset.pattern.permute.xlu1 %v4135_v21  ;;  %3998 = vset.pattern.permute.xlu0 %v4134_v17  ;;  %v4435_v17 = vld [vmem:[#allocation3 + $0x498] ss:$0 sm:$0xff]  ;;  %v4437_v21 = vpop.permute.xlu0 %615 }
 0x18a   :  { %670 = vperm.xlu1 %4001, %v613_v9   ;;  %634 = vperm.xlu0 %3998, %v613_v9   ;;  %vm617_vm1 = vcmp.eq.s32.totalorder %v4330_v60, %v4437_v21  ;;  %v1446_v21 = vld [vmem:[#allocation3 + $0x360] sm:$0xff] }
 0x18b   :  { %v2482_v46 = vsel %vm617_vm1, 1.0, %v4132_v10 }
 0x18e   :  { %4004 = vset.pattern.permute.xlu1 %v4137_v26  ;;  %3999 = vset.pattern.permute.xlu0 %v4129_v0  ;;  %v4168_v0 = vmov 38  }
 0x18f   :  { %694 = vperm.xlu1 %4004, %v613_v9   ;;  %646 = vperm.xlu0 %3999, %v613_v9  }
 0x193   :  { %4005 = vset.pattern.permute.xlu1 %v4139_v31  ;;  %4002 = vset.pattern.permute.xlu0 %v4136_v22  ;;  %v194_v22 = vadd.f32 %v4435_v17, %v193_v16  ;;  %v4440_v31 = vpop.permute.xlu0 %664 }
 0x194   :  { %706 = vperm.xlu1 %4005, %v613_v9   ;;  %682 = vperm.xlu0 %4002, %v613_v9   ;;  %vm666_vm4 = vcmp.eq.s32.totalorder %v4330_v60, %v4440_v31  ;;  %v2501_v31 = vld [vmem:[#allocation3 + $0x49e] ss:$0 sm:$0xff] }
 0x195   :  { %4014 = vtanh.f32 %v194_v22  ;;  %v2486_v57 = vsel %vm666_vm4, 1.0, %v4132_v10 }
 0x197   :  { %v201_v24 = vpop.permute.xlu0 %200 }
 0x198   :  { %4006 = vset.pattern.permute.xlu1 %v4165_v14  ;;  %4003 = vset.pattern.permute.xlu0 %v4166_v18  ;;  %v788_v14 = vld [vmem:[#allocation3 + $0x100] sm:$0xff]  ;;  %v789_v18 = vld [vmem:[#allocation3 + $0x108] sm:$0xff] }
 0x199   :  { %783 = vperm.xlu1 %4006, %v4242_v11   ;;  %700 = vperm.xlu0 %4003, %v4242_v11  }
 0x19b   :  { %v341_v29 = vpop.permute.xlu0 %340 }
 0x19d   :  { %206 = vrot.lane.b32.xlu1 %v4230_v2, %s4167_s9  ;;  %4007 = vset.pattern.permute.xlu0 %v4168_v0 }
 0x19e   :  { %865 = vperm.xlu0 %4007, %v4242_v11  }
 0x19f   :  { %v480_v38 = vpop.permute.xlu0 %479 }
 0x1a2   :  { %4008 = vset.pattern.permute.xlu0 %v4130_v1  ;;  %v4015_v1 = vpop.eup %4014 }
 0x1a3   :  { %v203_v34 = vmul.f32 %v4015_v1, %v201_v24  ;;  %v3575_v24 = vpack.c.bf16 %v789_v18, %v788_v14  ;;  %v1057_v14 = vld [vmem:[#allocation3 + $0x168] sm:$0xff]  ;;  %v1058_v18 = vld [vmem:[#allocation3 + $0x170] sm:$0xff] }
 0x1b4   :  { %v334_v26 = vpop.f32.mrb[0].mxu1 }
 0x1b5   :  { %v335_v19 = vadd.f32 %v4435_v17, %v334_v26  ;;  %v2895_v23 = vpop.f32.mrb[1].mxu1 }
 0x1b7   :  { %4016 = vtanh.f32 %v335_v19 }
 0x1bb   :  { %v473_v27 = vpop.f32.mrb[2].mxu0 }
 0x1bc   :  { %v474_v11 = vadd.f32 %v4435_v17, %v473_v27  ;;  %v2930_v28 = vpop.f32.mrb[3].mxu0 }
 0x1be   :  { %4018 = vtanh.f32 %v474_v11 }
 0x1c1   :  { %v4017_v33 = vpop.eup %4016  ;;  %490 = vadd.xlane.f32.xlu1 %v489_v32  ;;  %v945_v32 = vld [vmem:[#allocation3 + $0x118] sm:$0xff] }
 0x1c2   :  { %v343_v36 = vmul.f32 %v4017_v33, %v341_v29  ;;  %v870_v29 = vld [vmem:[#allocation3 + $0x110] sm:$0xff]  ;;  %2990 = vmatpush3.msra.mxu0 %v945_v32 }
 0x1c3   :  { %3601 = vmatprep.subr.bf16.mxu0 %v4131_v3  ;;  %v1062_v32 = vld [vmem:[#allocation3 + $0x190] sm:$0xff] }
 0x1c4   :  { %v344_v37 = vadd.f32 %v343_v36, %v203_v34 }
 0x1c8   :  { %v4019_v39 = vpop.eup %4018 }
 0x1c9   :  { %v482_v41 = vmul.f32 %v4019_v39, %v480_v38 }
 0x1cb   :  { %v483_v42 = vadd.f32 %v482_v41, %v344_v37 }
 0x1cd   :  { %2940 = vmatmul.mubr.msk.f32.vlgmr.msra.gmra.mrb[2].mxu1 %vm508_vm14, %v483_v42  ;;  %vm1038_vm14 = vcmask 386176  }
 0x1ce   :  { %3552 = vmatpush3.bf16.msra.mxu1 %v4235_v7  ;;  %2974 = vmatprep.mubr.msk.f32.mxu1 %vm4143_vm0, %v4132_v10  ;;  %v4459_v7 = vpop.permute.xlu1 %628 }
 0x1cf   :  { %3553 = vmatprep.subr.bf16.mxu1 %v4131_v3  ;;  %vm630_vm15 = vcmp.eq.s32.totalorder %v4330_v60, %v4459_v7 }
 0x1d0   :  { %v2483_v44 = vsel %vm630_vm15, 1.0, %v4132_v10 }
 0x1d2   :  { %3555 = vmatpush3.bf16.msra.mxu1 %v4245_v12  ;;  %v4465_v12 = vpop.permute.xlu1 %640 }
 0x1d3   :  { %3556 = vmatprep.subr.bf16.mxu1 %v4131_v3  ;;  %vm642_vm2 = vcmp.eq.s32.totalorder %v4330_v60, %v4465_v12 }
 0x1d4   :  { %v2484_v49 = vsel %vm642_vm2, 1.0, %v4132_v10 }
 0x1d6   :  { %3558 = vmatpush3.bf16.msra.mxu1 %v4253_v15  ;;  %v4467_v15 = vpop.permute.xlu1 %652 }
 0x1d7   :  { %3559 = vmatprep.subr.bf16.mxu1 %v4131_v3  ;;  %vm654_vm3 = vcmp.eq.s32.totalorder %v4330_v60, %v4467_v15 }
 0x1d8   :  { %v2485_v54 = vsel %vm654_vm3, 1.0, %v4132_v10 }
 0x1da   :  { %3561 = vmatpush3.bf16.msra.mxu1 %v4265_v20  ;;  %v4469_v20 = vpop.permute.xlu1 %676 }
 0x1db   :  { %3562 = vmatprep.subr.bf16.mxu1 %v4131_v3  ;;  %vm678_vm5 = vcmp.eq.s32.totalorder %v4330_v60, %v4469_v20 }
 0x1dc   :  { %v2487_v62 = vsel %vm678_vm5, 1.0, %v4132_v10 }
 0x1de   :  { %3564 = vmatpush3.bf16.msra.mxu1 %v4275_v25  ;;  %v4471_v25 = vpop.permute.xlu1 %688 }
 0x1df   :  { %3565 = vmatprep.subr.bf16.mxu1 %v4131_v3  ;;  %vm690_vm6 = vcmp.eq.s32.totalorder %v4330_v60, %v4471_v25  ;;  %v1636_v25 = vld [vmem:[#allocation3 + $0x438] sm:$0xff] }
 0x1e0   :  { %v2488_v8 = vsel %vm690_vm6, 1.0, %v4132_v10 }
 0x1e2   :  { %3567 = vmatpush3.bf16.msra.mxu1 %v4284_v30 }
 0x1e3   :  { %3568 = vmatprep.subr.bf16.mxu1 %v4131_v3 }
 0x1e6   :  { %3570 = vmatpush3.bf16.msra.mxu1 %v4293_v35 }
 0x1e7   :  { %3571 = vmatprep.subr.bf16.mxu1 %v4131_v3 }
 0x1ea   :  { %3573 = vmatpush3.bf16.msra.mxu1 %v4302_v40 }
 0x1eb   :  { %3574 = vmatprep.subr.bf16.mxu1 %v4131_v3 }
 0x204   :  { %v659_v30 = vpop.permute.xlu1 %658  ;;  %v623_v43 = vpop.permute.xlu0 %622 }
 0x205   :  { %v625_v47 = vmul.f32 %v2482_v46, %v623_v43  ;;  %v661_v55 = vmul.f32 %v2485_v54, %v659_v30  ;;  %v2477_v46 = vld [vmem:[#allocation3 + $0x140] ss:$0 sm:$0xff] }
 0x209   :  { %v671_v35 = vpop.permute.xlu1 %670  ;;  %v635_v40 = vpop.permute.xlu0 %634 }
 0x20a   :  { %v637_v45 = vmul.f32 %v2483_v44, %v635_v40  ;;  %v673_v58 = vmul.f32 %v2486_v57, %v671_v35 }
 0x20c   :  { %v638_v51 = vadd.f32 %v637_v45, %v625_v47 }
 0x20e   :  { %v695_v48 = vpop.permute.xlu1 %694  ;;  %v647_v50 = vpop.permute.xlu0 %646 }
 0x20f   :  { %v649_v52 = vmul.f32 %v2484_v49, %v647_v50  ;;  %v697_v13 = vmul.f32 %v2488_v8, %v695_v48  ;;  %v2479_v48 = vld [vmem:[#allocation3 + $0x141] ss:$0 sm:$0xff] }
 0x211   :  { %v650_v56 = vadd.f32 %v649_v52, %v638_v51  ;;  %v2480_v51 = vld [vmem:[#allocation3 + $0x499] ss:$0 sm:$0xff] }
 0x213   :  { %v662_v59 = vadd.f32 %v661_v55, %v650_v56  ;;  %v707_v61 = vpop.permute.xlu1 %706  ;;  %v683_v63 = vpop.permute.xlu0 %682 }
 0x214   :  { %v685_v4 = vmul.f32 %v2487_v62, %v683_v63  ;;  %v1144_v62 = vld [vmem:[#allocation3 + $0x1c8] sm:$0xff] }
 0x215   :  { %v674_v5 = vadd.f32 %v673_v58, %v662_v59  ;;  %v1053_v59 = vld [vmem:[#allocation3 + $0x148] sm:$0xff] }
 0x217   :  { %v686_v6 = vadd.f32 %v685_v4, %v674_v5  ;;  %v1145_v4 = vld [vmem:[#allocation3 + $0x1d0] sm:$0xff]  ;;  %v1055_v5 = vld [vmem:[#allocation3 + $0x158] sm:$0xff] }
 0x218   :  { %v784_v9 = vpop.permute.xlu1 %783  ;;  %v701_v16 = vpop.permute.xlu0 %700  ;;  %v3602_v8 = vpack.c.bf16 %v1145_v4, %v1144_v62  ;;  %v1236_v4 = vld [vmem:[#allocation3 + $0x248] sm:$0xff] }
 0x219   :  { %vm702_vm7 = vcmp.eq.s32.totalorder %v4330_v60, %v701_v16  ;;  %v698_v26 = vadd.f32 %v697_v13, %v686_v6  ;;  %vm785_vm8 = vcmp.eq.s32.totalorder %v4330_v60, %v784_v9  ;;  %v1056_v6 = vld [vmem:[#allocation3 + $0x160] sm:$0xff]  ;;  %v1146_v9 = vld [vmem:[#allocation3 + $0x1d8] sm:$0xff] }
 0x21a   :  { %v2489_v22 = vsel %vm702_vm7, 1.0, %v4132_v10  ;;  %v2490_v1 = vsel %vm785_vm8, 1.0, %v4132_v10  ;;  %v1147_v16 = vld [vmem:[#allocation3 + $0x1e0] sm:$0xff]  ;;  %vm1044_vm7 = vcmask 845376   ;;  %vm1050_vm8 = vcmask 911168  }
 0x21b   :  { %v709_v19 = vmul.f32 %v2489_v22, %v707_v61  ;;  %v1054_v61 = vld [vmem:[#allocation3 + $0x150] sm:$0xff]  ;;  %v3605_v13 = vpack.c.bf16 %v1147_v16, %v1146_v9  ;;  %v1148_v22 = vld [vmem:[#allocation3 + $0x1e8] sm:$0xff]  ;;  %v1239_v9 = vld [vmem:[#allocation3 + $0x260] sm:$0xff] }
 0x21c   :  { %v207_v23 = vpop.permute.xlu1 %206  ;;  %v3578_v63 = vpack.c.bf16 %v1054_v61, %v1053_v59  ;;  %v1159_v59 = vld [vmem:[#allocation3 + $0x240] sm:$0xff] }
 0x21d   :  { %v710_v27 = vadd.f32 %v709_v19, %v698_v26  ;;  %v209_v11 = vmul.f32 %v207_v23, %v4407_v53  ;;  %v866_v28 = vpop.permute.xlu0 %865  ;;  %v1149_v26 = vld [vmem:[#allocation3 + $0x1f0] sm:$0xff]  ;;  %v3584_v19 = vpack.c.bf16 %v1058_v18, %v1057_v14 }
 0x21e   :  { %vm867_vm11 = vcmp.eq.s32.totalorder %v4330_v60, %v866_v28  ;;  %v3608_v23 = vpack.c.bf16 %v1149_v26, %v1148_v22  ;;  %v1151_v28 = vld [vmem:[#allocation3 + $0x200] sm:$0xff]  ;;  %v1241_v14 = vld [vmem:[#allocation3 + $0x270] sm:$0xff]  ;;  %v1242_v22 = vld [vmem:[#allocation3 + $0x278] sm:$0xff] }
 0x21f   :  { %346 = vrot.lane.b32.xlu0 %v209_v11, %s4169_s10  ;;  %2975 = vmatmul.mubr.f32.vlgmr.msra.gmra.mrb[4].mxu1 %v710_v27  ;;  %v2492_v53 = vsel %vm867_vm11, 1.0, %v4132_v10  ;;  %v1060_v27 = vld [vmem:[#allocation3 + $0x180] sm:$0xff]  ;;  %vm2392_vm11 = vcmask 254976  }
 0x220   :  { %3576 = vmatpush3.bf16.msra.mxu1 %v3575_v24  ;;  %2981 = vmatprep.mubr.msk.f32.mxu1 %vm4143_vm0, %v4132_v10  ;;  %v1059_v24 = vld [vmem:[#allocation3 + $0x178] sm:$0xff]  ;;  %v1243_v26 = vld [vmem:[#allocation3 + $0x280] sm:$0xff] }
 0x221   :  { %2984 = vmatprep.subr.mxu1 %v4132_v10 }
 0x223   :  { %484 = vrot.lane.b32.xlu0 %v209_v11, %s4170_s11  ;;  %2982 = vmatmul.mubr.msk.f32.vlgmr.msra.gmra.mrb[6].mxu1 %vm790_vm9, %v2490_v1  ;;  %v3587_v1 = vpack.c.bf16 %v1060_v27, %v1059_v24  ;;  %v1245_v24 = vld [vmem:[#allocation3 + $0x290] sm:$0xff]  ;;  %vm1258_vm9 = vcmask 1043456  }
 0x224   :  { %2985 = vmatpush3.msra.mxu1 %v870_v29  ;;  %2986 = vmatprep.mubr.msk.f32.mxu1 %vm4143_vm0, %v4132_v10 }
 0x225   :  { %3577 = vmatprep.subr.bf16.mxu1 %v4131_v3 }
 0x227   :  { %2987 = vmatmul.mubr.msk.f32.vlgmr.msra.gmra.mrb[8].mxu1 %vm871_vm12, %v2492_v53  ;;  %v1061_v53 = vld [vmem:[#allocation3 + $0x188] sm:$0xff] }
 0x228   :  { %3026 = vmatprep.mubr.msk.f32.mxu1 %vm4143_vm0, %v4132_v10  ;;  %3579 = vmatpush3.bf16.msra.mxu1 %v3578_v63 }
 0x229   :  { %3580 = vmatprep.subr.bf16.mxu1 %v4131_v3 }
 0x24e   :  { %v491_v38 = vpop.xlane.xlu1 %490 }
 0x291   :  { %v347_v33 = vpop.permute.xlu0 %346 }
 0x292   :  { %v349_v34 = vadd.f32 %v347_v33, %v209_v11  ;;  %v1150_v11 = vld [vmem:[#allocation3 + $0x1f8] sm:$0xff]  ;;  %v1152_v33 = vld [vmem:[#allocation3 + $0x208] sm:$0xff] }
 0x293   :  { %v3611_v29 = vpack.c.bf16 %v1151_v28, %v1150_v11  ;;  %v1246_v11 = vld [vmem:[#allocation3 + $0x298] sm:$0xff]  ;;  %v1247_v28 = vld [vmem:[#allocation3 + $0x2a0] sm:$0xff] }
 0x295   :  { %v485_v36 = vpop.permute.xlu0 %484 }
 0x296   :  { %v487_v37 = vadd.f32 %v485_v36, %v349_v34  ;;  %v1153_v34 = vld [vmem:[#allocation3 + $0x210] sm:$0xff]  ;;  %v3590_v36 = vpack.c.bf16 %v1062_v32, %v1061_v53  ;;  %v2496_v53 = vld [vmem:[#allocation3 + $0x49b] ss:$0 sm:$0xff]  ;;  %v2497_v32 = vld [vmem:[#allocation3 + $0x49c] ss:$0 sm:$0xff] }
 0x298   :  { %v492_v39 = vsub.f32 %v491_v38, %v487_v37  ;;  %v1063_v38 = vld [vmem:[#allocation3 + $0x198] sm:$0xff] }
 0x29a   :  { %500 = vperm.xlu0 %4008, %v492_v39   ;;  %v1064_v39 = vld [vmem:[#allocation3 + $0x1a0] sm:$0xff] }
 0x29e   :  { %585 = vperm.xlu0 %4008, %v487_v37   ;;  %v3614_v37 = vpack.c.bf16 %v1153_v34, %v1152_v33 }
 0x2a0   :  { %v578_v41 = vpop.f32.mrb[2].mxu1 }
 0x2a1   :  { %v2941_v42 = vpop.f32.mrb[3].mxu1 }
 0x2a2   :  { %4009 = vset.pattern.permute.xlu0 %v4168_v0  ;;  %v1155_v42 = vld [vmem:[#allocation3 + $0x220] sm:$0xff] }
 0x2a3   :  { %1027 = vrot.lane.b32.xlu0 %v4230_v2, %s4171_s12 }
 0x2f2   :  { %v777_v30 = vpop.f32.mrb[4].mxu1 }
 0x2f3   :  { %v2976_v43 = vpop.f32.mrb[5].mxu1  ;;  %v778_v56 = vadd.f32 %v4435_v17, %v777_v30  ;;  %v3581_v17 = vpack.c.bf16 %v1056_v6, %v1055_v5  ;;  %v3593_v30 = vpack.c.bf16 %v1064_v39, %v1063_v38  ;;  %v1237_v5 = vld [vmem:[#allocation3 + $0x250] sm:$0xff] }
 0x2f4   :  { %v3626_v6 = vpack.c.bf16 %v1237_v5, %v1236_v4  ;;  %v1362_v5 = vld [vmem:[#allocation3 + $0x320] sm:$0xff] }
 0x2f5   :  { %3582 = vmatpush3.bf16.msra.mxu1 %v3581_v17 }
 0x2f6   :  { %v860_v35 = vpop.f32.mrb[6].mxu1  ;;  %3583 = vmatprep.subr.bf16.mxu1 %v4131_v3 }
 0x2f7   :  { %1026 = vst.msk [vmem:[#allocation2] sm:$0x3] %vm607_vm10, %v860_v35  ;;  %v2983_v40 = vpop.f32.mrb[7].mxu1  ;;  %vm1032_vm10 = vcmask 124000  }
 0x2f9   :  { %3585 = vmatpush3.bf16.msra.mxu1 %v3584_v19  ;;  %v3635_v19 = vpack.c.bf16 %v1243_v26, %v1242_v22  ;;  %v1536_v22 = vld [vmem:[#allocation3 + $0x3a0] sm:$0xff] }
 0x2fa   :  { %v4535_v44 = vpop.f32.mrb[8].mxu1  ;;  %3586 = vmatprep.subr.bf16.mxu1 %v4131_v3 }
 0x2fb   :  { %v2988_v45 = vpop.f32.mrb[9].mxu1  ;;  %2992 = vmatmul.mubr.msk.f32.vlgmr.msra.gmra.mrb[4].mxu0 %vm871_vm12, %v4535_v44  ;;  %vm1254_vm12 = vcmask 818176  }
 0x2fc   :  { %3061 = vmatprep.mubr.msk.f32.mxu0 %vm4143_vm0, %v4132_v10  ;;  %3603 = vmatpush3.bf16.msra.mxu0 %v3602_v8  ;;  %v2494_v45 = vld [vmem:[#allocation3 + $0x49a] ss:$0 sm:$0xff] }
 0x2fd   :  { %3604 = vmatprep.subr.bf16.mxu0 %v4131_v3  ;;  %3588 = vmatpush3.bf16.msra.mxu1 %v3587_v1  ;;  %v1238_v8 = vld [vmem:[#allocation3 + $0x258] sm:$0xff]  ;;  %v3641_v1 = vpack.c.bf16 %v1247_v28, %v1246_v11  ;;  %v1540_v28 = vld [vmem:[#allocation3 + $0x3c0] sm:$0xff] }
 0x2fe   :  { %3589 = vmatprep.subr.bf16.mxu1 %v4131_v3  ;;  %v3629_v17 = vpack.c.bf16 %v1239_v9, %v1238_v8 }
 0x300   :  { %3606 = vmatpush3.bf16.msra.mxu0 %v3605_v13  ;;  %v1240_v13 = vld [vmem:[#allocation3 + $0x268] sm:$0xff] }
 0x301   :  { %3607 = vmatprep.subr.bf16.mxu0 %v4131_v3  ;;  %3591 = vmatpush3.bf16.msra.mxu1 %v3590_v36  ;;  %v3632_v18 = vpack.c.bf16 %v1241_v14, %v1240_v13 }
 0x302   :  { %3592 = vmatprep.subr.bf16.mxu1 %v4131_v3 }
 0x304   :  { %3609 = vmatpush3.bf16.msra.mxu0 %v3608_v23  ;;  %v1244_v23 = vld [vmem:[#allocation3 + $0x288] sm:$0xff] }
 0x305   :  { %3610 = vmatprep.subr.bf16.mxu0 %v4131_v3  ;;  %3594 = vmatpush3.bf16.msra.mxu1 %v3593_v30  ;;  %v3638_v27 = vpack.c.bf16 %v1245_v24, %v1244_v23  ;;  %v1538_v23 = vld [vmem:[#allocation3 + $0x3b0] sm:$0xff] }
 0x306   :  { %3595 = vmatprep.subr.bf16.mxu1 %v4131_v3 }
 0x308   :  { %3612 = vmatpush3.bf16.msra.mxu0 %v3611_v29  ;;  %v1248_v29 = vld [vmem:[#allocation3 + $0x2a8] sm:$0xf] }
 0x309   :  { %3613 = vmatprep.subr.bf16.mxu0 %v4131_v3 }
 0x30c   :  { %3615 = vmatpush3.bf16.msra.mxu0 %v3614_v37 }
 0x30d   :  { %3616 = vmatprep.subr.bf16.mxu0 %v4131_v3 }
 0x319   :  { %v501_v0 = vpop.permute.xlu0 %500 }
 0x31a   :  { %v507_v47 = vmul.f32 %v2477_v46, %v501_v0  ;;  %v1065_v46 = vld [vmem:[#allocation3 + $0x1a8] sm:$0xff]  ;;  %v1066_v0 = vld [vmem:[#allocation3 + $0x1b0] sm:$0xff] }
 0x31c   :  { %v579_v49 = vadd.f32 %v578_v41, %v507_v47  ;;  %v1154_v41 = vld [vmem:[#allocation3 + $0x218] sm:$0xff]  ;;  %v1156_v47 = vld [vmem:[#allocation3 + $0x228] sm:$0xff] }
 0x31d   :  { %v586_v2 = vpop.permute.xlu0 %585  ;;  %v3617_v43 = vpack.c.bf16 %v1155_v42, %v1154_v41 }
 0x31e   :  { %v592_v50 = vmul.f32 %v2479_v48, %v586_v2  ;;  %v3596_v2 = vpack.c.bf16 %v1066_v0, %v1065_v46  ;;  %v1350_v0 = vld [vmem:[#allocation3 + $0x2c0] sm:$0xff] }
 0x31f   :  { %3618 = vmatpush3.bf16.msra.mxu0 %v3617_v43 }
 0x320   :  { %v593_v52 = vadd.f32 %v592_v50, %v579_v49  ;;  %3619 = vmatprep.subr.bf16.mxu0 %v4131_v3  ;;  %v1157_v49 = vld [vmem:[#allocation3 + $0x230] sm:$0xff]  ;;  %3597 = vmatpush3.bf16.msra.mxu1 %v3596_v2 }
 0x321   :  { %v4541_v54 = vpop.permute.xlu0 %1027  ;;  %3598 = vmatprep.subr.bf16.mxu1 %v4131_v3  ;;  %v1352_v2 = vld [vmem:[#allocation3 + $0x2d0] sm:$0xff] }
 0x322   :  { %v599_v55 = vadd.f32 %v2480_v51, %v593_v52  ;;  %1031 = vst.msk [vmem:[#allocation2] sm:$0x3] %vm1030_vm13, %v4541_v54  ;;  %v3620_v52 = vpack.c.bf16 %v1157_v49, %v1156_v47  ;;  %v1351_v47 = vld [vmem:[#allocation3 + $0x2c8] sm:$0xff]  ;;  %v1353_v49 = vld [vmem:[#allocation3 + $0x2d8] sm:$0xff]  ;;  %vm1345_vm13 = vcmask 517504  }
 0x323   :  { %1033 = vst.msk [vmem:[#allocation2] sm:$0x3] %vm1032_vm10, %v4541_v54  ;;  %vm1629_vm10 = vcmask 583168  }
 0x324   :  { %4020 = vtanh.f32 %v599_v55  ;;  %v1067_v55 = vld [vmem:[#allocation3 + $0x1b8] sm:$0xff]  ;;  %3621 = vmatpush3.bf16.msra.mxu0 %v3620_v52  ;;  %v1355_v52 = vld [vmem:[#allocation3 + $0x2e8] sm:$0xff] }
 0x325   :  { %4022 = vtanh.f32 %v778_v56  ;;  %v1068_v56 = vld [vmem:[#allocation3 + $0x1c0] sm:$0xff]  ;;  %3622 = vmatprep.subr.bf16.mxu0 %v4131_v3 }
 0x32e   :  { %v4021_v57 = vpop.eup %4020 }
 0x32f   :  { %1035 = vrot.lane.b32.xlu0 %v4021_v57, %s4172_s13  ;;  %v4023_v58 = vpop.eup %4022  ;;  %v1158_v57 = vld [vmem:[#allocation3 + $0x238] sm:$0xff] }
 0x330   :  { %v3623_v61 = vpack.c.bf16 %v1159_v59, %v1158_v57  ;;  %v1359_v59 = vld [vmem:[#allocation3 + $0x308] sm:$0xff] }
 0x332   :  { %3624 = vmatpush3.bf16.msra.mxu0 %v3623_v61 }
 0x333   :  { %1041 = vrot.lane.b32.xlu0 %v4023_v58, %s4173_s14  ;;  %v3599_v58 = vpack.c.bf16 %v1068_v56, %v1067_v55  ;;  %3643 = vmatprep.subr.bf16.mxu0 %v4131_v3  ;;  %v1356_v55 = vld [vmem:[#allocation3 + $0x2f0] sm:$0xff]  ;;  %v1357_v56 = vld [vmem:[#allocation3 + $0x2f8] sm:$0xff] }
 0x334   :  { %v3656_v57 = vpack.c.bf16 %v1357_v56, %v1356_v55  ;;  %v1727_v55 = vld [vmem:[#allocation3 + $0xa0] sm:$0xff]  ;;  %v1728_v56 = vld [vmem:[#allocation3 + $0xa8] sm:$0xff] }
 0x335   :  { %3600 = vmatpush3.bf16.msra.mxu1 %v3599_v58  ;;  %v1358_v58 = vld [vmem:[#allocation3 + $0x300] sm:$0xff] }
 0x336   :  { %3625 = vmatprep.subr.bf16.mxu1 %v4131_v3  ;;  %v3659_v61 = vpack.c.bf16 %v1359_v59, %v1358_v58  ;;  %v1444_v58 = vld [vmem:[#allocation3 + $0x350] sm:$0xff]  ;;  %v1445_v59 = vld [vmem:[#allocation3 + $0x358] sm:$0xff] }
 0x3a1   :  { %v1036_v35 = vpop.permute.xlu0 %1035 }
 0x3a2   :  { %1039 = vst.msk [vmem:[#allocation2] sm:$0x3] %vm1038_vm14, %v1036_v35 }
 0x3a5   :  { %v1042_v40 = vpop.permute.xlu0 %1041 }
 0x3a6   :  { %1045 = vst.msk [vmem:[#allocation2] sm:$0x3] %vm1044_vm7, %v1042_v40  ;;  %v1348_v40 = vld [vmem:[#allocation3 + $0x2b0] sm:$0xff] }
 0x3ce   :  { %v1020_v48 = vpop.f32.mrb[4].mxu0 }
 0x3cf   :  { %v1021_v50 = vadd.f32 %v2494_v45, %v1020_v48  ;;  %v2993_v51 = vpop.f32.mrb[5].mxu0  ;;  %v1349_v45 = vld [vmem:[#allocation3 + $0x2b8] sm:$0xff]  ;;  %v3647_v48 = vpack.c.bf16 %v1351_v47, %v1350_v0  ;;  %v1725_v47 = vld [vmem:[#allocation3 + $0x90] sm:$0xff] }
 0x3d0   :  { %v3644_v46 = vpack.c.bf16 %v1349_v45, %v1348_v40  ;;  %v1354_v51 = vld [vmem:[#allocation3 + $0x2e0] sm:$0xff] }
 0x3d1   :  { %4024 = vtanh.f32 %v1021_v50  ;;  %v3650_v50 = vpack.c.bf16 %v1353_v49, %v1352_v2  ;;  %v1723_v45 = vld [vmem:[#allocation3 + $0x80] sm:$0xff]  ;;  %v1440_v2 = vld [vmem:[#allocation3 + $0x330] sm:$0xff]  ;;  %v1441_v49 = vld [vmem:[#allocation3 + $0x338] sm:$0xff] }
 0x3db   :  { %v4025_v62 = vpop.eup %4024 }
 0x3dc   :  { %1047 = vrot.lane.b32.xlu0 %v4025_v62, %s4174_s15  ;;  %v1360_v62 = vld [vmem:[#allocation3 + $0x310] sm:$0xff] }
 0x44e   :  { %v1048_v63 = vpop.permute.xlu0 %1047 }
 0x44f   :  { %1051 = vst.msk [vmem:[#allocation2] sm:$0x3] %vm1050_vm8, %v1048_v63  ;;  %v1361_v63 = vld [vmem:[#allocation3 + $0x318] sm:$0xff] }
 0x450   :  { %v3662_v4 = vpack.c.bf16 %v1361_v63, %v1360_v62  ;;  %v1729_v62 = vld [vmem:[#allocation3 + $0xb0] sm:$0xff]  ;;  %v1730_v63 = vld [vmem:[#allocation3 + $0xb8] sm:$0xff] }
 0x456   :  { %v1052_v16 = vld [vmem:[#allocation2] sm:$0x3] }
 0x457   :  { %3027 = vmatmul.mubr.f32.vlgmr.msra.gmra.mrb[10].mxu1 %v1052_v16  ;;  %3062 = vmatmul.mubr.f32.vlgmr.msra.gmra.mrb[6].mxu0 %v1052_v16 }
 0x458   :  { %3627 = vmatpush3.bf16.msra.mxu1 %v3626_v6  ;;  %3090 = vmatprep.mubr.msk.f32.mxu1 %vm4143_vm0, %v4132_v10  ;;  %v1363_v6 = vld [vmem:[#allocation3 + $0x328] sm:$0xff] }
 0x459   :  { %3628 = vmatprep.subr.bf16.mxu1 %v4131_v3  ;;  %3125 = vmatprep.mubr.msk.f32.mxu0 %vm4143_vm0, %v4132_v10  ;;  %v3665_v8 = vpack.c.bf16 %v1363_v6, %v1362_v5  ;;  %v4619_v5 = vpack.c.bf16 %v1730_v63, %v1729_v62  ;;  %v1731_v6 = vld [vmem:[#allocation3 + $0xc0] sm:$0xff]  ;;  %v1646_v63 = vld [vmem:[#allocation3 + $0x488] sm:$0xff] }
 0x45a   :  { %3645 = vmatpush3.bf16.msra.mxu0 %v3644_v46  ;;  %v1724_v46 = vld [vmem:[#allocation3 + $0x88] sm:$0xff] }
 0x45b   :  { %3646 = vmatprep.subr.bf16.mxu0 %v4131_v3  ;;  %v4603_v0 = vpack.c.bf16 %v1724_v46, %v1723_v45  ;;  %v1638_v46 = vld [vmem:[#allocation3 + $0x448] sm:$0xff] }
 0x45c   :  { %3630 = vmatpush3.bf16.msra.mxu1 %v3629_v17 }
 0x45d   :  { %3631 = vmatprep.subr.bf16.mxu1 %v4131_v3 }
 0x45e   :  { %3648 = vmatpush3.bf16.msra.mxu0 %v3647_v48  ;;  %v1726_v48 = vld [vmem:[#allocation3 + $0x98] sm:$0xff] }
 0x45f   :  { %3649 = vmatprep.subr.bf16.mxu0 %v4131_v3 }
 0x460   :  { %3633 = vmatpush3.bf16.msra.mxu1 %v3632_v18  ;;  %v1535_v18 = vld [vmem:[#allocation3 + $0x398] sm:$0xff] }
 0x461   :  { %3634 = vmatprep.subr.bf16.mxu1 %v4131_v3  ;;  %v3686_v26 = vpack.c.bf16 %v1536_v22, %v1535_v18  ;;  %v1735_v18 = vld [vmem:[#allocation3 + $0xe0] sm:$0xff]  ;;  %v1736_v22 = vld [vmem:[#allocation3 + $0xe8] sm:$0xff] }
 0x462   :  { %3651 = vmatpush3.bf16.msra.mxu0 %v3650_v50  ;;  %v1442_v50 = vld [vmem:[#allocation3 + $0x340] sm:$0xff] }
 0x463   :  { %3652 = vmatprep.subr.bf16.mxu0 %v4131_v3 }
 0x464   :  { %3636 = vmatpush3.bf16.msra.mxu1 %v3635_v19  ;;  %v1537_v19 = vld [vmem:[#allocation3 + $0x3a8] sm:$0xff] }
 0x465   :  { %3637 = vmatprep.subr.bf16.mxu1 %v4131_v3  ;;  %v3689_v11 = vpack.c.bf16 %v1538_v23, %v1537_v19  ;;  %v1737_v19 = vld [vmem:[#allocation3 + $0xf0] sm:$0xff]  ;;  %v1738_v23 = vld [vmem:[#allocation3 + $0xf8] sm:$0xff] }
 0x468   :  { %3639 = vmatpush3.bf16.msra.mxu1 %v3638_v27 }
 0x469   :  { %3640 = vmatprep.subr.bf16.mxu1 %v4131_v3 }
 0x46c   :  { %3642 = vmatpush3.bf16.msra.mxu1 %v3641_v1 }
 0x46d   :  { %3088 = vmatprep.subr.mxu1 %v4132_v10 }
 0x470   :  { %3089 = vmatpush3.msk.msra.mxu1 %vm1258_vm9, %v1248_v29  ;;  %v1541_v29 = vld [vmem:[#allocation3 + $0x3c8] sm:$0xff] }
 0x471   :  { %3667 = vmatprep.subr.bf16.mxu1 %v4131_v3 }
 0x52a   :  { %v1140_v33 = vpop.f32.mrb[10].mxu1  ;;  %v1231_v34 = vpop.f32.mrb[6].mxu0 }
 0x52b   :  { %v1141_v36 = vadd.f32 %v2496_v53, %v1140_v33  ;;  %v1232_v37 = vadd.f32 %v2497_v32, %v1231_v34  ;;  %v3028_v38 = vpop.f32.mrb[11].mxu1  ;;  %v3063_v39 = vpop.f32.mrb[7].mxu0  ;;  %v1542_v53 = vld [vmem:[#allocation3 + $0x3d0] sm:$0xff]  ;;  %v1543_v33 = vld [vmem:[#allocation3 + $0x3d8] sm:$0xff]  ;;  %v1544_v34 = vld [vmem:[#allocation3 + $0x3e0] sm:$0xff] }
 0x52c   :  { %v3695_v32 = vpack.c.bf16 %v1542_v53, %v1541_v29  ;;  %v1546_v38 = vld [vmem:[#allocation3 + $0x3f0] sm:$0xff]  ;;  %v1450_v53 = vld [vmem:[#allocation3 + $0x380] sm:$0xff] }
 0x52d   :  { %v1332_v41 = vmul.f32 0.5, %v1141_v36  ;;  %4026 = vtanh.f32 %v1232_v37  ;;  %2393 = vst.msk [vmem:[%s4895_s2] sm:$0x3] %vm2392_vm11, %v1141_v36  ;;  %v1545_v37 = vld [vmem:[#allocation3 + $0x3e8] sm:$0xff] }
 0x52e   :  { %v3701_v39 = vpack.c.bf16 %v1546_v38, %v1545_v37  ;;  %v1632_v38 = vld [vmem:[#allocation3 + $0x418] sm:$0xff] }
 0x52f   :  { %v1333_v42 = vmul.f32 1.442695, %v1332_v41  ;;  %v1547_v41 = vld [vmem:[#allocation3 + $0x3f8] sm:$0xff] }
 0x531   :  { %4028 = vpow2.f32 %v1333_v42  ;;  %v1548_v42 = vld [vmem:[#allocation3 + $0x400] sm:$0xff] }
 0x537   :  { %v4027_v30 = vpop.eup %4026 }
 0x538   :  { %3091 = vmatmul.mubr.msk.f32.vlgmr.msra.gmra.mrb[12].mxu1 %vm1254_vm12, %v4027_v30  ;;  %v3704_v30 = vpack.c.bf16 %v1548_v42, %v1547_v41  ;;  %v1634_v42 = vld [vmem:[#allocation3 + $0x428] sm:$0xff] }
 0x539   :  { %3154 = vmatprep.mubr.msk.f32.mxu1 %vm4143_vm0, %v4132_v10 }
 0x53b   :  { %v4029_v43 = vpop.eup %4028 }
 0x53c   :  { %v1335_v35 = vmul.f32 %v4029_v43, %v4541_v54  ;;  %v3653_v54 = vpack.c.bf16 %v1355_v52, %v1354_v51  ;;  %v1549_v43 = vld [vmem:[#allocation3 + $0x408] sm:$0xff]  ;;  %v4607_v51 = vpack.c.bf16 %v1726_v48, %v1725_v47  ;;  %v3668_v52 = vpack.c.bf16 %v1441_v49, %v1440_v2  ;;  %v1639_v47 = vld [vmem:[#allocation3 + $0x450] sm:$0xff]  ;;  %v1640_v2 = vld [vmem:[#allocation3 + $0x458] sm:$0xff] }
 0x53d   :  { %v3719_v48 = vpack.c.bf16 %v1639_v47, %v1638_v46  ;;  %v1641_v49 = vld [vmem:[#allocation3 + $0x460] sm:$0xff] }
 0x53e   :  { %1337 = vrot.lane.b32.xlu1 %v1335_v35, %s4175_s18  ;;  %3654 = vmatpush3.bf16.msra.mxu0 %v3653_v54  ;;  %v1550_v35 = vld [vmem:[#allocation3 + $0x410] sm:$0xff]  ;;  %v1443_v54 = vld [vmem:[#allocation3 + $0x348] sm:$0xff] }
 0x53f   :  { %3655 = vmatprep.subr.bf16.mxu0 %v4131_v3  ;;  %v3707_v40 = vpack.c.bf16 %v1550_v35, %v1549_v43  ;;  %3669 = vmatpush3.bf16.msra.mxu1 %v3668_v52  ;;  %v1642_v52 = vld [vmem:[#allocation3 + $0x468] sm:$0xff] }
 0x540   :  { %3670 = vmatprep.subr.bf16.mxu1 %v4131_v3 }
 0x542   :  { %3657 = vmatpush3.bf16.msra.mxu0 %v3656_v57  ;;  %v3671_v57 = vpack.c.bf16 %v1443_v54, %v1442_v50  ;;  %v3722_v50 = vpack.c.bf16 %v1641_v49, %v1640_v2  ;;  %v1643_v54 = vld [vmem:[#allocation3 + $0x470] sm:$0xff] }
 0x543   :  { %3658 = vmatprep.subr.bf16.mxu0 %v4131_v3 }
 0x544   :  { %3672 = vmatpush3.bf16.msra.mxu1 %v3671_v57  ;;  %v1644_v57 = vld [vmem:[#allocation3 + $0x478] sm:$0xff] }
 0x545   :  { %3673 = vmatprep.subr.bf16.mxu1 %v4131_v3 }
 0x546   :  { %3660 = vmatpush3.bf16.msra.mxu0 %v3659_v61  ;;  %v4614_v61 = vpack.c.bf16 %v1728_v56, %v1727_v55  ;;  %v3725_v55 = vpack.c.bf16 %v1643_v54, %v1642_v52 }
 0x547   :  { %3661 = vmatprep.subr.bf16.mxu0 %v4131_v3 }
 0x54a   :  { %3663 = vmatpush3.bf16.msra.mxu0 %v3662_v4  ;;  %v3674_v4 = vpack.c.bf16 %v1445_v59, %v1444_v58  ;;  %v1645_v58 = vld [vmem:[#allocation3 + $0x480] sm:$0xff] }
 0x54b   :  { %3664 = vmatprep.subr.bf16.mxu0 %v4131_v3  ;;  %v3728_v62 = vpack.c.bf16 %v1645_v58, %v1644_v57 }
 0x54c   :  { %3675 = vmatpush3.bf16.msra.mxu1 %v3674_v4  ;;  %v1647_v4 = vld [vmem:[#allocation3 + $0x490] sm:$0xff] }
 0x54d   :  { %3676 = vmatprep.subr.bf16.mxu1 %v4131_v3 }
 0x54e   :  { %3666 = vmatpush3.bf16.msra.mxu0 %v3665_v8  ;;  %v1732_v8 = vld [vmem:[#allocation3 + $0xc8] sm:$0xff] }
 0x54f   :  { %3685 = vmatprep.subr.bf16.mxu0 %v4131_v3 }
 0x5b0   :  { %v1338_v9 = vpop.permute.xlu1 %1337 }
 0x5b1   :  { %v1340_v16 = vadd.f32 %v1338_v9, %v1141_v36  ;;  %v3698_v36 = vpack.c.bf16 %v1544_v34, %v1543_v33  ;;  %v4624_v9 = vpack.c.bf16 %v1732_v8, %v1731_v6  ;;  %v1452_v34 = vld [vmem:[#allocation3 + $0x390] sm:$0xf]  ;;  %v3731_v6 = vpack.c.bf16 %v1647_v4, %v1646_v63 }
 0x5b3   :  { %1342 = vrot.lane.b32.xlu0 %v1340_v16, %s4176_s19  ;;  %v1733_v16 = vld [vmem:[#allocation3 + $0xd0] sm:$0xff] }
 0x5b7   :  { %1626 = vrot.lane.b32.xlu0 %v4535_v44, %s4177_s20  ;;  %v1539_v44 = vld [vmem:[#allocation3 + $0x3b8] sm:$0xff] }
 0x5b8   :  { %v3692_v1 = vpack.c.bf16 %v1540_v28, %v1539_v44  ;;  %v1448_v28 = vld [vmem:[#allocation3 + $0x370] sm:$0xff] }
 0x60b   :  { %v4591_v17 = vpop.f32.mrb[12].mxu1 }
 0x60c   :  { %v3092_v13 = vpop.f32.mrb[13].mxu1 }
 0x60d   :  { %v1734_v13 = vld [vmem:[#allocation3 + $0xd8] sm:$0xff] }
 0x625   :  { %v1343_v14 = vpop.permute.xlu0 %1342 }
 0x626   :  { %1346 = vst.msk [vmem:[#allocation2] sm:$0x3] %vm1345_vm13, %v1343_v14  ;;  %v4628_v14 = vpack.c.bf16 %v1734_v13, %v1733_v16 }
 0x629   :  { %v1627_v24 = vpop.permute.xlu0 %1626 }
 0x62d   :  { %v1347_v27 = vld [vmem:[#allocation2] sm:$0x3] }
 0x62e   :  { %3126 = vmatmul.mubr.f32.vlgmr.msra.gmra.mrb[8].mxu0 %v1347_v27  ;;  %1630 = vst.msk [vmem:[#allocation2] sm:$0x3] %vm1629_vm10, %v1627_v24  ;;  %v4636_v24 = vpack.c.bf16 %v1738_v23, %v1737_v19 }
 0x62f   :  { %3687 = vmatpush3.bf16.msra.mxu0 %v3686_v26  ;;  %3189 = vmatprep.mubr.msk.f32.mxu0 %vm4143_vm0, %v4132_v10  ;;  %v4632_v26 = vpack.c.bf16 %v1736_v22, %v1735_v18 }
 0x630   :  { %3688 = vmatprep.subr.bf16.mxu0 %v4131_v3 }
 0x633   :  { %3690 = vmatpush3.bf16.msra.mxu0 %v3689_v11  ;;  %v1447_v11 = vld [vmem:[#allocation3 + $0x368] sm:$0xff] }
 0x634   :  { %3691 = vmatprep.subr.bf16.mxu0 %v4131_v3  ;;  %v3677_v44 = vpack.c.bf16 %v1447_v11, %v1446_v21 }
 0x635   :  { %v1631_v8 = vld [vmem:[#allocation2] sm:$0x3] }
 0x636   :  { %3678 = vmatpush3.bf16.msra.mxu1 %v3677_v44 }
 0x637   :  { %3693 = vmatpush3.bf16.msra.mxu0 %v3692_v1  ;;  %3679 = vmatprep.subr.bf16.mxu1 %v4131_v3  ;;  %v1449_v1 = vld [vmem:[#allocation3 + $0x378] sm:$0xff] }
 0x638   :  { %3694 = vmatprep.subr.bf16.mxu0 %v4131_v3  ;;  %v3680_v29 = vpack.c.bf16 %v1449_v1, %v1448_v28 }
 0x63a   :  { %3681 = vmatpush3.bf16.msra.mxu1 %v3680_v29 }
 0x63b   :  { %3696 = vmatpush3.bf16.msra.mxu0 %v3695_v32  ;;  %v1451_v32 = vld [vmem:[#allocation3 + $0x388] sm:$0xff]  ;;  %3682 = vmatprep.subr.bf16.mxu1 %v4131_v3 }
 0x63c   :  { %3697 = vmatprep.subr.bf16.mxu0 %v4131_v3  ;;  %v3683_v33 = vpack.c.bf16 %v1451_v32, %v1450_v53 }
 0x63e   :  { %3684 = vmatpush3.bf16.msra.mxu1 %v3683_v33 }
 0x63f   :  { %3699 = vmatpush3.bf16.msra.mxu0 %v3698_v36  ;;  %3152 = vmatprep.subr.mxu1 %v4132_v10 }
 0x640   :  { %3700 = vmatprep.subr.bf16.mxu0 %v4131_v3 }
 0x642   :  { %3153 = vmatpush3.msk.msra.mxu1 %vm1258_vm9, %v1452_v34 }
 0x643   :  { %3702 = vmatpush3.bf16.msra.mxu0 %v3701_v39  ;;  %3709 = vmatprep.subr.bf16.mxu1 %v4131_v3  ;;  %v1633_v39 = vld [vmem:[#allocation3 + $0x420] sm:$0xff] }
 0x644   :  { %3703 = vmatprep.subr.bf16.mxu0 %v4131_v3  ;;  %v3710_v41 = vpack.c.bf16 %v1633_v39, %v1632_v38 }
 0x647   :  { %3705 = vmatpush3.bf16.msra.mxu0 %v3704_v30  ;;  %v1635_v30 = vld [vmem:[#allocation3 + $0x430] sm:$0xff] }
 0x648   :  { %3706 = vmatprep.subr.bf16.mxu0 %v4131_v3  ;;  %v3713_v35 = vpack.c.bf16 %v1635_v30, %v1634_v42 }
 0x64b   :  { %3708 = vmatpush3.bf16.msra.mxu0 %v3707_v40  ;;  %v1637_v40 = vld [vmem:[#allocation3 + $0x440] sm:$0xff] }
 0x64c   :  { %3733 = vmatprep.subr.bf16.mxu0 %v4131_v3  ;;  %v3716_v45 = vpack.c.bf16 %v1637_v40, %v1636_v25 }
 0x64e   :  { %3190 = vmatmul.mubr.f32.vlgmr.msra.gmra.mrb[10].mxu0 %v1347_v27  ;;  %v4178_v27 = vmov 1.0  }
 0x64f   :  { %3735 = vmatpush3.bf16.msra.mxu0 %v4603_v0  ;;  %3259 = vmatprep.mubr.msk.f32.mxu0 %vm4143_vm0, %v4132_v10 }
 0x650   :  { %3736 = vmatprep.subr.bf16.mxu0 %v4131_v3 }
 0x653   :  { %3738 = vmatpush3.bf16.msra.mxu0 %v4607_v51 }
 0x654   :  { %3739 = vmatprep.subr.bf16.mxu0 %v4131_v3 }
 0x657   :  { %3741 = vmatpush3.bf16.msra.mxu0 %v4614_v61 }
 0x658   :  { %3742 = vmatprep.subr.bf16.mxu0 %v4131_v3 }
 0x65b   :  { %3744 = vmatpush3.bf16.msra.mxu0 %v4619_v5 }
 0x65c   :  { %3745 = vmatprep.subr.bf16.mxu0 %v4131_v3 }
 0x65f   :  { %3747 = vmatpush3.bf16.msra.mxu0 %v4624_v9 }
 0x660   :  { %3748 = vmatprep.subr.bf16.mxu0 %v4131_v3 }
 0x663   :  { %3750 = vmatpush3.bf16.msra.mxu0 %v4628_v14 }
 0x664   :  { %3751 = vmatprep.subr.bf16.mxu0 %v4131_v3 }
 0x667   :  { %3753 = vmatpush3.bf16.msra.mxu0 %v4632_v26 }
 0x668   :  { %3754 = vmatprep.subr.bf16.mxu0 %v4131_v3 }
 0x66b   :  { %3756 = vmatpush3.bf16.msra.mxu0 %v4636_v24 }
 0x66c   :  { %3781 = vmatprep.subr.bf16.mxu0 %v4131_v3 }
 0x66e   :  { %3260 = vmatmul.mubr.msk.f32.vlgmr.msra.gmra.mrb[12].mxu0 %vm617_vm1, %v4178_v27 }
 0x66f   :  { %3783 = vmatpush3.bf16.msra.mxu0 %v4603_v0  ;;  %3329 = vmatprep.mubr.msk.f32.mxu0 %vm4143_vm0, %v4132_v10 }
 0x670   :  { %3784 = vmatprep.subr.bf16.mxu0 %v4131_v3 }
 0x673   :  { %3786 = vmatpush3.bf16.msra.mxu0 %v4607_v51 }
 0x674   :  { %3787 = vmatprep.subr.bf16.mxu0 %v4131_v3 }
 0x677   :  { %3789 = vmatpush3.bf16.msra.mxu0 %v4614_v61 }
 0x678   :  { %3790 = vmatprep.subr.bf16.mxu0 %v4131_v3 }
 0x67b   :  { %3792 = vmatpush3.bf16.msra.mxu0 %v4619_v5 }
 0x67c   :  { %3793 = vmatprep.subr.bf16.mxu0 %v4131_v3 }
 0x67f   :  { %3795 = vmatpush3.bf16.msra.mxu0 %v4624_v9 }
 0x680   :  { %3796 = vmatprep.subr.bf16.mxu0 %v4131_v3 }
 0x683   :  { %3798 = vmatpush3.bf16.msra.mxu0 %v4628_v14 }
 0x684   :  { %3799 = vmatprep.subr.bf16.mxu0 %v4131_v3 }
 0x687   :  { %3801 = vmatpush3.bf16.msra.mxu0 %v4632_v26 }
 0x688   :  { %3802 = vmatprep.subr.bf16.mxu0 %v4131_v3 }
 0x68b   :  { %3804 = vmatpush3.bf16.msra.mxu0 %v4636_v24 }
 0x68c   :  { %3829 = vmatprep.subr.bf16.mxu0 %v4131_v3 }
 0x68e   :  { %3330 = vmatmul.mubr.msk.f32.vlgmr.msra.gmra.mrb[14].mxu0 %vm642_vm2, %v4178_v27 }
 0x68f   :  { %3831 = vmatpush3.bf16.msra.mxu0 %v4603_v0  ;;  %3399 = vmatprep.mubr.msk.f32.mxu0 %vm4143_vm0, %v4132_v10 }
 0x690   :  { %3832 = vmatprep.subr.bf16.mxu0 %v4131_v3 }
 0x693   :  { %3834 = vmatpush3.bf16.msra.mxu0 %v4607_v51 }
 0x694   :  { %3835 = vmatprep.subr.bf16.mxu0 %v4131_v3 }
 0x697   :  { %3837 = vmatpush3.bf16.msra.mxu0 %v4614_v61 }
 0x698   :  { %3838 = vmatprep.subr.bf16.mxu0 %v4131_v3 }
 0x69b   :  { %3840 = vmatpush3.bf16.msra.mxu0 %v4619_v5 }
 0x69c   :  { %3841 = vmatprep.subr.bf16.mxu0 %v4131_v3 }
 0x69f   :  { %3843 = vmatpush3.bf16.msra.mxu0 %v4624_v9 }
 0x6a0   :  { %3844 = vmatprep.subr.bf16.mxu0 %v4131_v3 }
 0x6a3   :  { %3846 = vmatpush3.bf16.msra.mxu0 %v4628_v14 }
 0x6a4   :  { %3847 = vmatprep.subr.bf16.mxu0 %v4131_v3 }
 0x6a7   :  { %3849 = vmatpush3.bf16.msra.mxu0 %v4632_v26 }
 0x6a8   :  { %3850 = vmatprep.subr.bf16.mxu0 %v4131_v3 }
 0x6ab   :  { %3852 = vmatpush3.bf16.msra.mxu0 %v4636_v24 }
 0x6ac   :  { %3877 = vmatprep.subr.bf16.mxu0 %v4131_v3 }
 0x6ae   :  { %3400 = vmatmul.mubr.msk.f32.vlgmr.msra.gmra.mrb[16].mxu0 %vm666_vm4, %v4178_v27 }
 0x6af   :  { %3879 = vmatpush3.bf16.msra.mxu0 %v4603_v0  ;;  %3469 = vmatprep.mubr.msk.f32.mxu0 %vm4143_vm0, %v4132_v10 }
 0x6b0   :  { %3880 = vmatprep.subr.bf16.mxu0 %v4131_v3 }
 0x6b3   :  { %3882 = vmatpush3.bf16.msra.mxu0 %v4607_v51 }
 0x6b4   :  { %3883 = vmatprep.subr.bf16.mxu0 %v4131_v3 }
 0x6b7   :  { %3885 = vmatpush3.bf16.msra.mxu0 %v4614_v61 }
 0x6b8   :  { %3886 = vmatprep.subr.bf16.mxu0 %v4131_v3 }
 0x6bb   :  { %3888 = vmatpush3.bf16.msra.mxu0 %v4619_v5 }
 0x6bc   :  { %3889 = vmatprep.subr.bf16.mxu0 %v4131_v3 }
 0x6bf   :  { %3891 = vmatpush3.bf16.msra.mxu0 %v4624_v9 }
 0x6c0   :  { %3892 = vmatprep.subr.bf16.mxu0 %v4131_v3 }
 0x6c3   :  { %3894 = vmatpush3.bf16.msra.mxu0 %v4628_v14 }
 0x6c4   :  { %3895 = vmatprep.subr.bf16.mxu0 %v4131_v3 }
 0x6c7   :  { %3897 = vmatpush3.bf16.msra.mxu0 %v4632_v26 }
 0x6c8   :  { %3898 = vmatprep.subr.bf16.mxu0 %v4131_v3 }
 0x6cb   :  { %3900 = vmatpush3.bf16.msra.mxu0 %v4636_v24 }
 0x6ce   :  { %3470 = vmatmul.mubr.msk.f32.vlgmr.msra.gmra.mrb[18].mxu0 %vm690_vm6, %v4178_v27 }
 0x701   :  { %v1435_v12 = vpop.f32.mrb[8].mxu0 }
 0x702   :  { %v1436_v36 = vadd.f32 %v2501_v31, %v1435_v12  ;;  %v3127_v37 = vpop.f32.mrb[9].mxu0 }
 0x704   :  { %4030 = vtanh.f32 %v1436_v36 }
 0x70e   :  { %v4031_v43 = vpop.eup %4030 }
 0x70f   :  { %3155 = vmatmul.mubr.msk.f32.vlgmr.msra.gmra.mrb[14].mxu1 %vm1254_vm12, %v4031_v43 }
 0x710   :  { %3711 = vmatpush3.bf16.msra.mxu1 %v3710_v41  ;;  %3224 = vmatprep.mubr.msk.f32.mxu1 %vm4143_vm0, %v4132_v10 }
 0x711   :  { %3712 = vmatprep.subr.bf16.mxu1 %v4131_v3 }
 0x714   :  { %3714 = vmatpush3.bf16.msra.mxu1 %v3713_v35 }
 0x715   :  { %3715 = vmatprep.subr.bf16.mxu1 %v4131_v3 }
 0x718   :  { %3717 = vmatpush3.bf16.msra.mxu1 %v3716_v45 }
 0x719   :  { %3718 = vmatprep.subr.bf16.mxu1 %v4131_v3 }
 0x71c   :  { %3720 = vmatpush3.bf16.msra.mxu1 %v3719_v48 }
 0x71d   :  { %3721 = vmatprep.subr.bf16.mxu1 %v4131_v3 }
 0x720   :  { %3723 = vmatpush3.bf16.msra.mxu1 %v3722_v50 }
 0x721   :  { %v4722_v56 = vpop.f32.mrb[10].mxu0  ;;  %3724 = vmatprep.subr.bf16.mxu1 %v4131_v3 }
 0x722   :  { %v3191_v59 = vpop.f32.mrb[11].mxu0 }
 0x724   :  { %3726 = vmatpush3.bf16.msra.mxu1 %v3725_v55 }
 0x725   :  { %3727 = vmatprep.subr.bf16.mxu1 %v4131_v3 }
 0x728   :  { %3729 = vmatpush3.bf16.msra.mxu1 %v3728_v62 }
 0x729   :  { %3730 = vmatprep.subr.bf16.mxu1 %v4131_v3 }
 0x72c   :  { %3732 = vmatpush3.bf16.msra.mxu1 %v3731_v6 }
 0x72d   :  { %3757 = vmatprep.subr.bf16.mxu1 %v4131_v3 }
 0x72f   :  { %3225 = vmatmul.mubr.f32.vlgmr.msra.gmra.mrb[16].mxu1 %v1631_v8 }
 0x730   :  { %3759 = vmatpush3.bf16.msra.mxu1 %v4603_v0  ;;  %3294 = vmatprep.mubr.msk.f32.mxu1 %vm4143_vm0, %v4132_v10 }
 0x731   :  { %3760 = vmatprep.subr.bf16.mxu1 %v4131_v3 }
 0x734   :  { %3762 = vmatpush3.bf16.msra.mxu1 %v4607_v51 }
 0x735   :  { %3763 = vmatprep.subr.bf16.mxu1 %v4131_v3 }
 0x738   :  { %3765 = vmatpush3.bf16.msra.mxu1 %v4614_v61 }
 0x739   :  { %3766 = vmatprep.subr.bf16.mxu1 %v4131_v3 }
 0x73c   :  { %3768 = vmatpush3.bf16.msra.mxu1 %v4619_v5 }
 0x73d   :  { %3769 = vmatprep.subr.bf16.mxu1 %v4131_v3 }
 0x740   :  { %3771 = vmatpush3.bf16.msra.mxu1 %v4624_v9 }
 0x741   :  { %v1805_v16 = vpop.f32.mrb[12].mxu0  ;;  %3772 = vmatprep.subr.bf16.mxu1 %v4131_v3 }
 0x742   :  { %v3261_v13 = vpop.f32.mrb[13].mxu0 }
 0x744   :  { %3774 = vmatpush3.bf16.msra.mxu1 %v4628_v14 }
 0x745   :  { %3775 = vmatprep.subr.bf16.mxu1 %v4131_v3 }
 0x748   :  { %3777 = vmatpush3.bf16.msra.mxu1 %v4632_v26 }
 0x749   :  { %3778 = vmatprep.subr.bf16.mxu1 %v4131_v3 }
 0x74c   :  { %3780 = vmatpush3.bf16.msra.mxu1 %v4636_v24 }
 0x74d   :  { %3805 = vmatprep.subr.bf16.mxu1 %v4131_v3 }
 0x74f   :  { %3295 = vmatmul.mubr.msk.f32.vlgmr.msra.gmra.mrb[18].mxu1 %vm630_vm15, %v4178_v27 }
 0x750   :  { %3807 = vmatpush3.bf16.msra.mxu1 %v4603_v0  ;;  %3364 = vmatprep.mubr.msk.f32.mxu1 %vm4143_vm0, %v4132_v10 }
 0x751   :  { %3808 = vmatprep.subr.bf16.mxu1 %v4131_v3 }
 0x754   :  { %3810 = vmatpush3.bf16.msra.mxu1 %v4607_v51 }
 0x755   :  { %3811 = vmatprep.subr.bf16.mxu1 %v4131_v3 }
 0x758   :  { %3813 = vmatpush3.bf16.msra.mxu1 %v4614_v61 }
 0x759   :  { %3814 = vmatprep.subr.bf16.mxu1 %v4131_v3 }
 0x75c   :  { %3816 = vmatpush3.bf16.msra.mxu1 %v4619_v5 }
 0x75d   :  { %3817 = vmatprep.subr.bf16.mxu1 %v4131_v3 }
 0x760   :  { %3819 = vmatpush3.bf16.msra.mxu1 %v4624_v9 }
 0x761   :  { %v1992_v7 = vpop.f32.mrb[14].mxu0  ;;  %3820 = vmatprep.subr.bf16.mxu1 %v4131_v3 }
 0x762   :  { %v3331_v18 = vpop.f32.mrb[15].mxu0 }
 0x764   :  { %3822 = vmatpush3.bf16.msra.mxu1 %v4628_v14 }
 0x765   :  { %3823 = vmatprep.subr.bf16.mxu1 %v4131_v3 }
 0x768   :  { %3825 = vmatpush3.bf16.msra.mxu1 %v4632_v26 }
 0x769   :  { %3826 = vmatprep.subr.bf16.mxu1 %v4131_v3 }
 0x76c   :  { %3828 = vmatpush3.bf16.msra.mxu1 %v4636_v24 }
 0x76d   :  { %3853 = vmatprep.subr.bf16.mxu1 %v4131_v3 }
 0x76f   :  { %3365 = vmatmul.mubr.msk.f32.vlgmr.msra.gmra.mrb[20].mxu1 %vm654_vm3, %v4178_v27 }
 0x770   :  { %3855 = vmatpush3.bf16.msra.mxu1 %v4603_v0  ;;  %3434 = vmatprep.mubr.msk.f32.mxu1 %vm4143_vm0, %v4132_v10  ;;  %vm1810_vm0 = vcmask 1041408  }
 0x771   :  { %3856 = vmatprep.subr.bf16.mxu1 %v4131_v3 }
 0x774   :  { %3858 = vmatpush3.bf16.msra.mxu1 %v4607_v51 }
 0x775   :  { %3859 = vmatprep.subr.bf16.mxu1 %v4131_v3 }
 0x778   :  { %3861 = vmatpush3.bf16.msra.mxu1 %v4614_v61  ;;  %v2502_v61 = vld [vmem:[#allocation3 + $0x49f] ss:$0 sm:$0xff] }
 0x779   :  { %3862 = vmatprep.subr.bf16.mxu1 %v4131_v3 }
 0x77c   :  { %3864 = vmatpush3.bf16.msra.mxu1 %v4619_v5 }
 0x77d   :  { %3865 = vmatprep.subr.bf16.mxu1 %v4131_v3 }
 0x780   :  { %3867 = vmatpush3.bf16.msra.mxu1 %v4624_v9 }
 0x781   :  { %v2178_v15 = vpop.f32.mrb[16].mxu0  ;;  %3868 = vmatprep.subr.bf16.mxu1 %v4131_v3 }
 0x782   :  { %v3401_v10 = vpop.f32.mrb[17].mxu0 }
 0x784   :  { %3870 = vmatpush3.bf16.msra.mxu1 %v4628_v14  ;;  %v2506_v14 = vld [vmem:[#allocation3 + $0x4a1] ss:$0 sm:$0xff] }
 0x785   :  { %3871 = vmatprep.subr.bf16.mxu1 %v4131_v3 }
 0x788   :  { %3873 = vmatpush3.bf16.msra.mxu1 %v4632_v26 }
 0x789   :  { %3874 = vmatprep.subr.bf16.mxu1 %v4131_v3 }
 0x78c   :  { %3876 = vmatpush3.bf16.msra.mxu1 %v4636_v24 }
 0x78f   :  { %3435 = vmatmul.mubr.msk.f32.vlgmr.msra.gmra.mrb[22].mxu1 %vm678_vm5, %v4178_v27 }
 0x7a1   :  { %v2364_v0 = vpop.f32.mrb[18].mxu0 }
 0x7a2   :  { %v3471_v51 = vpop.f32.mrb[19].mxu0 }
 0x7e2   :  { %v1530_v5 = vpop.f32.mrb[14].mxu1 }
 0x7e3   :  { %v1531_v9 = vadd.f32 %v2502_v61, %v1530_v5  ;;  %v3156_v22 = vpop.f32.mrb[15].mxu1 }
 0x7e5   :  { %1534 = vst [vmem:[#allocation6] sm:$0x3] %v1531_v9 }
 0x802   :  { %v1719_v19 = vpop.f32.mrb[16].mxu1 }
 0x803   :  { %v1720_v23 = vadd.f32 %v2506_v14, %v1719_v19  ;;  %v3226_v26 = vpop.f32.mrb[17].mxu1 }
 0x805   :  { %v1806_v3 = vadd.f32 %v1805_v16, %v1720_v23  ;;  %v1993_v21 = vadd.f32 %v1992_v7, %v1720_v23  ;;  %v2179_v24 = vadd.f32 %v2178_v15, %v1720_v23  ;;  %v4793_v11 = vadd.f32 %v2364_v0, %v1720_v23 }
 0x807   :  { %v1811_v20 = vsel %vm1810_vm0, %v1806_v3, -inf  ;;  %1809 = vst [vmem:[#allocation7] sm:$0x3] %v1806_v3  ;;  %1996 = vst [vmem:[#allocation7 + $0x4] sm:$0x3] %v1993_v21  ;;  %v1997_v27 = vsel %vm1810_vm0, %v1993_v21, -inf }
 0x808   :  { %2182 = vst [vmem:[#allocation7 + $0x8] sm:$0x3] %v2179_v24  ;;  %2368 = vst [vmem:[#allocation7 + $0xc] sm:$0x3] %v4793_v11  ;;  %1812 = vmax.xlane.f32.xlu0 %v1811_v20  ;;  %v2183_v44 = vsel %vm1810_vm0, %v2179_v24, -inf  ;;  %v2369_v12 = vsel %vm1810_vm0, %v4793_v11, -inf }
 0x80c   :  { %1998 = vmax.xlane.f32.xlu0 %v1997_v27 }
 0x810   :  { %2184 = vmax.xlane.f32.xlu0 %v2183_v44 }
 0x822   :  { %v1899_v28 = vpop.f32.mrb[18].mxu1 }
 0x823   :  { %v1900_v1 = vadd.f32 %v1899_v28, %v1720_v23  ;;  %v3296_v29 = vpop.f32.mrb[19].mxu1 }
 0x825   :  { %1903 = vst [vmem:[#allocation7 + $0x2] sm:$0x3] %v1900_v1  ;;  %v1904_v53 = vsel %vm1810_vm0, %v1900_v1, -inf }
 0x826   :  { %1905 = vmax.xlane.f32.xlu1 %v1904_v53 }
 0x842   :  { %v2085_v32 = vpop.f32.mrb[20].mxu1 }
 0x843   :  { %v2086_v33 = vadd.f32 %v2085_v32, %v1720_v23  ;;  %v3366_v34 = vpop.f32.mrb[21].mxu1 }
 0x845   :  { %2089 = vst [vmem:[#allocation7 + $0x6] sm:$0x3] %v2086_v33  ;;  %v2090_v31 = vsel %vm1810_vm0, %v2086_v33, -inf }
 0x846   :  { %2091 = vmax.xlane.f32.xlu0 %v2090_v31 }
 0x84a   :  { %2370 = vmax.xlane.f32.xlu0 %v2369_v12 }
 0x862   :  { %v2271_v36 = vpop.f32.mrb[22].mxu1 }
 0x863   :  { %v2272_v37 = vadd.f32 %v2271_v36, %v1720_v23  ;;  %v3436_v38 = vpop.f32.mrb[23].mxu1 }
 0x865   :  { %2275 = vst [vmem:[#allocation7 + $0xa] sm:$0x3] %v2272_v37  ;;  %v2276_v39 = vsel %vm1810_vm0, %v2272_v37, -inf }
 0x866   :  { %2277 = vmax.xlane.f32.xlu1 %v2276_v39 }
 0x895   :  { %v1813_v41 = vpop.xlane.xlu0 %1812 }
 0x896   :  { %vm1814_vm15 = vcmp.ge.f32.partialorder %v1806_v3, %v1813_v41 }
 0x897   :  { %v1815_v42 = vsel %vm1814_vm15, %v4330_v60, 128 }
 0x898   :  { %v1816_v30 = vsel %vm1810_vm0, %v1815_v42, 2147483647 }
 0x899   :  { %v1999_v43 = vpop.xlane.xlu0 %1998  ;;  %v1818_v35 = vshra.s32 %v1816_v30, 16  ;;  %v1817_v9 = vand.u32 65535, %v1816_v30 }
 0x89a   :  { %vm2000_vm1 = vcmp.ge.f32.partialorder %v1993_v21, %v1999_v43  ;;  %v2498_v43 = vld [vmem:[#allocation3 + $0x49d] ss:$0 sm:$0xff] }
 0x89b   :  { %v2001_v25 = vsel %vm2000_vm1, %v4330_v60, 128  ;;  %v1820_v40 = vcvt.s32.f32 %v1818_v35  ;;  %v1819_v14 = vcvt.s32.f32 %v1817_v9  ;;  %v1329_v35 = vadd.f32 %v2498_v43, %v4591_v17 }
 0x89c   :  { %v2002_v45 = vsel %vm1810_vm0, %v2001_v25, 2147483647 }
 0x89d   :  { %v2185_v46 = vpop.xlane.xlu0 %2184  ;;  %1821 = vmin.xlane.f32.xlu1 %v1820_v40  ;;  %v2004_v47 = vshra.s32 %v2002_v45, 16  ;;  %v2003_v19 = vand.u32 65535, %v2002_v45 }
 0x89e   :  { %vm2186_vm2 = vcmp.ge.f32.partialorder %v2179_v24, %v2185_v46 }
 0x89f   :  { %v2187_v48 = vsel %vm2186_vm2, %v4330_v60, 128  ;;  %v2006_v2 = vcvt.s32.f32 %v2004_v47  ;;  %v2005_v3 = vcvt.s32.f32 %v2003_v19 }
 0x8a0   :  { %v2188_v49 = vsel %vm1810_vm0, %v2187_v48, 2147483647 }
 0x8a1   :  { %2007 = vmin.xlane.f32.xlu1 %v2006_v2  ;;  %v2190_v50 = vshra.s32 %v2188_v49, 16  ;;  %v2189_v21 = vand.u32 65535, %v2188_v49 }
 0x8a3   :  { %v2192_v52 = vcvt.s32.f32 %v2190_v50 }
 0x8a5   :  { %2193 = vmin.xlane.f32.xlu1 %v2192_v52 }
 0x8b3   :  { %v1906_v54 = vpop.xlane.xlu1 %1905 }
 0x8b4   :  { %vm1907_vm3 = vcmp.ge.f32.partialorder %v1900_v1, %v1906_v54 }
 0x8b5   :  { %v1908_v55 = vsel %vm1907_vm3, %v4330_v60, 128 }
 0x8b6   :  { %v1909_v57 = vsel %vm1810_vm0, %v1908_v55, 2147483647 }
 0x8b7   :  { %v1911_v58 = vshra.s32 %v1909_v57, 16  ;;  %v1910_v27 = vand.u32 65535, %v1909_v57 }
 0x8b9   :  { %v1913_v59 = vcvt.s32.f32 %v1911_v58  ;;  %v1912_v28 = vcvt.s32.f32 %v1910_v27 }
 0x8bb   :  { %1914 = vmin.xlane.f32.xlu0 %v1913_v59 }
 0x8d3   :  { %v2092_v62 = vpop.xlane.xlu0 %2091 }
 0x8d4   :  { %vm2093_vm4 = vcmp.ge.f32.partialorder %v2086_v33, %v2092_v62 }
 0x8d5   :  { %v2094_v63 = vsel %vm2093_vm4, %v4330_v60, 128 }
 0x8d6   :  { %v2095_v4 = vsel %vm1810_vm0, %v2094_v63, 2147483647 }
 0x8d7   :  { %v2371_v6 = vpop.xlane.xlu0 %2370  ;;  %v2097_v8 = vshra.s32 %v2095_v4, 16  ;;  %v2096_v29 = vand.u32 65535, %v2095_v4 }
 0x8d8   :  { %vm2372_vm5 = vcmp.ge.f32.partialorder %v4793_v11, %v2371_v6  ;;  %v2191_v11 = vcvt.s32.f32 %v2189_v21 }
 0x8d9   :  { %v2373_v16 = vsel %vm2372_vm5, %v4330_v60, 128  ;;  %v2099_v13 = vcvt.s32.f32 %v2097_v8  ;;  %v2098_v32 = vcvt.s32.f32 %v2096_v29 }
 0x8da   :  { %v2374_v7 = vsel %vm1810_vm0, %v2373_v16, 2147483647 }
 0x8db   :  { %2100 = vmin.xlane.f32.xlu0 %v2099_v13  ;;  %v2376_v18 = vshra.s32 %v2374_v7, 16  ;;  %v2375_v33 = vand.u32 65535, %v2374_v7 }
 0x8dd   :  { %v2378_v15 = vcvt.s32.f32 %v2376_v18  ;;  %v2377_v12 = vcvt.s32.f32 %v2375_v33 }
 0x8df   :  { %2379 = vmin.xlane.f32.xlu1 %v2378_v15 }
 0x8f3   :  { %v2278_v10 = vpop.xlane.xlu1 %2277 }
 0x8f4   :  { %vm2279_vm6 = vcmp.ge.f32.partialorder %v2272_v37, %v2278_v10  ;;  %v2505_v37 = vld [vmem:[#allocation3 + $0x4a0] ss:$0 sm:$0xff] }
 0x8f5   :  { %v2280_v0 = vsel %vm2279_vm6, %v4330_v60, 128  ;;  %v1623_v38 = vadd.f32 %v2505_v37, %v4722_v56 }
 0x8f6   :  { %v2281_v51 = vsel %vm1810_vm0, %v2280_v0, 2147483647 }
 0x8f7   :  { %v2283_v61 = vshra.s32 %v2281_v51, 16  ;;  %v2282_v39 = vand.u32 65535, %v2281_v51 }
 0x8f9   :  { %v2285_v5 = vcvt.s32.f32 %v2283_v61  ;;  %v2284_v42 = vcvt.s32.f32 %v2282_v39 }
 0x8fb   :  { %2286 = vmin.xlane.f32.xlu0 %v2285_v5 }
 0x92a   :  { %v4819_v22 = vpop.xlane.xlu1 %1821 }
 0x92b   :  { %vm1823_vm14 = vcmp.eq.f32.partialorder %v1820_v40, %v4819_v22 }
 0x92c   :  { %v1824_v23 = vsel %vm1823_vm14, %v1819_v14, inf }
 0x92d   :  { %1825 = vmin.xlane.f32.xlu0 %v1824_v23 }
 0x92e   :  { %v4822_v26 = vpop.xlane.xlu1 %2007 }
 0x92f   :  { %vm2009_vm7 = vcmp.eq.f32.partialorder %v2006_v2, %v4822_v26 }
 0x930   :  { %v2010_v60 = vsel %vm2009_vm7, %v2005_v3, inf }
 0x931   :  { %2011 = vmin.xlane.f32.xlu0 %v2010_v60 }
 0x932   :  { %v4825_v24 = vpop.xlane.xlu1 %2193 }
 0x933   :  { %vm2195_vm8 = vcmp.eq.f32.partialorder %v2192_v52, %v4825_v24 }
 0x934   :  { %v2196_v20 = vsel %vm2195_vm8, %v2191_v11, inf }
 0x935   :  { %2197 = vmin.xlane.f32.xlu0 %v2196_v20 }
 0x948   :  { %v4828_v44 = vpop.xlane.xlu0 %1914 }
 0x949   :  { %vm1916_vm9 = vcmp.eq.f32.partialorder %v1913_v59, %v4828_v44 }
 0x94a   :  { %v1917_v1 = vsel %vm1916_vm9, %v1912_v28, inf }
 0x94b   :  { %1918 = vmin.xlane.f32.xlu1 %v1917_v1 }
 0x968   :  { %v4831_v53 = vpop.xlane.xlu0 %2100 }
 0x969   :  { %vm2102_vm11 = vcmp.eq.f32.partialorder %v2099_v13, %v4831_v53 }
 0x96a   :  { %v2103_v34 = vsel %vm2102_vm11, %v2098_v32, inf }
 0x96b   :  { %2104 = vmin.xlane.f32.xlu1 %v2103_v34 }
 0x96c   :  { %v4834_v31 = vpop.xlane.xlu1 %2379 }
 0x96d   :  { %vm2381_vm12 = vcmp.eq.f32.partialorder %v2378_v15, %v4834_v31 }
 0x96e   :  { %v2382_v36 = vsel %vm2381_vm12, %v2377_v12, inf }
 0x96f   :  { %2383 = vmin.xlane.f32.xlu0 %v2382_v36 }
 0x985   :  { %2401 = vrot.lane.b32.xlu0 %v1623_v38, %s4177_s20 }
 0x988   :  { %v4839_v41 = vpop.xlane.xlu0 %2286 }
 0x989   :  { %vm2288_vm13 = vcmp.eq.f32.partialorder %v2285_v5, %v4839_v41 }
 0x98a   :  { %v2289_v30 = vsel %vm2288_vm13, %v2284_v42, inf }
 0x98b   :  { %2290 = vmin.xlane.f32.xlu1 %v2289_v30 }
 0x99c   :  { %2395 = vrot.lane.b32.xlu1 %v1329_v35, %s4179_s21 }
 0x99d   :  { %4065 = shalt.err (!%p4062_p12)
}
 0x99e   :  { %s4066_s29 = scalar_lea.hbm %s4897_s4, 224 }
 0x99f   :  { %p4067_p13 = scmp.ne.s32.totalorder %s4897_s4, %s4066_s29  ;;  %p4070_p0 = scmp.lt.u32.totalorder %s4066_s29, %s4897_s4 }
 0x9a1   :  { %p4072_p1 = pnand %p4070_p0, %p4067_p13 }
 0x9a3   :  { %4075 = shalt.err (!%p4072_p1)
}
 0x9a4   :  { %2426 = dma.vmem_to_hbm [thread:$0]  %s2424_s23, 224, %s4897_s4, [#allocation8]  }
 0x9a5   :  { %s4076_s9 = scalar_lea.vmem %s2414_s25, 32  ;;  %p4081_p3 = scmp.lt.s32.totalorder %s2414_s25, %s2414_s25 }
 0x9a6   :  { %p4077_p2 = scmp.ne.s32.totalorder %s2414_s25, %s4076_s9  ;;  %p4082_p4 = scmp.lt.s32.totalorder %s4076_s9, %s4076_s9 }
 0x9a8   :  { %p4083_p5 = por %p4082_p4, %p4081_p3 }
 0x9aa   :  { %p4084_p6 = pnand %p4083_p5, %p4077_p2 }
 0x9ac   :  { %4087 = shalt.err (!%p4084_p6)
}
 0x9ad   :  { %s4088_s12 = scalar_lea.hbm %s4896_s3, 32 }
 0x9ae   :  { %p4089_p7 = scmp.ne.s32.totalorder %s4896_s3, %s4088_s12  ;;  %p4092_p8 = scmp.lt.u32.totalorder %s4088_s12, %s4896_s3 }
 0x9b0   :  { %p4094_p9 = pnand %p4092_p8, %p4089_p7 }
 0x9b2   :  { %4097 = shalt.err (!%p4094_p9)
}
 0x9b3   :  { %2416 = dma.vmem_to_hbm [thread:$0]  %s2414_s25, 32, %s4896_s3, [#allocation5]   ;;  %v1828_v17 = vcvt.f32.s32 %v4819_v22  ;;  %vm1831_vm0 = vcmask 1024   ;;  %v1921_v46 = vcvt.f32.s32 %v4828_v44  ;;  %v2014_v48 = vcvt.f32.s32 %v4822_v26 }
 0x9b4   :  { %vm1924_vm15 = vcmask 9224   ;;  %vm2017_vm1 = vcmask 17424   ;;  %v2107_v58 = vcvt.f32.s32 %v4831_v53  ;;  %v2200_v62 = vcvt.f32.s32 %v4825_v24  ;;  %s4182_s3 = smov [#allocation9]  }
 0x9b5   :  { %v1829_v25 = vshll.u32 %v1828_v17, 16  ;;  %v1922_v50 = vshll.u32 %v1921_v46, 16  ;;  %v2015_v54 = vshll.u32 %v2014_v48, 16  ;;  %vm2110_vm2 = vcmask 25624   ;;  %s2433_s18 = sshll.u32 %s4182_s3, 4  ;;  %s2434_s18 = int_to_ptr.vmem [resolvable:$true] %s2433_s18 }
 0x9b6   :  { %v2108_v6 = vshll.u32 %v2107_v58, 16  ;;  %v2201_v16 = vshll.u32 %v2200_v62, 16  ;;  %vm2203_vm3 = vcmask 33824   ;;  %v2293_v18 = vcvt.f32.s32 %v4839_v41  ;;  %s4098_s23 = scalar_lea.vmem %s2434_s18, 32  ;;  %p4103_p11 = scmp.lt.s32.totalorder %s2434_s18, %s2434_s18 }
 0x9b7   :  { %v2386_v10 = vcvt.f32.s32 %v4834_v31  ;;  %vm2398_vm4 = vcmask 517376   ;;  %vm2296_vm5 = vcmask 42024   ;;  %vm2389_vm6 = vcmask 50224   ;;  %p4099_p10 = scmp.ne.s32.totalorder %s2434_s18, %s4098_s23  ;;  %p4104_p12 = scmp.lt.s32.totalorder %s4098_s23, %s4098_s23 }
 0x9b8   :  { %v2294_v61 = vshll.u32 %v2293_v18, 16 }
 0x9b9   :  { %v2387_v9 = vshll.u32 %v2386_v10, 16  ;;  %p4105_p13 = por %p4104_p12, %p4103_p11 }
 0x9ba   :  { %v1826_v56 = vpop.xlane.xlu0 %1825 }
 0x9bb   :  { %v1827_v40 = vcvt.f32.s32 %v1826_v56  ;;  %p4106_p0 = pnand %p4105_p13, %p4099_p10 }
 0x9bd   :  { %v1830_v45 = vadd.s32 %v1829_v25, %v1827_v40 }
 0x9be   :  { %v2012_v47 = vpop.xlane.xlu0 %2011 }
 0x9bf   :  { %1832 = vst.msk [vmem:[#allocation9] sm:$0x3] %vm1831_vm0, %v1830_v45  ;;  %v2013_v2 = vcvt.f32.s32 %v2012_v47 }
 0x9c1   :  { %v2016_v57 = vadd.s32 %v2015_v54, %v2013_v2 }
 0x9c2   :  { %v2198_v59 = vpop.xlane.xlu0 %2197 }
 0x9c3   :  { %v2199_v63 = vcvt.f32.s32 %v2198_v59 }
 0x9c5   :  { %v2202_v7 = vadd.s32 %v2201_v16, %v2199_v63 }
 0x9d8   :  { %v1919_v49 = vpop.xlane.xlu1 %1918 }
 0x9d9   :  { %v1920_v52 = vcvt.f32.s32 %v1919_v49 }
 0x9db   :  { %v1923_v55 = vadd.s32 %v1922_v50, %v1920_v52 }
 0x9dd   :  { %1925 = vst.msk [vmem:[#allocation9] sm:$0x3] %vm1924_vm15, %v1923_v55 }
 0x9de   :  { %2018 = vst.msk [vmem:[#allocation9] sm:$0x3] %vm2017_vm1, %v2016_v57 }
 0x9f8   :  { %v2105_v4 = vpop.xlane.xlu1 %2104 }
 0x9f9   :  { %v2106_v8 = vcvt.f32.s32 %v2105_v4 }
 0x9fb   :  { %v2109_v13 = vadd.s32 %v2108_v6, %v2106_v8 }
 0x9fc   :  { %v2384_v15 = vpop.xlane.xlu0 %2383 }
 0x9fd   :  { %2111 = vst.msk [vmem:[#allocation9] sm:$0x3] %vm2110_vm2, %v2109_v13  ;;  %v2385_v0 = vcvt.f32.s32 %v2384_v15 }
 0x9fe   :  { %2204 = vst.msk [vmem:[#allocation9] sm:$0x3] %vm2203_vm3, %v2202_v7 }
 0x9ff   :  { %v2388_v14 = vadd.s32 %v2387_v9, %v2385_v0 }
 0xa00   :  { %v2402_v23 = vpop.permute.xlu0 %2401 }
 0xa18   :  { %v2291_v51 = vpop.xlane.xlu1 %2290 }
 0xa19   :  { %v2292_v5 = vcvt.f32.s32 %v2291_v51 }
 0xa1b   :  { %v2295_v22 = vadd.s32 %v2294_v61, %v2292_v5 }
 0xa1c   :  { %v2396_v19 = vpop.permute.xlu1 %2395 }
 0xa1d   :  { %2399 = vst.msk [vmem:[%s4895_s2] sm:$0x3] %vm2398_vm4, %v2396_v19 }
 0xa1e   :  { %2297 = vst.msk [vmem:[#allocation9] sm:$0x3] %vm2296_vm5, %v2295_v22 }
 0xa1f   :  { %2404 = vst.msk [vmem:[%s4895_s2] sm:$0x3] %vm1629_vm10, %v2402_v23 }
 0xa20   :  { %2390 = vst.msk [vmem:[#allocation9] sm:$0x3] %vm2389_vm6, %v2388_v14 }
 0xa21   :  { %4109 = shalt.err (!%p4106_p0)
}
 0xa22   :  { %s4110_s26 = scalar_lea.hbm %s4898_s5, 32 }
 0xa23   :  { %p4111_p1 = scmp.ne.s32.totalorder %s4898_s5, %s4110_s26  ;;  %p4114_p2 = scmp.lt.u32.totalorder %s4110_s26, %s4898_s5 }
 0xa25   :  { %p4116_p3 = pnand %p4114_p2, %p4111_p1 }
 0xa27   :  { %4119 = shalt.err (!%p4116_p3)
}
 0xa28   :  { %2436 = dma.vmem_to_hbm [thread:$0]  %s2434_s18, 32, %s4898_s5, [#allocation8]  }
 0xa29   :  { %4122 = dma.done.wait [#allocation5], 32  }
 0xa2a   :  { %4123 = vsyncadd [#allocation5], 4294967264 }
 0xa2b   :  { %4124 = dma.done.wait [#allocation8], 256  }
 0xa2c   :  { %4125 = vsyncadd [#allocation8], 4294967040 }
 0xa2d   :  { %2448 = vsyncpa [#allocation4], 1 }
 0xa2e   :  { %2449 = vsyncpa [#allocation5], 1 }
 0xa2f   :  { %2450 = vsyncpa [#allocation8], 1 }

</bundles_post_ra>
